<compile_context>
chip_gen: v5e
topology: v5e:2x2
jax: 0.10.0
libtpu: 0.0.40
codegen_flags: <defaults>
</compile_context>

<pallas_src>
import math
import numpy as np

import jax
import jax.numpy as jnp
from jax.experimental import pallas as pl
from jax.experimental.pallas import tpu as pltpu

F32 = jnp.float32

# ----------------------------- synthetic graph / model config -----------------------------
NTYPES = ["a", "b"]
N = 8                       # nodes per ntype
IN = 16                     # input feature dim per ntype
H = 32                      # hidden dim
L = 1                       # stacked HTGNN layers
T = 4                       # time window
TIMEFRAME = [f"t{i}" for i in range(T)]
RELATIONS = [("a", "aa", "a"), ("a", "ab", "b"), ("b", "ba", "a"), ("b", "bb", "b")]

NT = len(NTYPES)
R = len(RELATIONS)
NT_IDX = {nt: i for i, nt in enumerate(NTYPES)}
SRC_R = [NT_IDX[s] for (s, _e, _d) in RELATIONS]
DST_R = [NT_IDX[d] for (_s, _e, d) in RELATIONS]
NEG = -1e30
TN = T * N                  # 32 == H, also the row count of every activation slab


def positional_encoding(d_model, max_len):
    pe = np.zeros((max_len, d_model))
    for i in range(max_len):
        for k in range(0, d_model, 2):
            div_term = math.exp(k * -math.log(100000.0) / d_model)   # matches the PyTorch module
            pe[i][k] = math.sin((i + 1) * div_term)
            if k + 1 < d_model:
                pe[i][k + 1] = math.cos((i + 1) * div_term)
    return pe.astype(np.float32)


# ----------------------------- params-slab packer -----------------------------
class SlabPacker:
    """Packs named [rows, cols<=128] blocks into one [TOTAL, 128] f32 slab (8-row aligned)."""

    def __init__(self):
        self.blocks, self.offsets, self.row = [], {}, 0

    def add(self, name, arr):
        arr = np.asarray(arr, dtype=np.float32)
        if arr.ndim == 1:
            arr = arr[None, :]
        r, c = arr.shape
        assert c <= 128
        buf = np.zeros((r, 128), np.float32)
        buf[:, :c] = arr
        pad = (-self.row) % 8
        if pad:
            self.blocks.append(np.zeros((pad, 128), np.float32))
            self.row += pad
        self.offsets[name] = (self.row, r)
        self.blocks.append(buf)
        self.row += r

    def finish(self):
        pad = (-self.row) % 8
        if pad:
            self.blocks.append(np.zeros((pad, 128), np.float32))
            self.row += pad
        return np.concatenate(self.blocks, axis=0), self.offsets


# ----------------------------- raw parameter synthesis -----------------------------
def make_raw_params(key):
    ks = iter(jax.random.split(key, 32))

    def rnd(shape, scale=0.1):
        return np.asarray(scale * jax.random.normal(next(ks), shape), dtype=np.float32)

    return {
        "adapt_w": rnd((NT, IN, H)), "adapt_b": rnd((NT, H)),
        "gat_w": rnd((L, R, T, H, H)),
        "gat_al": rnd((L, R, T, H)), "gat_ar": rnd((L, R, T, H)), "gat_b": rnd((L, R, T, H)),
        "rel_w1": rnd((L, T, H, H)), "rel_b1": rnd((L, T, H)), "rel_w2": rnd((L, T, H)),
        "tmp_wp": rnd((L, NT, H, H)), "tmp_bp": rnd((L, NT, H)),
        "q_w": rnd((L, NT, H, H)), "k_w": rnd((L, NT, H, H)), "v_w": rnd((L, NT, H, H)),
        "fc_w": rnd((L, NT, H, H)), "fc_b": rnd((L, NT, H)),
        "res_w": rnd((L, NT, H, H)), "res_b": rnd((L, NT, H)),
        "res_gate": rnd((L, NT), scale=1.0),
        "ln_g": np.ones((L, NT, H), np.float32), "ln_b": np.zeros((L, NT, H), np.float32),
        "out_w": rnd((NT, H, IN)), "out_b": rnd((NT, IN)),
    }


# ----------------------------- params slab construction -----------------------------
def pack_params(P):
    pk = SlabPacker()

    # ---- layer-independent selector / broadcast constants ----
    exp_er = np.zeros((128, 128), np.float32)       # er (lanes 0:4 of EA) -> 32-lane relation block
    exp_el = np.zeros((128, 128), np.float32)       # el (lanes 4:8 of EA) -> 32-lane relation block
    for r in range(R):
        exp_er[r, r * H:(r + 1) * H] = 1.0
        exp_el[R + r, r * H:(r + 1) * H] = 1.0
    pk.add("EXP_ER", exp_er)
    pk.add("EXP_EL", exp_el)

    sel = np.zeros((TN, 128), np.float32)           # picks el[r,t,j] onto lane (r,t,j)
    for t in range(T):
        for j in range(N):
            for r in range(R):
                sel[t * N + j, r * TN + t * N + j] = 1.0
    pk.add("SEL", sel)

    pk.add("BLKSUM", np.kron(np.eye(R), np.ones((H, H))).astype(np.float32))   # per-relation lane block sum

    grp = np.zeros((128, 128), np.float32)          # relations sharing a dst ntype
    for r in range(R):
        for r2 in range(R):
            if DST_R[r] == DST_R[r2]:
                grp[r, r2] = 1.0
    pk.add("GRP", grp)

    obs = np.zeros((128, 128), np.float32)          # 32-lane block sum into lane r
    for c in range(128):
        obs[c, c // H] = 1.0
    pk.add("OBS", obs)

    sumsel = np.zeros((128, 128), np.float32)       # (r,h) -> (dst ntype, h) sum
    for r in range(R):
        for h in range(H):
            sumsel[r * H + h, DST_R[r] * H + h] = 1.0
    pk.add("SUMSEL", sumsel)

    mean2 = np.zeros((128, 128), np.float32)        # per-ntype 32-lane block mean (LayerNorm)
    for nt in range(NT):
        mean2[nt * H:(nt + 1) * H, nt * H:(nt + 1) * H] = 1.0 / H
    pk.add("MEAN2", mean2)

    gmask = np.zeros((NT, 128), np.float32)         # relation group masks (by dst ntype)
    for r in range(R):
        gmask[DST_R[r], r] = 1.0
    pk.add("GMSK_A", gmask[0])
    pk.add("GMSK_B", gmask[1])

    cbm = np.zeros((TN, 128), np.float32)           # per-time-block node mean
    for t in range(T):
        cbm[t * N:(t + 1) * N, t * N:(t + 1) * N] = 1.0 / N
    pk.add("CBM", cbm)

    tmask = np.zeros((TN, 128), np.float32)         # temporal attention: same-node mask
    for t in range(T):
        for i in range(N):
            for t2 in range(T):
                tmask[t * N + i, t2 * N + i] = 1.0
    pk.add("TMASK", tmask)

    # ---- adaption layer (block-diagonal over ntype, batched over time) ----
    wad = np.zeros((128, 128), np.float32)
    bad = np.zeros((128,), np.float32)
    for nt in range(NT):
        wad[nt * IN:(nt + 1) * IN, nt * H:(nt + 1) * H] = P["adapt_w"][nt]
        bad[nt * H:(nt + 1) * H] = P["adapt_b"][nt]
    pk.add("WAD", wad)
    pk.add("BAD", bad)

    pe = positional_encoding(H, T)                  # [T, H]

    # ---- per-layer weights ----
    for li in range(L):
        for t in range(T):
            wz = np.zeros((128, 128), np.float32)   # relation-packed GAT projection for time t
            wa = np.zeros((128, 128), np.float32)   # folded attention vectors (er cols 0:4, el 4:8)
            for r in range(R):
                s, d = SRC_R[r], DST_R[r]
                wz[s * H:(s + 1) * H, r * H:(r + 1) * H] = P["gat_w"][li, r, t]
                wa[d * H:(d + 1) * H, r] = P["gat_w"][li, r, t] @ P["gat_ar"][li, r, t]
                wa[s * H:(s + 1) * H, R + r] = P["gat_w"][li, r, t] @ P["gat_al"][li, r, t]
            pk.add(f"WZ{li}_{t}", wz)
            pk.add(f"WA{li}_{t}", wa)

        gb = np.zeros((TN, 128), np.float32)        # GATConv bias, broadcast over nodes
        for t in range(T):
            for r in range(R):
                gb[t * N:(t + 1) * N, r * H:(r + 1) * H] = P["gat_b"][li, r, t]
        pk.add(f"GB{li}", gb)

        for t in range(T):
            w1 = np.zeros((128, 128), np.float32)   # RelationAgg first linear, block-diag over r
            for r in range(R):
                w1[r * H:(r + 1) * H, r * H:(r + 1) * H] = P["rel_w1"][li, t]
            pk.add(f"W1{li}_{t}", w1)
        b1 = np.zeros((TN, 128), np.float32)
        w2 = np.zeros((TN, 128), np.float32)
        for t in range(T):
            for r in range(R):
                b1[t * N:(t + 1) * N, r * H:(r + 1) * H] = P["rel_b1"][li, t]
                w2[t * N:(t + 1) * N, r * H:(r + 1) * H] = P["rel_w2"][li, t]
        pk.add(f"B1{li}", b1)
        pk.add(f"W2{li}", w2)

        wp = np.zeros((128, 128), np.float32)
        wqk = np.zeros((128, 128), np.float32)
        wv = np.zeros((128, 128), np.float32)
        wfc = np.zeros((NT * H, 128), np.float32)
        wres = np.zeros((128, 128), np.float32)
        for nt in range(NT):
            sl = slice(nt * H, (nt + 1) * H)
            wp[sl, sl] = P["tmp_wp"][li, nt]
            wqk[sl, sl] = P["q_w"][li, nt]
            wqk[sl, NT * H + nt * H:NT * H + (nt + 1) * H] = P["k_w"][li, nt]
            wv[sl, sl] = P["v_w"][li, nt]
            wfc[sl, sl] = P["fc_w"][li, nt]
            wres[sl, sl] = P["res_w"][li, nt]
        pk.add(f"WP{li}", wp)

        bppe = np.zeros((TN, 128), np.float32)      # proj bias + positional encoding (host fused)
        for t in range(T):
            for nt in range(NT):
                bppe[t * N:(t + 1) * N, nt * H:(nt + 1) * H] = P["tmp_bp"][li, nt] + pe[t]
        pk.add(f"BPPE{li}", bppe)
        pk.add(f"WQK{li}", wqk)
        pk.add(f"WV{li}", wv)
        pk.add(f"WFC{li}", wfc)

        bfc = np.zeros((128,), np.float32)
        bres = np.zeros((128,), np.float32)
        alpha = np.zeros((128,), np.float32)        # sigmoid(res_weight) hoisted to host
        gln = np.zeros((128,), np.float32)
        bln = np.zeros((128,), np.float32)
        for nt in range(NT):
            sl = slice(nt * H, (nt + 1) * H)
            bfc[sl] = P["fc_b"][li, nt]
            bres[sl] = P["res_b"][li, nt]
            alpha[sl] = 1.0 / (1.0 + math.exp(-float(P["res_gate"][li, nt])))
            gln[sl] = P["ln_g"][li, nt]
            bln[sl] = P["ln_b"][li, nt]
        pk.add(f"BFC{li}", bfc)
        pk.add(f"WRES{li}", wres)
        pk.add(f"BRES{li}", bres)
        pk.add(f"ALPHA{li}", alpha)
        pk.add(f"GLN{li}", gln)
        pk.add(f"BLN{li}", bln)

    # ---- output projection ----
    wout = np.zeros((128, 128), np.float32)
    bout = np.zeros((128,), np.float32)
    for nt in range(NT):
        wout[nt * H:(nt + 1) * H, nt * IN:(nt + 1) * IN] = P["out_w"][nt]
        bout[nt * IN:(nt + 1) * IN] = P["out_b"][nt]
    pk.add("WOUT", wout)
    pk.add("BOUT", bout)

    slab, offs = pk.finish()
    return jnp.asarray(slab), offs


# ----------------------------- graph / data slab construction -----------------------------
def make_graph(key):
    kx, ka = jax.random.split(key)
    x = np.asarray(jax.random.normal(kx, (NT, T, N, IN)), np.float32)
    a = np.asarray(jax.random.uniform(ka, (R, T, N, N)) < 0.4, np.float32)
    adj = np.maximum(a, np.eye(N, dtype=np.float32))     # [dst, src], guarantee in-degree >= 1
    return x, adj


def pack_data(x, adj):
    d = np.zeros((2 * TN, 128), np.float32)
    for nt in range(NT):
        for t in range(T):
            d[t * N:(t + 1) * N, nt * IN:(nt + 1) * IN] = x[nt, t]           # features
    for r in range(R):
        for t in range(T):
            d[TN + t * N:TN + (t + 1) * N,
              r * TN + t * N:r * TN + (t + 1) * N] = adj[r, t]               # packed adjacency mask
    return jnp.asarray(d)


# ----------------------------- the fused forward kernel -----------------------------
def make_kernel(offs):
    def kernel(p_ref, d_ref, o_ref):
        def W(name):
            o, r = offs[name]
            return p_ref[o:o + r, :]

        x = d_ref[0:TN, :]                      # [32,128]  features (lanes 0:32 used)
        adjm = d_ref[TN:2 * TN, :]              # [32,128]  adjacency mask, lanes = (r, t', j_src)

        exp_er = W("EXP_ER"); exp_el = W("EXP_EL"); sel = W("SEL")
        blksum = W("BLKSUM"); grp = W("GRP"); obs = W("OBS")
        sumsel = W("SUMSEL"); mean2 = W("MEAN2")
        gmsk_a = W("GMSK_A"); gmsk_b = W("GMSK_B")
        cbm = W("CBM")[:, 0:TN]                 # [32,32]
        tmask = W("TMASK")[:, 0:TN]             # [32,32]

        # ---- adaption: both ntypes x all time steps in one block-diagonal matmul ----
        feat = jnp.dot(x, W("WAD"), preferred_element_type=F32) + W("BAD")   # [32,128] lanes 0:64

        for li in range(L):
            f_in = feat

            # ---- intra-relation GAT: projections packed per time, one fused edge softmax ----
            z_parts, a_parts = [], []
            for t in range(T):
                ft = f_in[t * N:(t + 1) * N, :]
                z_parts.append(jnp.dot(ft, W(f"WZ{li}_{t}"), preferred_element_type=F32))
                a_parts.append(jnp.dot(ft, W(f"WA{li}_{t}"), preferred_element_type=F32))
            z_src = jnp.concatenate(z_parts, axis=0)          # [32,128] lanes = (r, h)
            ea = jnp.concatenate(a_parts, axis=0)             # [32,128] cols 0:4 er, 4:8 el

            er_b = jnp.dot(ea, exp_er, preferred_element_type=F32)           # er broadcast per r-block
            el_bt = jnp.dot(ea, exp_el, preferred_element_type=F32)
            el_row = jnp.sum(el_bt * sel, axis=0, keepdims=True)             # [1,128]: el[r,t',j]

            lg = er_b + el_row
            lg = jnp.where(lg > 0, lg, 0.2 * lg)                             # LeakyReLU(0.2)
            lg = jnp.where(adjm > 0, lg, NEG)
            m = jnp.max(lg, axis=-1, keepdims=True)
            pgat = jnp.where(adjm > 0, jnp.exp(lg - m), 0.0)
            den = jnp.maximum(jnp.dot(pgat, blksum, preferred_element_type=F32), 1e-30)
            nums = [jnp.dot(pgat[:, r * H:(r + 1) * H], z_src[:, r * H:(r + 1) * H],
                            preferred_element_type=F32) for r in range(R)]
            intra = jnp.concatenate(nums, axis=1) / den + W(f"GB{li}")        # [32,128] (r,h)

            # ---- inter-relation aggregation (RelationAgg), batched over relations & ntypes ----
            z1 = jnp.concatenate(
                [jnp.dot(intra[t * N:(t + 1) * N, :], W(f"W1{li}_{t}"),
                         preferred_element_type=F32) for t in range(T)], axis=0) + W(f"B1{li}")
            z1 = jnp.tanh(z1)
            s_rel = jnp.dot(z1 * W(f"W2{li}"), obs, preferred_element_type=F32)   # [32,128] cols 0:4
            sc = jnp.dot(cbm, s_rel, preferred_element_type=F32)                   # node-mean per (t,r)
            m_a = jnp.max(jnp.where(gmsk_a > 0, sc, NEG), axis=-1, keepdims=True)
            m_b = jnp.max(jnp.where(gmsk_b > 0, sc, NEG), axis=-1, keepdims=True)
            m_g = gmsk_a * m_a + gmsk_b * m_b
            e_g = jnp.where((gmsk_a + gmsk_b) > 0, jnp.exp(sc - m_g), 0.0)
            den_g = jnp.maximum(jnp.dot(e_g, grp, preferred_element_type=F32), 1e-30)
            beta = jnp.dot(e_g / den_g, exp_er, preferred_element_type=F32)         # beta per (t,r) bcast
            f_int = jnp.dot(intra * beta, sumsel, preferred_element_type=F32)       # [32,128] lanes 0:64

            # ---- cross-time aggregation (TemporalAgg) ----
            hproj = jnp.dot(f_int, W(f"WP{li}"), preferred_element_type=F32) + W(f"BPPE{li}")
            qk = jnp.dot(hproj, W(f"WQK{li}"), preferred_element_type=F32)    # q 0:64 | k 64:128
            vv = jnp.dot(hproj, W(f"WV{li}"), preferred_element_type=F32)     # v 0:64
            ctxs = []
            for nt in range(NT):
                q = qk[:, nt * H:(nt + 1) * H]
                k = qk[:, NT * H + nt * H:NT * H + (nt + 1) * H]
                v = vv[:, nt * H:(nt + 1) * H]
                lgt = jnp.dot(q, k.T, preferred_element_type=F32)             # [32,32] (no 1/sqrt(H), as in ref)
                lgt = jnp.where(tmask > 0, lgt, NEG)
                mt = jnp.max(lgt, axis=-1, keepdims=True)
                pt = jnp.where(tmask > 0, jnp.exp(lgt - mt), 0.0)
                dt = jnp.sum(pt, axis=-1, keepdims=True)
                ctxs.append(jnp.dot(pt / dt, v, preferred_element_type=F32))
            ctx = jnp.concatenate(ctxs, axis=1)                               # [32,64]
            h_att = jnp.maximum(
                jnp.dot(ctx, W(f"WFC{li}"), preferred_element_type=F32) + W(f"BFC{li}"), 0.0)

            # ---- gated residual (alpha = sigmoid(res_weight), precomputed on host) + LayerNorm ----
            res = jnp.dot(f_in, W(f"WRES{li}"), preferred_element_type=F32) + W(f"BRES{li}")
            alpha = W(f"ALPHA{li}")
            y = h_att * alpha + res * (1.0 - alpha)
            mu = jnp.dot(y, mean2, preferred_element_type=F32)
            dlt = y - mu
            var = jnp.dot(dlt * dlt, mean2, preferred_element_type=F32)
            feat = dlt * jax.lax.rsqrt(var + 1e-5) * W(f"GLN{li}") + W(f"BLN{li}")

        # ---- output projection, lane-dense [32,128] store ----
        out = jnp.dot(feat, W("WOUT"), preferred_element_type=F32) + W("BOUT")
        o_ref[...] = out

    return kernel


# ----------------------------- host-side wrapper -----------------------------
def build_forward(offs):
    kernel = make_kernel(offs)
    vmem = pl.BlockSpec(memory_space=pltpu.MemorySpace.VMEM)
    call = pl.pallas_call(
        kernel,
        out_shape=jax.ShapeDtypeStruct((TN, 128), F32),
        in_specs=[vmem, vmem],
        out_specs=vmem,
    )

    @jax.jit
    def forward(pslab, dslab):
        packed = call(pslab, dslab)
        out = {}
        for i_nt, nt in enumerate(NTYPES):
            out[nt] = {}
            for i_t, tt in enumerate(TIMEFRAME):
                out[nt][tt] = packed[i_t * N:(i_t + 1) * N, i_nt * IN:(i_nt + 1) * IN]
        return out

    return forward


# ----------------------------- main -----------------------------
if __name__ == "__main__":
    key = jax.random.PRNGKey(0)
    kp, kg = jax.random.split(key)

    raw_params = make_raw_params(kp)
    pslab, offs = pack_params(raw_params)
    x, adj = make_graph(kg)
    dslab = pack_data(x, adj)

    forward = build_forward(offs)
    out = forward(pslab, dslab)
    out = jax.block_until_ready(out)

    for nt in NTYPES:
        for tt in TIMEFRAME:
            assert out[nt][tt].shape == (N, IN)
            assert bool(jnp.all(jnp.isfinite(out[nt][tt])))
    print("KERNEL_OK")
</pallas_src>

<mosaic_0001>
module attributes {stable_mosaic.version = 11 : i64} {
  func.func @kernel(%arg0: memref<3560x128xf32, #tpu.memory_space<vmem>>, %arg1: memref<64x128xf32, #tpu.memory_space<vmem>>, %arg2: memref<32x128xf32, #tpu.memory_space<vmem>>) attributes {dimension_semantics = [], scalar_prefetch = 0 : i64, scratch_operands = 0 : i64, tpu.core_type = #tpu.core_type<tc>} {
    %c0 = arith.constant 0 : index
    %c0_0 = arith.constant 0 : index
    %0 = vector.load %arg1[%c0, %c0_0] : memref<64x128xf32, #tpu.memory_space<vmem>>, vector<32x128xf32>
    %c32 = arith.constant 32 : index
    %c0_1 = arith.constant 0 : index
    %1 = vector.load %arg1[%c32, %c0_1] : memref<64x128xf32, #tpu.memory_space<vmem>>, vector<32x128xf32>
    %c0_2 = arith.constant 0 : index
    %c0_3 = arith.constant 0 : index
    %2 = vector.load %arg0[%c0_2, %c0_3] : memref<3560x128xf32, #tpu.memory_space<vmem>>, vector<128x128xf32>
    %c128 = arith.constant 128 : index
    %c0_4 = arith.constant 0 : index
    %3 = vector.load %arg0[%c128, %c0_4] : memref<3560x128xf32, #tpu.memory_space<vmem>>, vector<128x128xf32>
    %c256 = arith.constant 256 : index
    %c0_5 = arith.constant 0 : index
    %4 = vector.load %arg0[%c256, %c0_5] : memref<3560x128xf32, #tpu.memory_space<vmem>>, vector<32x128xf32>
    %c288 = arith.constant 288 : index
    %c0_6 = arith.constant 0 : index
    %5 = vector.load %arg0[%c288, %c0_6] : memref<3560x128xf32, #tpu.memory_space<vmem>>, vector<128x128xf32>
    %c416 = arith.constant 416 : index
    %c0_7 = arith.constant 0 : index
    %6 = vector.load %arg0[%c416, %c0_7] : memref<3560x128xf32, #tpu.memory_space<vmem>>, vector<128x128xf32>
    %c544 = arith.constant 544 : index
    %c0_8 = arith.constant 0 : index
    %7 = vector.load %arg0[%c544, %c0_8] : memref<3560x128xf32, #tpu.memory_space<vmem>>, vector<128x128xf32>
    %c672 = arith.constant 672 : index
    %c0_9 = arith.constant 0 : index
    %8 = vector.load %arg0[%c672, %c0_9] : memref<3560x128xf32, #tpu.memory_space<vmem>>, vector<128x128xf32>
    %c800 = arith.constant 800 : index
    %c0_10 = arith.constant 0 : index
    %9 = vector.load %arg0[%c800, %c0_10] : memref<3560x128xf32, #tpu.memory_space<vmem>>, vector<128x128xf32>
    %c928 = arith.constant 928 : index
    %c0_11 = arith.constant 0 : index
    %10 = vector.load %arg0[%c928, %c0_11] : memref<3560x128xf32, #tpu.memory_space<vmem>>, vector<1x128xf32>
    %c936 = arith.constant 936 : index
    %c0_12 = arith.constant 0 : index
    %11 = vector.load %arg0[%c936, %c0_12] : memref<3560x128xf32, #tpu.memory_space<vmem>>, vector<1x128xf32>
    %c944 = arith.constant 944 : index
    %c0_13 = arith.constant 0 : index
    %12 = vector.load %arg0[%c944, %c0_13] : memref<3560x128xf32, #tpu.memory_space<vmem>>, vector<32x128xf32>
    %13 = vector.extract_strided_slice %12 {offsets = [0, 0], sizes = [32, 32], strides = [1, 1]} : vector<32x128xf32> to vector<32x32xf32>
    %c976 = arith.constant 976 : index
    %c0_14 = arith.constant 0 : index
    %14 = vector.load %arg0[%c976, %c0_14] : memref<3560x128xf32, #tpu.memory_space<vmem>>, vector<32x128xf32>
    %15 = vector.extract_strided_slice %14 {offsets = [0, 0], sizes = [32, 32], strides = [1, 1]} : vector<32x128xf32> to vector<32x32xf32>
    %c1008 = arith.constant 1008 : index
    %c0_15 = arith.constant 0 : index
    %16 = vector.load %arg0[%c1008, %c0_15] : memref<3560x128xf32, #tpu.memory_space<vmem>>, vector<128x128xf32>
    %cst = arith.constant dense<0.000000e+00> : vector<32x128xf32>
    %17 = tpu.matmul %0, %16, %cst {dimension_numbers = #tpu.dot_dimension_numbers<[1], [0], [0], [1], [0, 0, 1, 1], [], []>} : vector<32x128xf32>, vector<128x128xf32>, vector<32x128xf32> -> vector<32x128xf32>
    %c1136 = arith.constant 1136 : index
    %c0_16 = arith.constant 0 : index
    %18 = vector.load %arg0[%c1136, %c0_16] : memref<3560x128xf32, #tpu.memory_space<vmem>>, vector<1x128xf32>
    %19 = vector.broadcast %18 : vector<1x128xf32> to vector<32x128xf32>
    %20 = arith.addf %17, %19 : vector<32x128xf32>
    %21 = vector.extract_strided_slice %20 {offsets = [0, 0], sizes = [8, 128], strides = [1, 1]} : vector<32x128xf32> to vector<8x128xf32>
    %c1144 = arith.constant 1144 : index
    %c0_17 = arith.constant 0 : index
    %22 = vector.load %arg0[%c1144, %c0_17] : memref<3560x128xf32, #tpu.memory_space<vmem>>, vector<128x128xf32>
    %cst_18 = arith.constant dense<0.000000e+00> : vector<8x128xf32>
    %23 = tpu.matmul %21, %22, %cst_18 {dimension_numbers = #tpu.dot_dimension_numbers<[1], [0], [0], [1], [0, 0, 1, 1], [], []>} : vector<8x128xf32>, vector<128x128xf32>, vector<8x128xf32> -> vector<8x128xf32>
    %c1272 = arith.constant 1272 : index
    %c0_19 = arith.constant 0 : index
    %24 = vector.load %arg0[%c1272, %c0_19] : memref<3560x128xf32, #tpu.memory_space<vmem>>, vector<128x128xf32>
    %cst_20 = arith.constant dense<0.000000e+00> : vector<8x128xf32>
    %25 = tpu.matmul %21, %24, %cst_20 {dimension_numbers = #tpu.dot_dimension_numbers<[1], [0], [0], [1], [0, 0, 1, 1], [], []>} : vector<8x128xf32>, vector<128x128xf32>, vector<8x128xf32> -> vector<8x128xf32>
    %26 = vector.extract_strided_slice %20 {offsets = [8, 0], sizes = [8, 128], strides = [1, 1]} : vector<32x128xf32> to vector<8x128xf32>
    %c1400 = arith.constant 1400 : index
    %c0_21 = arith.constant 0 : index
    %27 = vector.load %arg0[%c1400, %c0_21] : memref<3560x128xf32, #tpu.memory_space<vmem>>, vector<128x128xf32>
    %cst_22 = arith.constant dense<0.000000e+00> : vector<8x128xf32>
    %28 = tpu.matmul %26, %27, %cst_22 {dimension_numbers = #tpu.dot_dimension_numbers<[1], [0], [0], [1], [0, 0, 1, 1], [], []>} : vector<8x128xf32>, vector<128x128xf32>, vector<8x128xf32> -> vector<8x128xf32>
    %c1528 = arith.constant 1528 : index
    %c0_23 = arith.constant 0 : index
    %29 = vector.load %arg0[%c1528, %c0_23] : memref<3560x128xf32, #tpu.memory_space<vmem>>, vector<128x128xf32>
    %cst_24 = arith.constant dense<0.000000e+00> : vector<8x128xf32>
    %30 = tpu.matmul %26, %29, %cst_24 {dimension_numbers = #tpu.dot_dimension_numbers<[1], [0], [0], [1], [0, 0, 1, 1], [], []>} : vector<8x128xf32>, vector<128x128xf32>, vector<8x128xf32> -> vector<8x128xf32>
    %31 = vector.extract_strided_slice %20 {offsets = [16, 0], sizes = [8, 128], strides = [1, 1]} : vector<32x128xf32> to vector<8x128xf32>
    %c1656 = arith.constant 1656 : index
    %c0_25 = arith.constant 0 : index
    %32 = vector.load %arg0[%c1656, %c0_25] : memref<3560x128xf32, #tpu.memory_space<vmem>>, vector<128x128xf32>
    %cst_26 = arith.constant dense<0.000000e+00> : vector<8x128xf32>
    %33 = tpu.matmul %31, %32, %cst_26 {dimension_numbers = #tpu.dot_dimension_numbers<[1], [0], [0], [1], [0, 0, 1, 1], [], []>} : vector<8x128xf32>, vector<128x128xf32>, vector<8x128xf32> -> vector<8x128xf32>
    %c1784 = arith.constant 1784 : index
    %c0_27 = arith.constant 0 : index
    %34 = vector.load %arg0[%c1784, %c0_27] : memref<3560x128xf32, #tpu.memory_space<vmem>>, vector<128x128xf32>
    %cst_28 = arith.constant dense<0.000000e+00> : vector<8x128xf32>
    %35 = tpu.matmul %31, %34, %cst_28 {dimension_numbers = #tpu.dot_dimension_numbers<[1], [0], [0], [1], [0, 0, 1, 1], [], []>} : vector<8x128xf32>, vector<128x128xf32>, vector<8x128xf32> -> vector<8x128xf32>
    %36 = vector.extract_strided_slice %20 {offsets = [24, 0], sizes = [8, 128], strides = [1, 1]} : vector<32x128xf32> to vector<8x128xf32>
    %c1912 = arith.constant 1912 : index
    %c0_29 = arith.constant 0 : index
    %37 = vector.load %arg0[%c1912, %c0_29] : memref<3560x128xf32, #tpu.memory_space<vmem>>, vector<128x128xf32>
    %cst_30 = arith.constant dense<0.000000e+00> : vector<8x128xf32>
    %38 = tpu.matmul %36, %37, %cst_30 {dimension_numbers = #tpu.dot_dimension_numbers<[1], [0], [0], [1], [0, 0, 1, 1], [], []>} : vector<8x128xf32>, vector<128x128xf32>, vector<8x128xf32> -> vector<8x128xf32>
    %c2040 = arith.constant 2040 : index
    %c0_31 = arith.constant 0 : index
    %39 = vector.load %arg0[%c2040, %c0_31] : memref<3560x128xf32, #tpu.memory_space<vmem>>, vector<128x128xf32>
    %cst_32 = arith.constant dense<0.000000e+00> : vector<8x128xf32>
    %40 = tpu.matmul %36, %39, %cst_32 {dimension_numbers = #tpu.dot_dimension_numbers<[1], [0], [0], [1], [0, 0, 1, 1], [], []>} : vector<8x128xf32>, vector<128x128xf32>, vector<8x128xf32> -> vector<8x128xf32>
    %41 = tpu.concatenate %23, %28, %33, %38 in 0 : vector<8x128xf32>, vector<8x128xf32>, vector<8x128xf32>, vector<8x128xf32> -> vector<32x128xf32>
    %42 = tpu.concatenate %25, %30, %35, %40 in 0 : vector<8x128xf32>, vector<8x128xf32>, vector<8x128xf32>, vector<8x128xf32> -> vector<32x128xf32>
    %cst_33 = arith.constant dense<0.000000e+00> : vector<32x128xf32>
    %43 = tpu.matmul %42, %2, %cst_33 {dimension_numbers = #tpu.dot_dimension_numbers<[1], [0], [0], [1], [0, 0, 1, 1], [], []>} : vector<32x128xf32>, vector<128x128xf32>, vector<32x128xf32> -> vector<32x128xf32>
    %cst_34 = arith.constant dense<0.000000e+00> : vector<32x128xf32>
    %44 = tpu.matmul %42, %3, %cst_34 {dimension_numbers = #tpu.dot_dimension_numbers<[1], [0], [0], [1], [0, 0, 1, 1], [], []>} : vector<32x128xf32>, vector<128x128xf32>, vector<32x128xf32> -> vector<32x128xf32>
    %45 = arith.mulf %44, %4 : vector<32x128xf32>
    %cst_35 = arith.constant dense<0.000000e+00> : vector<128xf32>
    %46 = vector.multi_reduction <add>, %45, %cst_35 [0] : vector<32x128xf32> to vector<128xf32>
    %47 = vector.shape_cast %46 : vector<128xf32> to vector<1x128xf32>
    %48 = vector.broadcast %47 : vector<1x128xf32> to vector<32x128xf32>
    %49 = arith.addf %43, %48 : vector<32x128xf32>
    %cst_36 = arith.constant 0.000000e+00 : f32
    %50 = vector.broadcast %cst_36 : f32 to vector<32x128xf32>
    %51 = arith.cmpf ogt, %49, %50 : vector<32x128xf32>
    %cst_37 = arith.constant 2.000000e-01 : f32
    %52 = vector.broadcast %cst_37 : f32 to vector<32x128xf32>
    %53 = arith.mulf %52, %49 : vector<32x128xf32>
    %54 = arith.select %51, %49, %53 : vector<32x128xi1>, vector<32x128xf32>
    %cst_38 = arith.constant 0.000000e+00 : f32
    %55 = vector.broadcast %cst_38 : f32 to vector<32x128xf32>
    %56 = arith.cmpf ogt, %1, %55 : vector<32x128xf32>
    %cst_39 = arith.constant -1.000000e+30 : f32
    %57 = vector.broadcast %cst_39 : f32 to vector<32x128xf32>
    %58 = arith.select %56, %54, %57 : vector<32x128xi1>, vector<32x128xf32>
    %cst_40 = arith.constant dense<0xFF800000> : vector<32xf32>
    %59 = vector.multi_reduction <maximumf>, %58, %cst_40 [1] : vector<32x128xf32> to vector<32xf32>
    %60 = vector.shape_cast %59 : vector<32xf32> to vector<32x1xf32>
    %cst_41 = arith.constant 0.000000e+00 : f32
    %61 = vector.broadcast %cst_41 : f32 to vector<32x128xf32>
    %62 = arith.cmpf ogt, %1, %61 : vector<32x128xf32>
    %63 = vector.broadcast %60 : vector<32x1xf32> to vector<32x128xf32>
    %64 = arith.subf %58, %63 : vector<32x128xf32>
    %65 = math.exp %64 : vector<32x128xf32>
    %cst_42 = arith.constant 0.000000e+00 : f32
    %66 = vector.broadcast %cst_42 : f32 to vector<32x128xf32>
    %67 = arith.select %62, %65, %66 : vector<32x128xi1>, vector<32x128xf32>
    %cst_43 = arith.constant dense<0.000000e+00> : vector<32x128xf32>
    %68 = tpu.matmul %67, %5, %cst_43 {dimension_numbers = #tpu.dot_dimension_numbers<[1], [0], [0], [1], [0, 0, 1, 1], [], []>} : vector<32x128xf32>, vector<128x128xf32>, vector<32x128xf32> -> vector<32x128xf32>
    %cst_44 = arith.constant 1.000000e-30 : f32
    %69 = vector.broadcast %cst_44 : f32 to vector<32x128xf32>
    %70 = arith.maximumf %68, %69 : vector<32x128xf32>
    %71 = vector.extract_strided_slice %67 {offsets = [0, 0], sizes = [32, 32], strides = [1, 1]} : vector<32x128xf32> to vector<32x32xf32>
    %72 = vector.extract_strided_slice %41 {offsets = [0, 0], sizes = [32, 32], strides = [1, 1]} : vector<32x128xf32> to vector<32x32xf32>
    %cst_45 = arith.constant dense<0.000000e+00> : vector<32x32xf32>
    %73 = tpu.matmul %71, %72, %cst_45 {dimension_numbers = #tpu.dot_dimension_numbers<[1], [0], [0], [1], [0, 0, 1, 1], [], []>} : vector<32x32xf32>, vector<32x32xf32>, vector<32x32xf32> -> vector<32x32xf32>
    %74 = vector.extract_strided_slice %67 {offsets = [0, 32], sizes = [32, 32], strides = [1, 1]} : vector<32x128xf32> to vector<32x32xf32>
    %75 = vector.extract_strided_slice %41 {offsets = [0, 32], sizes = [32, 32], strides = [1, 1]} : vector<32x128xf32> to vector<32x32xf32>
    %cst_46 = arith.constant dense<0.000000e+00> : vector<32x32xf32>
    %76 = tpu.matmul %74, %75, %cst_46 {dimension_numbers = #tpu.dot_dimension_numbers<[1], [0], [0], [1], [0, 0, 1, 1], [], []>} : vector<32x32xf32>, vector<32x32xf32>, vector<32x32xf32> -> vector<32x32xf32>
    %77 = vector.extract_strided_slice %67 {offsets = [0, 64], sizes = [32, 32], strides = [1, 1]} : vector<32x128xf32> to vector<32x32xf32>
    %78 = vector.extract_strided_slice %41 {offsets = [0, 64], sizes = [32, 32], strides = [1, 1]} : vector<32x128xf32> to vector<32x32xf32>
    %cst_47 = arith.constant dense<0.000000e+00> : vector<32x32xf32>
    %79 = tpu.matmul %77, %78, %cst_47 {dimension_numbers = #tpu.dot_dimension_numbers<[1], [0], [0], [1], [0, 0, 1, 1], [], []>} : vector<32x32xf32>, vector<32x32xf32>, vector<32x32xf32> -> vector<32x32xf32>
    %80 = vector.extract_strided_slice %67 {offsets = [0, 96], sizes = [32, 32], strides = [1, 1]} : vector<32x128xf32> to vector<32x32xf32>
    %81 = vector.extract_strided_slice %41 {offsets = [0, 96], sizes = [32, 32], strides = [1, 1]} : vector<32x128xf32> to vector<32x32xf32>
    %cst_48 = arith.constant dense<0.000000e+00> : vector<32x32xf32>
    %82 = tpu.matmul %80, %81, %cst_48 {dimension_numbers = #tpu.dot_dimension_numbers<[1], [0], [0], [1], [0, 0, 1, 1], [], []>} : vector<32x32xf32>, vector<32x32xf32>, vector<32x32xf32> -> vector<32x32xf32>
    %83 = tpu.concatenate %73, %76, %79, %82 in 1 : vector<32x32xf32>, vector<32x32xf32>, vector<32x32xf32>, vector<32x32xf32> -> vector<32x128xf32>
    %84 = arith.divf %83, %70 : vector<32x128xf32>
    %c2168 = arith.constant 2168 : index
    %c0_49 = arith.constant 0 : index
    %85 = vector.load %arg0[%c2168, %c0_49] : memref<3560x128xf32, #tpu.memory_space<vmem>>, vector<32x128xf32>
    %86 = arith.addf %84, %85 : vector<32x128xf32>
    %87 = vector.extract_strided_slice %86 {offsets = [0, 0], sizes = [8, 128], strides = [1, 1]} : vector<32x128xf32> to vector<8x128xf32>
    %c2200 = arith.constant 2200 : index
    %c0_50 = arith.constant 0 : index
    %88 = vector.load %arg0[%c2200, %c0_50] : memref<3560x128xf32, #tpu.memory_space<vmem>>, vector<128x128xf32>
    %cst_51 = arith.constant dense<0.000000e+00> : vector<8x128xf32>
    %89 = tpu.matmul %87, %88, %cst_51 {dimension_numbers = #tpu.dot_dimension_numbers<[1], [0], [0], [1], [0, 0, 1, 1], [], []>} : vector<8x128xf32>, vector<128x128xf32>, vector<8x128xf32> -> vector<8x128xf32>
    %90 = vector.extract_strided_slice %86 {offsets = [8, 0], sizes = [8, 128], strides = [1, 1]} : vector<32x128xf32> to vector<8x128xf32>
    %c2328 = arith.constant 2328 : index
    %c0_52 = arith.constant 0 : index
    %91 = vector.load %arg0[%c2328, %c0_52] : memref<3560x128xf32, #tpu.memory_space<vmem>>, vector<128x128xf32>
    %cst_53 = arith.constant dense<0.000000e+00> : vector<8x128xf32>
    %92 = tpu.matmul %90, %91, %cst_53 {dimension_numbers = #tpu.dot_dimension_numbers<[1], [0], [0], [1], [0, 0, 1, 1], [], []>} : vector<8x128xf32>, vector<128x128xf32>, vector<8x128xf32> -> vector<8x128xf32>
    %93 = vector.extract_strided_slice %86 {offsets = [16, 0], sizes = [8, 128], strides = [1, 1]} : vector<32x128xf32> to vector<8x128xf32>
    %c2456 = arith.constant 2456 : index
    %c0_54 = arith.constant 0 : index
    %94 = vector.load %arg0[%c2456, %c0_54] : memref<3560x128xf32, #tpu.memory_space<vmem>>, vector<128x128xf32>
    %cst_55 = arith.constant dense<0.000000e+00> : vector<8x128xf32>
    %95 = tpu.matmul %93, %94, %cst_55 {dimension_numbers = #tpu.dot_dimension_numbers<[1], [0], [0], [1], [0, 0, 1, 1], [], []>} : vector<8x128xf32>, vector<128x128xf32>, vector<8x128xf32> -> vector<8x128xf32>
    %96 = vector.extract_strided_slice %86 {offsets = [24, 0], sizes = [8, 128], strides = [1, 1]} : vector<32x128xf32> to vector<8x128xf32>
    %c2584 = arith.constant 2584 : index
    %c0_56 = arith.constant 0 : index
    %97 = vector.load %arg0[%c2584, %c0_56] : memref<3560x128xf32, #tpu.memory_space<vmem>>, vector<128x128xf32>
    %cst_57 = arith.constant dense<0.000000e+00> : vector<8x128xf32>
    %98 = tpu.matmul %96, %97, %cst_57 {dimension_numbers = #tpu.dot_dimension_numbers<[1], [0], [0], [1], [0, 0, 1, 1], [], []>} : vector<8x128xf32>, vector<128x128xf32>, vector<8x128xf32> -> vector<8x128xf32>
    %99 = tpu.concatenate %89, %92, %95, %98 in 0 : vector<8x128xf32>, vector<8x128xf32>, vector<8x128xf32>, vector<8x128xf32> -> vector<32x128xf32>
    %c2712 = arith.constant 2712 : index
    %c0_58 = arith.constant 0 : index
    %100 = vector.load %arg0[%c2712, %c0_58] : memref<3560x128xf32, #tpu.memory_space<vmem>>, vector<32x128xf32>
    %101 = arith.addf %99, %100 : vector<32x128xf32>
    %102 = math.tanh %101 : vector<32x128xf32>
    %c2744 = arith.constant 2744 : index
    %c0_59 = arith.constant 0 : index
    %103 = vector.load %arg0[%c2744, %c0_59] : memref<3560x128xf32, #tpu.memory_space<vmem>>, vector<32x128xf32>
    %104 = arith.mulf %102, %103 : vector<32x128xf32>
    %cst_60 = arith.constant dense<0.000000e+00> : vector<32x128xf32>
    %105 = tpu.matmul %104, %7, %cst_60 {dimension_numbers = #tpu.dot_dimension_numbers<[1], [0], [0], [1], [0, 0, 1, 1], [], []>} : vector<32x128xf32>, vector<128x128xf32>, vector<32x128xf32> -> vector<32x128xf32>
    %cst_61 = arith.constant dense<0.000000e+00> : vector<32x128xf32>
    %106 = tpu.matmul %13, %105, %cst_61 {dimension_numbers = #tpu.dot_dimension_numbers<[1], [0], [0], [1], [0, 0, 1, 1], [], []>} : vector<32x32xf32>, vector<32x128xf32>, vector<32x128xf32> -> vector<32x128xf32>
    %cst_62 = arith.constant 0.000000e+00 : f32
    %107 = vector.broadcast %cst_62 : f32 to vector<1x128xf32>
    %108 = arith.cmpf ogt, %10, %107 : vector<1x128xf32>
    %cst_63 = arith.constant -1.000000e+30 : f32
    %109 = vector.shape_cast %108 : vector<1x128xi1> to vector<1x128xi1>
    %110 = vector.broadcast %109 : vector<1x128xi1> to vector<32x128xi1>
    %111 = vector.broadcast %cst_63 : f32 to vector<32x128xf32>
    %112 = arith.select %110, %106, %111 : vector<32x128xi1>, vector<32x128xf32>
    %cst_64 = arith.constant dense<0xFF800000> : vector<32xf32>
    %113 = vector.multi_reduction <maximumf>, %112, %cst_64 [1] : vector<32x128xf32> to vector<32xf32>
    %114 = vector.shape_cast %113 : vector<32xf32> to vector<32x1xf32>
    %cst_65 = arith.constant 0.000000e+00 : f32
    %115 = vector.broadcast %cst_65 : f32 to vector<1x128xf32>
    %116 = arith.cmpf ogt, %11, %115 : vector<1x128xf32>
    %cst_66 = arith.constant -1.000000e+30 : f32
    %117 = vector.shape_cast %116 : vector<1x128xi1> to vector<1x128xi1>
    %118 = vector.broadcast %117 : vector<1x128xi1> to vector<32x128xi1>
    %119 = vector.broadcast %cst_66 : f32 to vector<32x128xf32>
    %120 = arith.select %118, %106, %119 : vector<32x128xi1>, vector<32x128xf32>
    %cst_67 = arith.constant dense<0xFF800000> : vector<32xf32>
    %121 = vector.multi_reduction <maximumf>, %120, %cst_67 [1] : vector<32x128xf32> to vector<32xf32>
    %122 = vector.shape_cast %121 : vector<32xf32> to vector<32x1xf32>
    %123 = vector.broadcast %10 : vector<1x128xf32> to vector<32x128xf32>
    %124 = vector.broadcast %114 : vector<32x1xf32> to vector<32x128xf32>
    %125 = arith.mulf %123, %124 : vector<32x128xf32>
    %126 = vector.broadcast %11 : vector<1x128xf32> to vector<32x128xf32>
    %127 = vector.broadcast %122 : vector<32x1xf32> to vector<32x128xf32>
    %128 = arith.mulf %126, %127 : vector<32x128xf32>
    %129 = arith.addf %125, %128 : vector<32x128xf32>
    %130 = arith.addf %10, %11 : vector<1x128xf32>
    %cst_68 = arith.constant 0.000000e+00 : f32
    %131 = vector.broadcast %cst_68 : f32 to vector<1x128xf32>
    %132 = arith.cmpf ogt, %130, %131 : vector<1x128xf32>
    %133 = arith.subf %106, %129 : vector<32x128xf32>
    %134 = math.exp %133 : vector<32x128xf32>
    %cst_69 = arith.constant 0.000000e+00 : f32
    %135 = vector.shape_cast %132 : vector<1x128xi1> to vector<1x128xi1>
    %136 = vector.broadcast %135 : vector<1x128xi1> to vector<32x128xi1>
    %137 = vector.broadcast %cst_69 : f32 to vector<32x128xf32>
    %138 = arith.select %136, %134, %137 : vector<32x128xi1>, vector<32x128xf32>
    %cst_70 = arith.constant dense<0.000000e+00> : vector<32x128xf32>
    %139 = tpu.matmul %138, %6, %cst_70 {dimension_numbers = #tpu.dot_dimension_numbers<[1], [0], [0], [1], [0, 0, 1, 1], [], []>} : vector<32x128xf32>, vector<128x128xf32>, vector<32x128xf32> -> vector<32x128xf32>
    %cst_71 = arith.constant 1.000000e-30 : f32
    %140 = vector.broadcast %cst_71 : f32 to vector<32x128xf32>
    %141 = arith.maximumf %139, %140 : vector<32x128xf32>
    %142 = arith.divf %138, %141 : vector<32x128xf32>
    %cst_72 = arith.constant dense<0.000000e+00> : vector<32x128xf32>
    %143 = tpu.matmul %142, %2, %cst_72 {dimension_numbers = #tpu.dot_dimension_numbers<[1], [0], [0], [1], [0, 0, 1, 1], [], []>} : vector<32x128xf32>, vector<128x128xf32>, vector<32x128xf32> -> vector<32x128xf32>
    %144 = arith.mulf %86, %143 : vector<32x128xf32>
    %cst_73 = arith.constant dense<0.000000e+00> : vector<32x128xf32>
    %145 = tpu.matmul %144, %8, %cst_73 {dimension_numbers = #tpu.dot_dimension_numbers<[1], [0], [0], [1], [0, 0, 1, 1], [], []>} : vector<32x128xf32>, vector<128x128xf32>, vector<32x128xf32> -> vector<32x128xf32>
    %c2776 = arith.constant 2776 : index
    %c0_74 = arith.constant 0 : index
    %146 = vector.load %arg0[%c2776, %c0_74] : memref<3560x128xf32, #tpu.memory_space<vmem>>, vector<128x128xf32>
    %cst_75 = arith.constant dense<0.000000e+00> : vector<32x128xf32>
    %147 = tpu.matmul %145, %146, %cst_75 {dimension_numbers = #tpu.dot_dimension_numbers<[1], [0], [0], [1], [0, 0, 1, 1], [], []>} : vector<32x128xf32>, vector<128x128xf32>, vector<32x128xf32> -> vector<32x128xf32>
    %c2904 = arith.constant 2904 : index
    %c0_76 = arith.constant 0 : index
    %148 = vector.load %arg0[%c2904, %c0_76] : memref<3560x128xf32, #tpu.memory_space<vmem>>, vector<32x128xf32>
    %149 = arith.addf %147, %148 : vector<32x128xf32>
    %c2936 = arith.constant 2936 : index
    %c0_77 = arith.constant 0 : index
    %150 = vector.load %arg0[%c2936, %c0_77] : memref<3560x128xf32, #tpu.memory_space<vmem>>, vector<128x128xf32>
    %cst_78 = arith.constant dense<0.000000e+00> : vector<32x128xf32>
    %151 = tpu.matmul %149, %150, %cst_78 {dimension_numbers = #tpu.dot_dimension_numbers<[1], [0], [0], [1], [0, 0, 1, 1], [], []>} : vector<32x128xf32>, vector<128x128xf32>, vector<32x128xf32> -> vector<32x128xf32>
    %c3064 = arith.constant 3064 : index
    %c0_79 = arith.constant 0 : index
    %152 = vector.load %arg0[%c3064, %c0_79] : memref<3560x128xf32, #tpu.memory_space<vmem>>, vector<128x128xf32>
    %cst_80 = arith.constant dense<0.000000e+00> : vector<32x128xf32>
    %153 = tpu.matmul %149, %152, %cst_80 {dimension_numbers = #tpu.dot_dimension_numbers<[1], [0], [0], [1], [0, 0, 1, 1], [], []>} : vector<32x128xf32>, vector<128x128xf32>, vector<32x128xf32> -> vector<32x128xf32>
    %154 = vector.extract_strided_slice %151 {offsets = [0, 0], sizes = [32, 32], strides = [1, 1]} : vector<32x128xf32> to vector<32x32xf32>
    %155 = vector.extract_strided_slice %151 {offsets = [0, 64], sizes = [32, 32], strides = [1, 1]} : vector<32x128xf32> to vector<32x32xf32>
    %156 = vector.extract_strided_slice %153 {offsets = [0, 0], sizes = [32, 32], strides = [1, 1]} : vector<32x128xf32> to vector<32x32xf32>
    %157 = tpu.transpose %155, [1, 0] : vector<32x32xf32> -> vector<32x32xf32>
    %cst_81 = arith.constant dense<0.000000e+00> : vector<32x32xf32>
    %158 = tpu.matmul %154, %157, %cst_81 {dimension_numbers = #tpu.dot_dimension_numbers<[1], [0], [0], [1], [0, 0, 1, 1], [], []>} : vector<32x32xf32>, vector<32x32xf32>, vector<32x32xf32> -> vector<32x32xf32>
    %cst_82 = arith.constant 0.000000e+00 : f32
    %159 = vector.broadcast %cst_82 : f32 to vector<32x32xf32>
    %160 = arith.cmpf ogt, %15, %159 : vector<32x32xf32>
    %cst_83 = arith.constant -1.000000e+30 : f32
    %161 = vector.broadcast %cst_83 : f32 to vector<32x32xf32>
    %162 = arith.select %160, %158, %161 : vector<32x32xi1>, vector<32x32xf32>
    %cst_84 = arith.constant dense<0xFF800000> : vector<32xf32>
    %163 = vector.multi_reduction <maximumf>, %162, %cst_84 [1] : vector<32x32xf32> to vector<32xf32>
    %164 = vector.shape_cast %163 : vector<32xf32> to vector<32x1xf32>
    %cst_85 = arith.constant 0.000000e+00 : f32
    %165 = vector.broadcast %cst_85 : f32 to vector<32x32xf32>
    %166 = arith.cmpf ogt, %15, %165 : vector<32x32xf32>
    %167 = vector.broadcast %164 : vector<32x1xf32> to vector<32x32xf32>
    %168 = arith.subf %162, %167 : vector<32x32xf32>
    %169 = math.exp %168 : vector<32x32xf32>
    %cst_86 = arith.constant 0.000000e+00 : f32
    %170 = vector.broadcast %cst_86 : f32 to vector<32x32xf32>
    %171 = arith.select %166, %169, %170 : vector<32x32xi1>, vector<32x32xf32>
    %cst_87 = arith.constant dense<0.000000e+00> : vector<32xf32>
    %172 = vector.multi_reduction <add>, %171, %cst_87 [1] : vector<32x32xf32> to vector<32xf32>
    %173 = vector.shape_cast %172 : vector<32xf32> to vector<32x1xf32>
    %174 = vector.broadcast %173 : vector<32x1xf32> to vector<32x32xf32>
    %175 = arith.divf %171, %174 : vector<32x32xf32>
    %cst_88 = arith.constant dense<0.000000e+00> : vector<32x32xf32>
    %176 = tpu.matmul %175, %156, %cst_88 {dimension_numbers = #tpu.dot_dimension_numbers<[1], [0], [0], [1], [0, 0, 1, 1], [], []>} : vector<32x32xf32>, vector<32x32xf32>, vector<32x32xf32> -> vector<32x32xf32>
    %177 = vector.extract_strided_slice %151 {offsets = [0, 32], sizes = [32, 32], strides = [1, 1]} : vector<32x128xf32> to vector<32x32xf32>
    %178 = vector.extract_strided_slice %151 {offsets = [0, 96], sizes = [32, 32], strides = [1, 1]} : vector<32x128xf32> to vector<32x32xf32>
    %179 = vector.extract_strided_slice %153 {offsets = [0, 32], sizes = [32, 32], strides = [1, 1]} : vector<32x128xf32> to vector<32x32xf32>
    %180 = tpu.transpose %178, [1, 0] : vector<32x32xf32> -> vector<32x32xf32>
    %cst_89 = arith.constant dense<0.000000e+00> : vector<32x32xf32>
    %181 = tpu.matmul %177, %180, %cst_89 {dimension_numbers = #tpu.dot_dimension_numbers<[1], [0], [0], [1], [0, 0, 1, 1], [], []>} : vector<32x32xf32>, vector<32x32xf32>, vector<32x32xf32> -> vector<32x32xf32>
    %cst_90 = arith.constant 0.000000e+00 : f32
    %182 = vector.broadcast %cst_90 : f32 to vector<32x32xf32>
    %183 = arith.cmpf ogt, %15, %182 : vector<32x32xf32>
    %cst_91 = arith.constant -1.000000e+30 : f32
    %184 = vector.broadcast %cst_91 : f32 to vector<32x32xf32>
    %185 = arith.select %183, %181, %184 : vector<32x32xi1>, vector<32x32xf32>
    %cst_92 = arith.constant dense<0xFF800000> : vector<32xf32>
    %186 = vector.multi_reduction <maximumf>, %185, %cst_92 [1] : vector<32x32xf32> to vector<32xf32>
    %187 = vector.shape_cast %186 : vector<32xf32> to vector<32x1xf32>
    %cst_93 = arith.constant 0.000000e+00 : f32
    %188 = vector.broadcast %cst_93 : f32 to vector<32x32xf32>
    %189 = arith.cmpf ogt, %15, %188 : vector<32x32xf32>
    %190 = vector.broadcast %187 : vector<32x1xf32> to vector<32x32xf32>
    %191 = arith.subf %185, %190 : vector<32x32xf32>
    %192 = math.exp %191 : vector<32x32xf32>
    %cst_94 = arith.constant 0.000000e+00 : f32
    %193 = vector.broadcast %cst_94 : f32 to vector<32x32xf32>
    %194 = arith.select %189, %192, %193 : vector<32x32xi1>, vector<32x32xf32>
    %cst_95 = arith.constant dense<0.000000e+00> : vector<32xf32>
    %195 = vector.multi_reduction <add>, %194, %cst_95 [1] : vector<32x32xf32> to vector<32xf32>
    %196 = vector.shape_cast %195 : vector<32xf32> to vector<32x1xf32>
    %197 = vector.broadcast %196 : vector<32x1xf32> to vector<32x32xf32>
    %198 = arith.divf %194, %197 : vector<32x32xf32>
    %cst_96 = arith.constant dense<0.000000e+00> : vector<32x32xf32>
    %199 = tpu.matmul %198, %179, %cst_96 {dimension_numbers = #tpu.dot_dimension_numbers<[1], [0], [0], [1], [0, 0, 1, 1], [], []>} : vector<32x32xf32>, vector<32x32xf32>, vector<32x32xf32> -> vector<32x32xf32>
    %200 = tpu.concatenate %176, %199 in 1 : vector<32x32xf32>, vector<32x32xf32> -> vector<32x64xf32>
    %c3192 = arith.constant 3192 : index
    %c0_97 = arith.constant 0 : index
    %201 = vector.load %arg0[%c3192, %c0_97] : memref<3560x128xf32, #tpu.memory_space<vmem>>, vector<64x128xf32>
    %cst_98 = arith.constant dense<0.000000e+00> : vector<32x128xf32>
    %202 = tpu.matmul %200, %201, %cst_98 {dimension_numbers = #tpu.dot_dimension_numbers<[1], [0], [0], [1], [0, 0, 1, 1], [], []>} : vector<32x64xf32>, vector<64x128xf32>, vector<32x128xf32> -> vector<32x128xf32>
    %c3256 = arith.constant 3256 : index
    %c0_99 = arith.constant 0 : index
    %203 = vector.load %arg0[%c3256, %c0_99] : memref<3560x128xf32, #tpu.memory_space<vmem>>, vector<1x128xf32>
    %204 = vector.broadcast %203 : vector<1x128xf32> to vector<32x128xf32>
    %205 = arith.addf %202, %204 : vector<32x128xf32>
    %cst_100 = arith.constant 0.000000e+00 : f32
    %206 = vector.broadcast %cst_100 : f32 to vector<32x128xf32>
    %207 = arith.maximumf %205, %206 : vector<32x128xf32>
    %c3264 = arith.constant 3264 : index
    %c0_101 = arith.constant 0 : index
    %208 = vector.load %arg0[%c3264, %c0_101] : memref<3560x128xf32, #tpu.memory_space<vmem>>, vector<128x128xf32>
    %cst_102 = arith.constant dense<0.000000e+00> : vector<32x128xf32>
    %209 = tpu.matmul %20, %208, %cst_102 {dimension_numbers = #tpu.dot_dimension_numbers<[1], [0], [0], [1], [0, 0, 1, 1], [], []>} : vector<32x128xf32>, vector<128x128xf32>, vector<32x128xf32> -> vector<32x128xf32>
    %c3392 = arith.constant 3392 : index
    %c0_103 = arith.constant 0 : index
    %210 = vector.load %arg0[%c3392, %c0_103] : memref<3560x128xf32, #tpu.memory_space<vmem>>, vector<1x128xf32>
    %211 = vector.broadcast %210 : vector<1x128xf32> to vector<32x128xf32>
    %212 = arith.addf %209, %211 : vector<32x128xf32>
    %c3400 = arith.constant 3400 : index
    %c0_104 = arith.constant 0 : index
    %213 = vector.load %arg0[%c3400, %c0_104] : memref<3560x128xf32, #tpu.memory_space<vmem>>, vector<1x128xf32>
    %214 = vector.broadcast %213 : vector<1x128xf32> to vector<32x128xf32>
    %215 = arith.mulf %207, %214 : vector<32x128xf32>
    %cst_105 = arith.constant 1.000000e+00 : f32
    %216 = vector.broadcast %cst_105 : f32 to vector<1x128xf32>
    %217 = arith.subf %216, %213 : vector<1x128xf32>
    %218 = vector.broadcast %217 : vector<1x128xf32> to vector<32x128xf32>
    %219 = arith.mulf %212, %218 : vector<32x128xf32>
    %220 = arith.addf %215, %219 : vector<32x128xf32>
    %cst_106 = arith.constant dense<0.000000e+00> : vector<32x128xf32>
    %221 = tpu.matmul %220, %9, %cst_106 {dimension_numbers = #tpu.dot_dimension_numbers<[1], [0], [0], [1], [0, 0, 1, 1], [], []>} : vector<32x128xf32>, vector<128x128xf32>, vector<32x128xf32> -> vector<32x128xf32>
    %222 = arith.subf %220, %221 : vector<32x128xf32>
    %223 = arith.mulf %222, %222 : vector<32x128xf32>
    %cst_107 = arith.constant dense<0.000000e+00> : vector<32x128xf32>
    %224 = tpu.matmul %223, %9, %cst_107 {dimension_numbers = #tpu.dot_dimension_numbers<[1], [0], [0], [1], [0, 0, 1, 1], [], []>} : vector<32x128xf32>, vector<128x128xf32>, vector<32x128xf32> -> vector<32x128xf32>
    %cst_108 = arith.constant 9.99999974E-6 : f32
    %225 = vector.broadcast %cst_108 : f32 to vector<32x128xf32>
    %226 = arith.addf %224, %225 : vector<32x128xf32>
    %227 = math.rsqrt %226 : vector<32x128xf32>
    %228 = arith.mulf %222, %227 : vector<32x128xf32>
    %c3408 = arith.constant 3408 : index
    %c0_109 = arith.constant 0 : index
    %229 = vector.load %arg0[%c3408, %c0_109] : memref<3560x128xf32, #tpu.memory_space<vmem>>, vector<1x128xf32>
    %230 = vector.broadcast %229 : vector<1x128xf32> to vector<32x128xf32>
    %231 = arith.mulf %228, %230 : vector<32x128xf32>
    %c3416 = arith.constant 3416 : index
    %c0_110 = arith.constant 0 : index
    %232 = vector.load %arg0[%c3416, %c0_110] : memref<3560x128xf32, #tpu.memory_space<vmem>>, vector<1x128xf32>
    %233 = vector.broadcast %232 : vector<1x128xf32> to vector<32x128xf32>
    %234 = arith.addf %231, %233 : vector<32x128xf32>
    %c3424 = arith.constant 3424 : index
    %c0_111 = arith.constant 0 : index
    %235 = vector.load %arg0[%c3424, %c0_111] : memref<3560x128xf32, #tpu.memory_space<vmem>>, vector<128x128xf32>
    %cst_112 = arith.constant dense<0.000000e+00> : vector<32x128xf32>
    %236 = tpu.matmul %234, %235, %cst_112 {dimension_numbers = #tpu.dot_dimension_numbers<[1], [0], [0], [1], [0, 0, 1, 1], [], []>} : vector<32x128xf32>, vector<128x128xf32>, vector<32x128xf32> -> vector<32x128xf32>
    %c3552 = arith.constant 3552 : index
    %c0_113 = arith.constant 0 : index
    %237 = vector.load %arg0[%c3552, %c0_113] : memref<3560x128xf32, #tpu.memory_space<vmem>>, vector<1x128xf32>
    %238 = vector.broadcast %237 : vector<1x128xf32> to vector<32x128xf32>
    %239 = arith.addf %236, %238 : vector<32x128xf32>
    %c0_114 = arith.constant 0 : index
    %c0_115 = arith.constant 0 : index
    %240 = vector.load %arg2[%c0_114, %c0_115] : memref<32x128xf32, #tpu.memory_space<vmem>>, vector<32x128xf32>
    tpu.vector_store %arg2[%c0_114, %c0_115], %239 {strides = array<i32>} : memref<32x128xf32, #tpu.memory_space<vmem>>, vector<32x128xf32>,
    return
  }
}

</mosaic_0001>

<bundles_post_ra>
// kernel: forward.1
= control target key start
LH: loop header
LB: loop body
LE: loop exit
PB: predicated region body
PF: predicated region fallthrough
CT: control target
= control target key end

     0   :  { %7 = vsyncpa [#allocation3], 0  ;;  %s3138_s0 = inlined_call_operand.hbm [shape: f32[3560,128], index: 0, kind: input, shape index: {}]   ;;  %s3139_s1 = inlined_call_operand.hbm [shape: f32[64,128], index: 1, kind: input, shape index: {}]   ;;  %s3140_s2 = inlined_call_operand.vmem [shape: f32[32,128], index: 2, kind: output, shape index: {}]  }
   0x1   :  { %s13_s11 = sshll.u32 %s3138_s0, 4  ;;  %s14_s11 = int_to_ptr.hbm [resolvable:$true] %s13_s11 }
   0x2   :  { %8 = vsyncpa [#allocation5], 0  ;;  %s2608_s12 = smov [#allocation2]   ;;  %s26_s16 = sshll.u32 %s3139_s1, 4  ;;  %s27_s16 = int_to_ptr.hbm [resolvable:$true] %s26_s16 }
   0x3   :  { %s15_s13 = sshll.u32 %s2608_s12, 4  ;;  %s2609_s17 = smov 128   ;;  %s16_s13 = int_to_ptr.vmem [resolvable:$true] %s15_s13 }
   0x4   :  { %s2610_s18 = smov 8   ;;  %s2611_s19 = smov [#allocation4]  }
   0x5   :  { %21 = dma.hbm_to_vmem [thread:$0]  %s14_s11, 56960, %s16_s13, [#allocation3], %s2609_s17, %s2609_s17, %s2610_s18  }
   0x6   :  { %s28_s20 = sshll.u32 %s2611_s19, 4  ;;  %s29_s20 = int_to_ptr.vmem [resolvable:$true] %s28_s20 }
   0x7   :  { %34 = dma.hbm_to_vmem [thread:$0]  %s27_s16, 1024, %s29_s20, [#allocation5], %s2609_s17, %s2609_s17, %s2610_s18  }
   0x8   :  { %2604 = dma.done.wait [#allocation3], 56960  }
   0x9   :  { %2605 = vsyncadd [#allocation3], 4294910336 }
   0xa   :  { %2606 = dma.done.wait [#allocation5], 1024  }
   0xb   :  { %2607 = vsyncadd [#allocation5], 4294966272  ;;  %v192_v0 = vld [vmem:[#allocation2 + $0x468] sm:$0xff]  ;;  %v191_v1 = vld [vmem:[#allocation2 + $0x460] sm:$0xff]  ;;  %s2612_s0 = smov 96   ;;  %s2613_s1 = smov 64  }
   0xc   :  { %195 = vmatpush.msra.mxu0 %v192_v0  ;;  %v190_v2 = vld [vmem:[#allocation2 + $0x458] sm:$0xff]  ;;  %v189_v3 = vld [vmem:[#allocation2 + $0x450] sm:$0xff]  ;;  %v188_v4 = vld [vmem:[#allocation2 + $0x448] sm:$0xff]  ;;  %s2614_s21 = smov 32   ;;  %vm660_vm8 = vcmask 261120   ;;  %vm929_vm11 = vcmask 523264  }
   0xd   :  { %v187_v5 = vld [vmem:[#allocation2 + $0x440] sm:$0xff]  ;;  %v186_v6 = vld [vmem:[#allocation2 + $0x438] sm:$0xff]  ;;  %v185_v7 = vld [vmem:[#allocation2 + $0x430] sm:$0xff]  ;;  %vm934_vm13 = vcmask 785408  }
   0xe   :  { %196 = vmatpush.msra.mxu0 %v191_v1  ;;  %v184_v8 = vld [vmem:[#allocation2 + $0x428] sm:$0xff]  ;;  %v183_v9 = vld [vmem:[#allocation2 + $0x420] sm:$0xff]  ;;  %v182_v10 = vld [vmem:[#allocation2 + $0x418] sm:$0xff] }
   0xf   :  { %v181_v11 = vld [vmem:[#allocation2 + $0x410] sm:$0xff]  ;;  %v180_v12 = vld [vmem:[#allocation2 + $0x408] sm:$0xff]  ;;  %v179_v13 = vld [vmem:[#allocation2 + $0x400] sm:$0xff] }
  0x10   :  { %197 = vmatpush.msra.mxu0 %v190_v2  ;;  %v239_v14 = vld [vmem:[#allocation2 + $0x4f0] sm:$0xff]  ;;  %v238_v16 = vld [vmem:[#allocation2 + $0x4e8] sm:$0xff]  ;;  %v178_v18 = vld [vmem:[#allocation2 + $0x3f8] sm:$0xff] }
  0x11   :  { %v275_v15 = vld [vmem:[#allocation2 + $0x570] sm:$0xff]  ;;  %240 = vmatpush.msra.mxu1 %v239_v14  ;;  %v274_v17 = vld [vmem:[#allocation2 + $0x568] sm:$0xff]  ;;  %v237_v19 = vld [vmem:[#allocation2 + $0x4e0] sm:$0xff] }
  0x12   :  { %198 = vmatpush.msra.mxu0 %v189_v3  ;;  %276 = vmatpush.msra.mxu2 %v275_v15  ;;  %v273_v20 = vld [vmem:[#allocation2 + $0x560] sm:$0xff]  ;;  %v311_v21 = vld [vmem:[#allocation2 + $0x5f0] sm:$0xff]  ;;  %v236_v23 = vld [vmem:[#allocation2 + $0x4d8] sm:$0xff] }
  0x13   :  { %241 = vmatpush.msra.mxu1 %v238_v16  ;;  %v177_v22 = vld [vmem:[#allocation2 + $0x3f0] sm:$0xff]  ;;  %312 = vmatpush.msra.mxu3 %v311_v21  ;;  %v310_v24 = vld [vmem:[#allocation2 + $0x5e8] sm:$0xff]  ;;  %v272_v26 = vld [vmem:[#allocation2 + $0x558] sm:$0xff] }
  0x14   :  { %199 = vmatpush.msra.mxu0 %v188_v4  ;;  %277 = vmatpush.msra.mxu2 %v274_v17  ;;  %v43_v25 = vld [vmem:[#allocation4] sm:$0xff]  ;;  %v235_v27 = vld [vmem:[#allocation2 + $0x4d0] sm:$0xff]  ;;  %v309_v28 = vld [vmem:[#allocation2 + $0x5e0] sm:$0xff] }
  0x15   :  { %242 = vmatpush.msra.mxu1 %v237_v19  ;;  %313 = vmatpush.msra.mxu3 %v310_v24  ;;  %v271_v29 = vld [vmem:[#allocation2 + $0x550] sm:$0xff]  ;;  %v234_v31 = vld [vmem:[#allocation2 + $0x4c8] sm:$0xff]  ;;  %v308_v32 = vld [vmem:[#allocation2 + $0x5d8] sm:$0xff] }
  0x16   :  { %200 = vmatpush.msra.mxu0 %v187_v5  ;;  %278 = vmatpush.msra.mxu2 %v273_v20  ;;  %v347_v30 = vld [vmem:[#allocation2 + $0x670] sm:$0xff]  ;;  %v270_v33 = vld [vmem:[#allocation2 + $0x548] sm:$0xff]  ;;  %v233_v35 = vld [vmem:[#allocation2 + $0x4c0] sm:$0xff] }
  0x17   :  { %243 = vmatpush.msra.mxu1 %v236_v23  ;;  %314 = vmatpush.msra.mxu3 %v309_v28  ;;  %v346_v34 = vld [vmem:[#allocation2 + $0x668] sm:$0xff]  ;;  %v307_v36 = vld [vmem:[#allocation2 + $0x5d0] sm:$0xff]  ;;  %v269_v37 = vld [vmem:[#allocation2 + $0x540] sm:$0xff] }
  0x18   :  { %201 = vmatpush.msra.mxu0 %v186_v6  ;;  %279 = vmatpush.msra.mxu2 %v272_v26  ;;  %v345_v38 = vld [vmem:[#allocation2 + $0x660] sm:$0xff]  ;;  %v232_v39 = vld [vmem:[#allocation2 + $0x4b8] sm:$0xff]  ;;  %v306_v40 = vld [vmem:[#allocation2 + $0x5c8] sm:$0xff] }
  0x19   :  { %244 = vmatpush.msra.mxu1 %v235_v27  ;;  %315 = vmatpush.msra.mxu3 %v308_v32  ;;  %v44_v41 = vld [vmem:[#allocation4 + $0x8] sm:$0xff]  ;;  %v268_v42 = vld [vmem:[#allocation2 + $0x538] sm:$0xff]  ;;  %v305_v44 = vld [vmem:[#allocation2 + $0x5c0] sm:$0xff] }
  0x1a   :  { %202 = vmatpush.msra.mxu0 %v185_v7  ;;  %280 = vmatpush.msra.mxu2 %v271_v29  ;;  %v231_v43 = vld [vmem:[#allocation2 + $0x4b0] sm:$0xff]  ;;  %v344_v46 = vld [vmem:[#allocation2 + $0x658] sm:$0xff]  ;;  %v230_v47 = vld [vmem:[#allocation2 + $0x4a8] sm:$0xff] }
  0x1b   :  { %245 = vmatpush.msra.mxu1 %v234_v31  ;;  %316 = vmatpush.msra.mxu3 %v307_v36  ;;  %v267_v45 = vld [vmem:[#allocation2 + $0x530] sm:$0xff]  ;;  %v304_v48 = vld [vmem:[#allocation2 + $0x5b8] sm:$0xff]  ;;  %v266_v49 = vld [vmem:[#allocation2 + $0x528] sm:$0xff] }
  0x1c   :  { %203 = vmatpush.msra.mxu0 %v184_v8  ;;  %281 = vmatpush.msra.mxu2 %v270_v33  ;;  %v343_v50 = vld [vmem:[#allocation2 + $0x650] sm:$0xff]  ;;  %v229_v51 = vld [vmem:[#allocation2 + $0x4a0] sm:$0xff]  ;;  %v342_v54 = vld [vmem:[#allocation2 + $0x648] sm:$0xff] }
  0x1d   :  { %246 = vmatpush.msra.mxu1 %v233_v35  ;;  %317 = vmatpush.msra.mxu3 %v306_v40  ;;  %v303_v52 = vld [vmem:[#allocation2 + $0x5b0] sm:$0xff]  ;;  %v265_v53 = vld [vmem:[#allocation2 + $0x520] sm:$0xff]  ;;  %v228_v55 = vld [vmem:[#allocation2 + $0x498] sm:$0xff] }
  0x1e   :  { %204 = vmatpush.msra.mxu0 %v183_v9  ;;  %282 = vmatpush.msra.mxu2 %v269_v37  ;;  %v302_v56 = vld [vmem:[#allocation2 + $0x5a8] sm:$0xff]  ;;  %v45_v57 = vld [vmem:[#allocation4 + $0x10] sm:$0xff]  ;;  %v227_v59 = vld [vmem:[#allocation2 + $0x490] sm:$0xff] }
  0x1f   :  { %247 = vmatpush.msra.mxu1 %v232_v39  ;;  %318 = vmatpush.msra.mxu3 %v305_v44  ;;  %v264_v58 = vld [vmem:[#allocation2 + $0x518] sm:$0xff]  ;;  %v341_v60 = vld [vmem:[#allocation2 + $0x640] sm:$0xff]  ;;  %v263_v61 = vld [vmem:[#allocation2 + $0x510] sm:$0xff] }
  0x20   :  { %205 = vmatpush.msra.mxu0 %v182_v10  ;;  %283 = vmatpush.msra.mxu2 %v268_v42  ;;  %v301_v62 = vld [vmem:[#allocation2 + $0x5a0] sm:$0xff]  ;;  %v226_v63 = vld [vmem:[#allocation2 + $0x488] sm:$0xff]  ;;  %v340_v0 = vld [vmem:[#allocation2 + $0x638] sm:$0xff] }
  0x21   :  { %248 = vmatpush.msra.mxu1 %v231_v43  ;;  %319 = vmatpush.msra.mxu3 %v304_v48  ;;  %v262_v1 = vld [vmem:[#allocation2 + $0x508] sm:$0xff]  ;;  %v300_v2 = vld [vmem:[#allocation2 + $0x598] sm:$0xff]  ;;  %v225_v3 = vld [vmem:[#allocation2 + $0x480] sm:$0xff] }
  0x22   :  { %206 = vmatpush.msra.mxu0 %v181_v11  ;;  %284 = vmatpush.msra.mxu2 %v267_v45  ;;  %v339_v4 = vld [vmem:[#allocation2 + $0x630] sm:$0xff]  ;;  %v261_v5 = vld [vmem:[#allocation2 + $0x500] sm:$0xff]  ;;  %v224_v7 = vld [vmem:[#allocation2 + $0x478] sm:$0xff] }
  0x23   :  { %249 = vmatpush.msra.mxu1 %v230_v47  ;;  %320 = vmatpush.msra.mxu3 %v303_v52  ;;  %v299_v6 = vld [vmem:[#allocation2 + $0x590] sm:$0xff]  ;;  %v338_v8 = vld [vmem:[#allocation2 + $0x628] sm:$0xff]  ;;  %v46_v9 = vld [vmem:[#allocation4 + $0x18] sm:$0xff] }
  0x24   :  { %207 = vmatpush.msra.mxu0 %v180_v12  ;;  %285 = vmatpush.msra.mxu2 %v266_v49  ;;  %v260_v10 = vld [vmem:[#allocation2 + $0x4f8] sm:$0xff]  ;;  %v383_v11 = vld [vmem:[#allocation2 + $0x6f0] sm:$0xff]  ;;  %v337_v14 = vld [vmem:[#allocation2 + $0x620] sm:$0xff] }
  0x25   :  { %250 = vmatpush.msra.mxu1 %v229_v51  ;;  %321 = vmatpush.msra.mxu3 %v302_v56  ;;  %v419_v12 = vld [vmem:[#allocation2 + $0x770] sm:$0xff]  ;;  %v382_v15 = vld [vmem:[#allocation2 + $0x6e8] sm:$0xff]  ;;  %v297_v17 = vld [vmem:[#allocation2 + $0x580] sm:$0xff] }
  0x26   :  { %208 = vmatpush.msra.mxu0 %v179_v13  ;;  %286 = vmatpush.msra.mxu2 %v265_v53  ;;  %v298_v13 = vld [vmem:[#allocation2 + $0x588] sm:$0xff]  ;;  %v381_v19 = vld [vmem:[#allocation2 + $0x6e0] sm:$0xff]  ;;  %v296_v21 = vld [vmem:[#allocation2 + $0x578] sm:$0xff] }
  0x27   :  { %251 = vmatpush.msra.mxu1 %v228_v55  ;;  %322 = vmatpush.msra.mxu3 %v301_v62  ;;  %v418_v16 = vld [vmem:[#allocation2 + $0x768] sm:$0xff]  ;;  %v417_v20 = vld [vmem:[#allocation2 + $0x760] sm:$0xff]  ;;  %v380_v23 = vld [vmem:[#allocation2 + $0x6d8] sm:$0xff] }
  0x28   :  { %209 = vmatpush.msra.mxu0 %v178_v18  ;;  %287 = vmatpush.msra.mxu2 %v264_v58  ;;  %v336_v18 = vld [vmem:[#allocation2 + $0x618] sm:$0xff]  ;;  %v334_v26 = vld [vmem:[#allocation2 + $0x608] sm:$0xff]  ;;  %v379_v27 = vld [vmem:[#allocation2 + $0x6d0] sm:$0xff] }
  0x29   :  { %252 = vmatpush.msra.mxu1 %v227_v59  ;;  %323 = vmatpush.msra.mxu3 %v300_v2  ;;  %v416_v24 = vld [vmem:[#allocation2 + $0x758] sm:$0xff]  ;;  %v415_v28 = vld [vmem:[#allocation2 + $0x750] sm:$0xff]  ;;  %v454_v29 = vld [vmem:[#allocation2 + $0x7e8] sm:$0xff] }
  0x2a   :  { %210 = vmatpush.msra.mxu0 %v177_v22  ;;  %288 = vmatpush.msra.mxu2 %v263_v61  ;;  %v335_v22 = vld [vmem:[#allocation2 + $0x610] sm:$0xff]  ;;  %v378_v31 = vld [vmem:[#allocation2 + $0x6c8] sm:$0xff]  ;;  %v377_v33 = vld [vmem:[#allocation2 + $0x6c0] sm:$0xff] }
  0x2b   :  { %211 = vmatmul.f32.vlgmr.msra.gmra.mxu0 %v43_v25  ;;  %253 = vmatpush.msra.mxu1 %v226_v63  ;;  %v455_v25 = vld [vmem:[#allocation2 + $0x7f0] sm:$0xff]  ;;  %v414_v32 = vld [vmem:[#allocation2 + $0x748] sm:$0xff]  ;;  %v453_v35 = vld [vmem:[#allocation2 + $0x7e0] sm:$0xff] }
  0x2c   :  { %348 = vmatpush.msrb.mxu0 %v347_v30  ;;  %289 = vmatpush.msra.mxu2 %v262_v1  ;;  %v333_v30 = vld [vmem:[#allocation2 + $0x600] sm:$0xff]  ;;  %v332_v36 = vld [vmem:[#allocation2 + $0x5f8] sm:$0xff]  ;;  %v491_v40 = vld [vmem:[#allocation2 + $0x870] sm:$0xff] }
  0x2d   :  { %254 = vmatpush.msra.mxu1 %v225_v3  ;;  %324 = vmatpush.msra.mxu3 %v299_v6  ;;  %v376_v37 = vld [vmem:[#allocation2 + $0x6b8] sm:$0xff]  ;;  %v411_v42 = vld [vmem:[#allocation2 + $0x730] sm:$0xff]  ;;  %v490_v44 = vld [vmem:[#allocation2 + $0x868] sm:$0xff] }
  0x2e   :  { %349 = vmatpush.msrb.mxu0 %v346_v34  ;;  %290 = vmatpush.msra.mxu2 %v261_v5  ;;  %v413_v34 = vld [vmem:[#allocation2 + $0x740] sm:$0xff]  ;;  %v452_v39 = vld [vmem:[#allocation2 + $0x7d8] sm:$0xff]  ;;  %v451_v43 = vld [vmem:[#allocation2 + $0x7d0] sm:$0xff] }
  0x2f   :  { %255 = vmatpush.msra.mxu1 %v224_v7  ;;  %325 = vmatpush.msra.mxu3 %v298_v13  ;;  %v374_v45 = vld [vmem:[#allocation2 + $0x6a8] sm:$0xff]  ;;  %v489_v48 = vld [vmem:[#allocation2 + $0x860] sm:$0xff]  ;;  %v488_v52 = vld [vmem:[#allocation2 + $0x858] sm:$0xff] }
  0x30   :  { %350 = vmatpush.msrb.mxu0 %v345_v38  ;;  %291 = vmatpush.msra.mxu2 %v260_v10  ;;  %v412_v38 = vld [vmem:[#allocation2 + $0x738] sm:$0xff]  ;;  %v450_v47 = vld [vmem:[#allocation2 + $0x7c8] sm:$0xff]  ;;  %v373_v49 = vld [vmem:[#allocation2 + $0x6a0] sm:$0xff] }
  0x31   :  { %384 = vmatpush.msrb.mxu1 %v383_v11  ;;  %326 = vmatpush.msra.mxu3 %v297_v17  ;;  %v449_v51 = vld [vmem:[#allocation2 + $0x7c0] sm:$0xff]  ;;  %v372_v53 = vld [vmem:[#allocation2 + $0x698] sm:$0xff]  ;;  %v487_v56 = vld [vmem:[#allocation2 + $0x850] sm:$0xff] }
  0x32   :  { %351 = vmatpush.msrb.mxu0 %v344_v46  ;;  %420 = vmatpush.msrb.mxu2 %v419_v12  ;;  %v410_v46 = vld [vmem:[#allocation2 + $0x728] sm:$0xff]  ;;  %v448_v55 = vld [vmem:[#allocation2 + $0x7b8] sm:$0xff]  ;;  %v407_v58 = vld [vmem:[#allocation2 + $0x710] sm:$0xff] }
  0x33   :  { %214 = vmatmul.f32.gmra.mxu0 %v44_v41  ;;  %385 = vmatpush.msrb.mxu1 %v382_v15  ;;  %v375_v41 = vld [vmem:[#allocation2 + $0x6b0] sm:$0xff]  ;;  %v370_v61 = vld [vmem:[#allocation2 + $0x688] sm:$0xff]  ;;  %v369_v1 = vld [vmem:[#allocation2 + $0x680] sm:$0xff] }
  0x34   :  { %352 = vmatpush.msrb.mxu0 %v343_v50  ;;  %421 = vmatpush.msrb.mxu2 %v418_v16  ;;  %v409_v50 = vld [vmem:[#allocation2 + $0x720] sm:$0xff]  ;;  %v447_v59 = vld [vmem:[#allocation2 + $0x7b0] sm:$0xff]  ;;  %v406_v62 = vld [vmem:[#allocation2 + $0x708] sm:$0xff] }
  0x35   :  { %386 = vmatpush.msrb.mxu1 %v381_v19  ;;  %327 = vmatpush.msra.mxu3 %v296_v21  ;;  %v446_v63 = vld [vmem:[#allocation2 + $0x7a8] sm:$0xff]  ;;  %v405_v2 = vld [vmem:[#allocation2 + $0x700] sm:$0xff]  ;;  %v368_v5 = vld [vmem:[#allocation2 + $0x678] sm:$0xff] }
  0x36   :  { %353 = vmatpush.msrb.mxu0 %v342_v54  ;;  %422 = vmatpush.msrb.mxu2 %v417_v20  ;;  %v408_v54 = vld [vmem:[#allocation2 + $0x718] sm:$0xff]  ;;  %v445_v3 = vld [vmem:[#allocation2 + $0x7a0] sm:$0xff]  ;;  %v482_v10 = vld [vmem:[#allocation2 + $0x828] sm:$0xff] }
  0x37   :  { %387 = vmatpush.msrb.mxu1 %v380_v23  ;;  %456 = vmatpush.msrb.mxu3 %v455_v25  ;;  %v404_v6 = vld [vmem:[#allocation2 + $0x6f8] sm:$0xff]  ;;  %v442_v11 = vld [vmem:[#allocation2 + $0x788] sm:$0xff]  ;;  %v481_v12 = vld [vmem:[#allocation2 + $0x820] sm:$0xff] }
  0x38   :  { %354 = vmatpush.msrb.mxu0 %v341_v60  ;;  %423 = vmatpush.msrb.mxu2 %v416_v24  ;;  %v486_v60 = vld [vmem:[#allocation2 + $0x848] sm:$0xff]  ;;  %v444_v7 = vld [vmem:[#allocation2 + $0x798] sm:$0xff]  ;;  %v441_v13 = vld [vmem:[#allocation2 + $0x780] sm:$0xff] }
  0x39   :  { %388 = vmatpush.msrb.mxu1 %v379_v27  ;;  %457 = vmatpush.msrb.mxu3 %v454_v29  ;;  %v440_v15 = vld [vmem:[#allocation2 + $0x778] sm:$0xff]  ;;  %v479_v16 = vld [vmem:[#allocation2 + $0x810] sm:$0xff]  ;;  %v478_v17 = vld [vmem:[#allocation2 + $0x808] sm:$0xff] }
  0x3a   :  { %355 = vmatpush.msrb.mxu0 %v340_v0  ;;  %424 = vmatpush.msrb.mxu2 %v415_v28  ;;  %v485_v0 = vld [vmem:[#allocation2 + $0x840] sm:$0xff]  ;;  %v2637_v19 = vld [vmem:[#allocation2 + $0x470] ss:$0 sm:$0xff]  ;;  %v476_v20 = vld [vmem:[#allocation2 + $0x7f8] sm:$0xff] }
  0x3b   :  { %217 = vmatmul.f32.gmra.mxu0 %v45_v57  ;;  %389 = vmatpush.msrb.mxu1 %v378_v31  ;;  %v371_v57 = vld [vmem:[#allocation2 + $0x690] sm:$0xff]  ;;  %v82_v23 = vld [vmem:[#allocation2 + $0xf8] sm:$0xff]  ;;  %v80_v27 = vld [vmem:[#allocation2 + $0xe8] sm:$0xff] }
  0x3c   :  { %356 = vmatpush.msrb.mxu0 %v339_v4  ;;  %425 = vmatpush.msrb.mxu2 %v414_v32  ;;  %v484_v4 = vld [vmem:[#allocation2 + $0x838] sm:$0xff]  ;;  %v81_v25 = vld [vmem:[#allocation2 + $0xf0] sm:$0xff]  ;;  %v2649_v28 = vld [vmem:[#allocation2 + $0x68] sm:$0xff] }
  0x3d   :  { %390 = vmatpush.msrb.mxu1 %v377_v33  ;;  %458 = vmatpush.msrb.mxu3 %v453_v35  ;;  %v2642_v24 = vld [vmem:[#allocation2 + $0x78] sm:$0xff]  ;;  %v79_v29 = vld [vmem:[#allocation2 + $0xe0] sm:$0xff]  ;;  %v77_v35 = vld [vmem:[#allocation2 + $0xd0] sm:$0xff] }
  0x3e   :  { %357 = vmatpush.msrb.mxu0 %v338_v8  ;;  %426 = vmatpush.msrb.mxu2 %v413_v34  ;;  %v483_v8 = vld [vmem:[#allocation2 + $0x830] sm:$0xff]  ;;  %v78_v33 = vld [vmem:[#allocation2 + $0xd8] sm:$0xff] }
  0x3f   :  { %391 = vmatpush.msrb.mxu1 %v376_v37  ;;  %459 = vmatpush.msrb.mxu3 %v452_v39  ;;  %v62_v34 = vld [vmem:[#allocation2 + $0x58] sm:$0xff]  ;;  %v76_v37 = vld [vmem:[#allocation2 + $0xc8] sm:$0xff]  ;;  %v75_v39 = vld [vmem:[#allocation2 + $0xc0] sm:$0xff] }
  0x40   :  { %358 = vmatpush.msrb.mxu0 %v337_v14  ;;  %427 = vmatpush.msrb.mxu2 %v412_v38  ;;  %v480_v14 = vld [vmem:[#allocation2 + $0x818] sm:$0xff]  ;;  %v60_v38 = vld [vmem:[#allocation2 + $0x48] sm:$0xff] }
  0x41   :  { %392 = vmatpush.msrb.mxu1 %v375_v41  ;;  %460 = vmatpush.msrb.mxu3 %v451_v43  ;;  %v74_v43 = vld [vmem:[#allocation2 + $0xb8] sm:$0xff] }
  0x42   :  { %359 = vmatpush.msrb.mxu0 %v336_v18  ;;  %428 = vmatpush.msrb.mxu2 %v411_v42  ;;  %v477_v18 = vld [vmem:[#allocation2 + $0x800] sm:$0xff] }
  0x43   :  { %220 = vmatmul.f32.gmra.mxu0 %v46_v9  ;;  %393 = vmatpush.msrb.mxu1 %v374_v45  ;;  %v443_v9 = vld [vmem:[#allocation2 + $0x790] sm:$0xff] }
  0x44   :  { %360 = vmatpush.msrb.mxu0 %v335_v22  ;;  %429 = vmatpush.msrb.mxu2 %v410_v46  ;;  %v73_v45 = vld [vmem:[#allocation2 + $0xb0] sm:$0xff] }
  0x45   :  { %461 = vmatpush.msrb.mxu3 %v450_v47  ;;  %394 = vmatpush.msrb.mxu1 %v373_v49  ;;  %v57_v46 = vld [vmem:[#allocation2 + $0x30] sm:$0xff]  ;;  %v72_v47 = vld [vmem:[#allocation2 + $0xa8] sm:$0xff]  ;;  %v71_v49 = vld [vmem:[#allocation2 + $0xa0] sm:$0xff] }
  0x46   :  { %361 = vmatpush.msrb.mxu0 %v334_v26  ;;  %430 = vmatpush.msrb.mxu2 %v409_v50  ;;  %v2646_v26 = vld [vmem:[#allocation2 + $0x70] sm:$0xff]  ;;  %v55_v50 = vld [vmem:[#allocation2 + $0x20] sm:$0xff] }
  0x47   :  { %462 = vmatpush.msrb.mxu3 %v449_v51  ;;  %395 = vmatpush.msrb.mxu1 %v372_v53  ;;  %v70_v53 = vld [vmem:[#allocation2 + $0x98] sm:$0xff] }
  0x48   :  { %362 = vmatpush.msrb.mxu0 %v333_v30  ;;  %431 = vmatpush.msrb.mxu2 %v408_v54  ;;  %v2652_v30 = vld [vmem:[#allocation2 + $0x60] sm:$0xff]  ;;  %v54_v54 = vld [vmem:[#allocation2 + $0x18] sm:$0xff] }
  0x49   :  { %463 = vmatpush.msrb.mxu3 %v448_v55  ;;  %396 = vmatpush.msrb.mxu1 %v371_v57  ;;  %v69_v55 = vld [vmem:[#allocation2 + $0x90] sm:$0xff]  ;;  %v68_v57 = vld [vmem:[#allocation2 + $0x88] sm:$0xff] }
  0x4a   :  { %363 = vmatpush.msrb.mxu0 %v332_v36  ;;  %432 = vmatpush.msrb.mxu2 %v407_v58  ;;  %v61_v36 = vld [vmem:[#allocation2 + $0x50] sm:$0xff]  ;;  %v52_v58 = vld [vmem:[#allocation2 + $0x8] sm:$0xff] }
  0x4b   :  { %464 = vmatpush.msrb.mxu3 %v447_v59  ;;  %397 = vmatpush.msrb.mxu1 %v370_v61  ;;  %v67_v59 = vld [vmem:[#allocation2 + $0x80] sm:$0xff] }
  0x4c   :  { %492 = vmatpush.msra.mxu0 %v491_v40  ;;  %433 = vmatpush.msrb.mxu2 %v406_v62  ;;  %v59_v40 = vld [vmem:[#allocation2 + $0x40] sm:$0xff] }
  0x4d   :  { %465 = vmatpush.msrb.mxu3 %v446_v63  ;;  %398 = vmatpush.msrb.mxu1 %v369_v1  ;;  %v102_v63 = vld [vmem:[#allocation2 + $0x198] sm:$0xff]  ;;  %v100_v1 = vld [vmem:[#allocation2 + $0x188] sm:$0xff] }
  0x4e   :  { %493 = vmatpush.msra.mxu0 %v490_v44  ;;  %434 = vmatpush.msrb.mxu2 %v405_v2  ;;  %v58_v44 = vld [vmem:[#allocation2 + $0x38] sm:$0xff] }
  0x4f   :  { %466 = vmatpush.msrb.mxu3 %v445_v3  ;;  %399 = vmatpush.msrb.mxu1 %v368_v5  ;;  %v99_v3 = vld [vmem:[#allocation2 + $0x180] sm:$0xff] }
  0x50   :  { %494 = vmatpush.msra.mxu0 %v489_v48  ;;  %435 = vmatpush.msrb.mxu2 %v404_v6  ;;  %v56_v48 = vld [vmem:[#allocation2 + $0x28] sm:$0xff]  ;;  %v98_v6 = vld [vmem:[#allocation2 + $0x178] sm:$0xff] }
  0x51   :  { %467 = vmatpush.msrb.mxu3 %v444_v7  ;;  %v97_v7 = vld [vmem:[#allocation2 + $0x170] sm:$0xff] }
  0x52   :  { %495 = vmatpush.msra.mxu0 %v488_v52 }
  0x53   :  { %468 = vmatpush.msrb.mxu3 %v443_v9 }
  0x54   :  { %496 = vmatpush.msra.mxu0 %v487_v56  ;;  %v53_v56 = vld [vmem:[#allocation2 + $0x10] sm:$0xff] }
  0x55   :  { %469 = vmatpush.msrb.mxu3 %v442_v11 }
  0x56   :  { %497 = vmatpush.msra.mxu0 %v486_v60  ;;  %v51_v60 = vld [vmem:[#allocation2] sm:$0xff] }
  0x57   :  { %470 = vmatpush.msrb.mxu3 %v441_v13 }
  0x58   :  { %498 = vmatpush.msra.mxu0 %v485_v0  ;;  %v101_v0 = vld [vmem:[#allocation2 + $0x190] sm:$0xff] }
  0x59   :  { %471 = vmatpush.msrb.mxu3 %v440_v15  ;;  %v93_v15 = vld [vmem:[#allocation2 + $0x150] sm:$0xff] }
  0x5a   :  { %499 = vmatpush.msra.mxu0 %v484_v4 }
  0x5c   :  { %500 = vmatpush.msra.mxu0 %v483_v8  ;;  %v96_v8 = vld [vmem:[#allocation2 + $0x168] sm:$0xff] }
  0x5e   :  { %501 = vmatpush.msra.mxu0 %v482_v10  ;;  %v95_v10 = vld [vmem:[#allocation2 + $0x160] sm:$0xff] }
  0x60   :  { %502 = vmatpush.msra.mxu0 %v481_v12 }
  0x62   :  { %503 = vmatpush.msra.mxu0 %v480_v14  ;;  %v94_v14 = vld [vmem:[#allocation2 + $0x158] sm:$0xff] }
  0x64   :  { %504 = vmatpush.msra.mxu0 %v479_v16  ;;  %v92_v16 = vld [vmem:[#allocation2 + $0x148] sm:$0xff] }
  0x66   :  { %505 = vmatpush.msra.mxu0 %v478_v17 }
  0x68   :  { %506 = vmatpush.msra.mxu0 %v477_v18  ;;  %v91_v18 = vld [vmem:[#allocation2 + $0x140] sm:$0xff] }
  0x6a   :  { %507 = vmatpush.msra.mxu0 %v476_v20  ;;  %v89_v20 = vld [vmem:[#allocation2 + $0x130] sm:$0xff] }
  0xa8   :  { %v212_v21 = vpop.f32.mrf.mxu0 }
  0xa9   :  { %v2640_v22 = vadd.f32 %v2637_v19, %v212_v21  ;;  %v88_v21 = vld [vmem:[#allocation2 + $0x128] sm:$0xff] }
  0xab   :  { %256 = vmatmul.f32.vlgmr.msra.gmra.mxu1 %v2640_v22  ;;  %292 = vmatmul.f32.vlgmr.msra.gmra.mxu2 %v2640_v22 }
  0xac   :  { %512 = vmatpush.msra.mxu1 %v82_v23  ;;  %554 = vmatpush.msra.mxu2 %v2642_v24  ;;  %v87_v23 = vld [vmem:[#allocation2 + $0x120] sm:$0xff] }
  0xae   :  { %513 = vmatpush.msra.mxu1 %v81_v25  ;;  %555 = vmatpush.msra.mxu2 %v2646_v26 }
  0xb0   :  { %v215_v31 = vpop.f32.mrf.mxu0  ;;  %514 = vmatpush.msra.mxu1 %v80_v27  ;;  %556 = vmatpush.msra.mxu2 %v2649_v28 }
  0xb1   :  { %v2656_v32 = vadd.f32 %v2637_v19, %v215_v31 }
  0xb2   :  { %515 = vmatpush.msra.mxu1 %v79_v29  ;;  %557 = vmatpush.msra.mxu2 %v2652_v30 }
  0xb3   :  { %328 = vmatmul.f32.vlgmr.msra.gmra.mxu3 %v2656_v32  ;;  %364 = vmatmul.f32.vlgmr.msrb.gmra.mxu0 %v2656_v32 }
  0xb4   :  { %516 = vmatpush.msra.mxu1 %v78_v33  ;;  %558 = vmatpush.msra.mxu2 %v62_v34 }
  0xb5   :  { %627 = vmatpush.msra.mxu3 %v102_v63 }
  0xb6   :  { %517 = vmatpush.msra.mxu1 %v77_v35  ;;  %559 = vmatpush.msra.mxu2 %v61_v36 }
  0xb7   :  { %628 = vmatpush.msra.mxu3 %v101_v0 }
  0xb8   :  { %v218_v41 = vpop.f32.mrf.mxu0  ;;  %518 = vmatpush.msra.mxu1 %v76_v37  ;;  %560 = vmatpush.msra.mxu2 %v60_v38 }
  0xb9   :  { %v2662_v42 = vadd.f32 %v2637_v19, %v218_v41  ;;  %629 = vmatpush.msra.mxu3 %v100_v1 }
  0xba   :  { %519 = vmatpush.msra.mxu1 %v75_v39  ;;  %561 = vmatpush.msra.mxu2 %v59_v40 }
  0xbb   :  { %400 = vmatmul.f32.vlgmr.msrb.gmra.mxu1 %v2662_v42  ;;  %436 = vmatmul.f32.vlgmr.msrb.gmra.mxu2 %v2662_v42 }
  0xbc   :  { %520 = vmatpush.msra.mxu1 %v74_v43  ;;  %562 = vmatpush.msra.mxu2 %v58_v44  ;;  %v84_v43 = vld [vmem:[#allocation2 + $0x108] sm:$0xff] }
  0xbd   :  { %630 = vmatpush.msra.mxu3 %v99_v3  ;;  %v2678_v3 = vld [vmem:[#allocation4 + $0x30] sm:$0xff] }
  0xbe   :  { %521 = vmatpush.msra.mxu1 %v73_v45  ;;  %563 = vmatpush.msra.mxu2 %v57_v46  ;;  %v83_v46 = vld [vmem:[#allocation2 + $0x100] sm:$0xff]  ;;  %vm597_vm0 = vcmp.gt.f32.partialorder %v2678_v3, 0.0 }
  0xbf   :  { %631 = vmatpush.msra.mxu3 %v98_v6 }
  0xc0   :  { %v221_v51 = vpop.f32.mrf.mxu0  ;;  %522 = vmatpush.msra.mxu1 %v72_v47  ;;  %564 = vmatpush.msra.mxu2 %v56_v48  ;;  %v85_v48 = vld [vmem:[#allocation2 + $0x110] sm:$0xff] }
  0xc1   :  { %v2667_v52 = vadd.f32 %v2637_v19, %v221_v51  ;;  %632 = vmatpush.msra.mxu3 %v97_v7  ;;  %v90_v19 = vld [vmem:[#allocation2 + $0x138] sm:$0xff] }
  0xc2   :  { %523 = vmatpush.msra.mxu1 %v71_v49  ;;  %565 = vmatpush.msra.mxu2 %v55_v50 }
  0xc3   :  { %472 = vmatmul.f32.vlgmr.msrb.gmra.mxu3 %v2667_v52  ;;  %508 = vmatmul.f32.vlgmr.msra.gmra.mxu0 %v2667_v52 }
  0xc4   :  { %524 = vmatpush.msra.mxu1 %v70_v53  ;;  %566 = vmatpush.msra.mxu2 %v54_v54  ;;  %v86_v54 = vld [vmem:[#allocation2 + $0x118] sm:$0xff] }
  0xc5   :  { %633 = vmatpush.msra.mxu3 %v96_v8 }
  0xc6   :  { %525 = vmatpush.msra.mxu1 %v69_v55  ;;  %567 = vmatpush.msra.mxu2 %v53_v56 }
  0xc7   :  { %634 = vmatpush.msra.mxu3 %v95_v10 }
  0xc8   :  { %526 = vmatpush.msra.mxu1 %v68_v57  ;;  %568 = vmatpush.msra.mxu2 %v52_v58 }
  0xc9   :  { %635 = vmatpush.msra.mxu3 %v94_v14 }
  0xca   :  { %527 = vmatpush.msra.mxu1 %v67_v59  ;;  %569 = vmatpush.msra.mxu2 %v51_v60 }
  0xcb   :  { %636 = vmatpush.msra.mxu3 %v93_v15 }
  0xcd   :  { %637 = vmatpush.msra.mxu3 %v92_v16 }
  0xcf   :  { %638 = vmatpush.msra.mxu3 %v91_v18  ;;  %v50_v18 = vld [vmem:[#allocation4 + $0x38] sm:$0xff] }
  0xd0   :  { %vm598_vm6 = vcmp.gt.f32.partialorder %v50_v18, 0.0 }
  0xd1   :  { %639 = vmatpush.msra.mxu3 %v90_v19 }
  0xd3   :  { %640 = vmatpush.msra.mxu3 %v89_v20  ;;  %v48_v20 = vld [vmem:[#allocation4 + $0x28] sm:$0xff] }
  0xd4   :  { %vm596_vm7 = vcmp.gt.f32.partialorder %v48_v20, 0.0 }
  0xd5   :  { %641 = vmatpush.msra.mxu3 %v88_v21 }
  0xd7   :  { %642 = vmatpush.msra.mxu3 %v87_v23 }
 0x128   :  { %v257_v2 = vpop.f32.mrf.mxu1 }
 0x12e   :  { %v293_v61 = vpop.f32.mrf.mxu2 }
 0x12f   :  { %528 = vmatmul.f32.vlgmr.msra.gmra.mxu1 %v293_v61  ;;  %570 = vmatmul.f32.vlgmr.msra.gmra.mxu2 %v293_v61 }
 0x130   :  { %v365_v62 = vpop.f32.mrf.mxu0 }
 0x136   :  { %v329_v4 = vpop.f32.mrf.mxu3 }
 0x137   :  { %531 = vmatmul.f32.gmra.mxu1 %v365_v62  ;;  %573 = vmatmul.f32.gmra.mxu2 %v365_v62  ;;  %v2674_v17 = vpack.i.bf16 %v257_v2, %v329_v4 }
 0x138   :  { %v401_v11 = vpop.f32.mrf.mxu1 }
 0x13e   :  { %v437_v5 = vpop.f32.mrf.mxu2 }
 0x13f   :  { %534 = vmatmul.f32.gmra.mxu1 %v437_v5  ;;  %576 = vmatmul.f32.gmra.mxu2 %v437_v5  ;;  %v47_v5 = vld [vmem:[#allocation4 + $0x20] sm:$0xff] }
 0x140   :  { %v509_v9 = vpop.f32.mrf.mxu0  ;;  %vm595_vm3 = vcmp.gt.f32.partialorder %v47_v5, 0.0 }
 0x146   :  { %v473_v12 = vpop.f32.mrf.mxu3 }
 0x147   :  { %537 = vmatmul.f32.gmra.mxu1 %v509_v9  ;;  %579 = vmatmul.f32.gmra.mxu2 %v509_v9  ;;  %v2430_v13 = vpack.i.bf16 %v401_v11, %v473_v12 }
 0x148   :  { %685 = vmatpush.msrb.mxu0 %v473_v12 }
 0x149   :  { %2431 = vrot.lane.b32.xlu1 %v2430_v13, %s2612_s0  ;;  %2416 = vrot.lane.b32.xlu2 %v2430_v13, %s2613_s1 }
 0x14a   :  { %686 = vmatpush.msrb.mxu0 %v401_v11 }
 0x14c   :  { %687 = vmatpush.msrb.mxu0 %v329_v4 }
 0x14e   :  { %688 = vmatpush.msrb.mxu0 %v257_v2 }
 0x151   :  { %2421 = vrot.lane.b32.xlu2 %v2430_v13, %s2614_s21 }
 0x159   :  { %2436 = vrot.lane.b32.xlu2 %v2674_v17, %s2614_s21 }
 0x1a3   :  { %v2417_v25 = vpop.permute.xlu2 %2416 }
 0x1a4   :  { %v2418_v27 = vunpack.i.l.bf16 %v2417_v25  ;;  %v2419_v29 = vunpack.i.h.bf16 %v2417_v25 }
 0x1a6   :  { %803 = vmatpush.msrb.mxu2 %v2418_v27 }
 0x1a8   :  { %804 = vmatpush.msrb.mxu2 %v2419_v29 }
 0x1ab   :  { %v2422_v31 = vpop.permute.xlu2 %2421 }
 0x1ac   :  { %v2423_v33 = vunpack.i.l.bf16 %v2422_v31  ;;  %v529_v34 = vpop.f32.mrf.mxu1  ;;  %v2424_v35 = vunpack.i.h.bf16 %v2422_v31 }
 0x1ad   :  { %v541_v50 = vmul.f32 %v529_v34, %v83_v46 }
 0x1ae   :  { %860 = vmatpush.msrb.mxu3 %v2423_v33 }
 0x1b0   :  { %861 = vmatpush.msrb.mxu3 %v2424_v35 }
 0x1b2   :  { %v571_v40 = vpop.f32.mrf.mxu2 }
 0x1b3   :  { %v2437_v36 = vpop.permute.xlu2 %2436 }
 0x1b4   :  { %v2438_v37 = vunpack.i.l.bf16 %v2437_v36  ;;  %v532_v38 = vpop.f32.mrf.mxu1  ;;  %v2439_v39 = vunpack.i.h.bf16 %v2437_v36 }
 0x1b5   :  { %v542_v49 = vmul.f32 %v532_v38, %v84_v43 }
 0x1b6   :  { %862 = vmatpush.msrb.mxu3 %v2438_v37 }
 0x1b7   :  { %v545_v55 = vadd.f32 %v542_v49, %v541_v50 }
 0x1b8   :  { %863 = vmatpush.msrb.mxu3 %v2439_v39 }
 0x1ba   :  { %v574_v53 = vpop.f32.mrf.mxu2 }
 0x1bb   :  { %v2432_v41 = vpop.permute.xlu1 %2431 }
 0x1bc   :  { %v2433_v44 = vunpack.i.l.bf16 %v2432_v41  ;;  %v535_v45 = vpop.f32.mrf.mxu1  ;;  %v2434_v47 = vunpack.i.h.bf16 %v2432_v41 }
 0x1bd   :  { %v543_v51 = vmul.f32 %v535_v45, %v85_v48 }
 0x1be   :  { %746 = vmatpush.msrb.mxu1 %v2433_v44 }
 0x1bf   :  { %v546_v57 = vadd.f32 %v545_v55, %v543_v51 }
 0x1c0   :  { %747 = vmatpush.msrb.mxu1 %v2434_v47 }
 0x1c2   :  { %v577_v62 = vpop.f32.mrf.mxu2 }
 0x1c4   :  { %v538_v56 = vpop.f32.mrf.mxu1 }
 0x1c5   :  { %v544_v58 = vmul.f32 %v538_v56, %v86_v54 }
 0x1c7   :  { %v547_v59 = vadd.f32 %v546_v57, %v544_v58 }
 0x1c9   :  { %v548_v60 = vrot.slane %v547_v59, 4 }
 0x1ca   :  { %v580_v7 = vpop.f32.mrf.mxu2 }
 0x1cb   :  { %v549_v61 = vadd.f32 %v548_v60, %v547_v59 }
 0x1cd   :  { %v550_v63 = vrot.slane %v549_v61, 2 }
 0x1cf   :  { %v551_v0 = vadd.f32 %v550_v63, %v549_v61 }
 0x1d1   :  { %v552_v1 = vrot.slane %v551_v0, 1 }
 0x1d3   :  { %v553_v2 = vadd.f32 %v552_v1, %v551_v0 }
 0x1d5   :  { %v578_v4 = vadd.f32 %v577_v62, %v553_v2  ;;  %v572_v6 = vadd.f32 %v571_v40, %v553_v2  ;;  %v581_v8 = vadd.f32 %v580_v7, %v553_v2  ;;  %v575_v11 = vadd.f32 %v574_v53, %v553_v2 }
 0x1d7   :  { %vm585_vm1 = vcmp.gt.f32.partialorder %v578_v4, 0.0  ;;  %v589_v9 = vmul.f32 0.2, %v578_v4  ;;  %vm583_vm2 = vcmp.gt.f32.partialorder %v572_v6, 0.0  ;;  %v587_v10 = vmul.f32 0.2, %v572_v6 }
 0x1d8   :  { %v590_v15 = vmul.f32 0.2, %v581_v8  ;;  %vm586_vm4 = vcmp.gt.f32.partialorder %v581_v8, 0.0  ;;  %v588_v19 = vmul.f32 0.2, %v575_v11  ;;  %vm584_vm5 = vcmp.gt.f32.partialorder %v575_v11, 0.0 }
 0x1d9   :  { %v593_v12 = vsel %vm585_vm1, %v578_v4, %v589_v9  ;;  %v591_v14 = vsel %vm583_vm2, %v572_v6, %v587_v10 }
 0x1da   :  { %v601_v13 = vsel %vm597_vm0, %v593_v12, -1e+30  ;;  %v599_v16 = vsel %vm595_vm3, %v591_v14, -1e+30  ;;  %v594_v21 = vsel %vm586_vm4, %v581_v8, %v590_v15  ;;  %v592_v23 = vsel %vm584_vm5, %v575_v11, %v588_v19 }
 0x1db   :  { %607 = vmax.xlane.f32.xlu1 %v601_v13  ;;  %603 = vmax.xlane.f32.xlu0 %v599_v16  ;;  %v602_v25 = vsel %vm598_vm6, %v594_v21, -1e+30  ;;  %v600_v27 = vsel %vm596_vm7, %v592_v23, -1e+30 }
 0x1e3   :  { %609 = vmax.xlane.f32.xlu1 %v602_v25  ;;  %605 = vmax.xlane.f32.xlu0 %v600_v27 }
 0x1f7   :  { %2426 = vrot.lane.b32.xlu0 %v2674_v17, %s2613_s1 }
 0x1ff   :  { %2441 = vrot.lane.b32.xlu0 %v2674_v17, %s2612_s0 }
 0x24e   :  { %v604_v29 = vpop.xlane.xlu0 %603  ;;  %v608_v34 = vpop.xlane.xlu1 %607 }
 0x24f   :  { %v611_v31 = vsub.f32 %v599_v16, %v604_v29  ;;  %v613_v38 = vsub.f32 %v601_v13, %v608_v34  ;;  %v1020_v29 = vld [vmem:[#allocation2 + $0x900] sm:$0xff]  ;;  %v1017_v34 = vld [vmem:[#allocation2 + $0x8e8] sm:$0xff] }
 0x251   :  { %v615_v33 = vmul.f32 1.442695, %v611_v31  ;;  %v619_v17 = vmul.f32 1.442695, %v613_v38  ;;  %v1019_v31 = vld [vmem:[#allocation2 + $0x8f8] sm:$0xff]  ;;  %v1013_v38 = vld [vmem:[#allocation2 + $0x8c8] sm:$0xff] }
 0x253   :  { %2464 = vpow2.f32 %v615_v33  ;;  %v1018_v33 = vld [vmem:[#allocation2 + $0x8f0] sm:$0xff] }
 0x256   :  { %v606_v35 = vpop.xlane.xlu0 %605  ;;  %v610_v41 = vpop.xlane.xlu1 %609 }
 0x257   :  { %v612_v36 = vsub.f32 %v600_v27, %v606_v35  ;;  %v614_v44 = vsub.f32 %v602_v25, %v610_v41  ;;  %v1022_v25 = vld [vmem:[#allocation2 + $0x910] sm:$0xff]  ;;  %v1021_v27 = vld [vmem:[#allocation2 + $0x908] sm:$0xff]  ;;  %v1016_v35 = vld [vmem:[#allocation2 + $0x8e0] sm:$0xff] }
 0x258   :  { %1023 = vmatpush.msra.mxu0 %v1022_v25  ;;  %v1011_v41 = vld [vmem:[#allocation2 + $0x8b8] sm:$0xff]  ;;  %v1084_v25 = vld [vmem:[#allocation2 + $0x9c0] sm:$0xff] }
 0x259   :  { %v2465_v37 = vpop.eup %2464  ;;  %v617_v39 = vmul.f32 1.442695, %v612_v36  ;;  %v621_v46 = vmul.f32 1.442695, %v614_v44  ;;  %v1015_v36 = vld [vmem:[#allocation2 + $0x8d8] sm:$0xff]  ;;  %v1056_v44 = vld [vmem:[#allocation2 + $0x980] sm:$0xff] }
 0x25a   :  { %2347 = vmatmul.msk.f32.vlgmr.msra.gmra.mxu3 %vm595_vm3, %v2465_v37  ;;  %v623_v40 = vsel %vm595_vm3, %v2465_v37, 0.0  ;;  %1024 = vmatpush.msra.mxu0 %v1021_v27  ;;  %v1014_v37 = vld [vmem:[#allocation2 + $0x8d0] sm:$0xff]  ;;  %v1124_v27 = vld [vmem:[#allocation2 + $0xa60] sm:$0xff] }
 0x25b   :  { %2466 = vpow2.f32 %v617_v39  ;;  %763 = vrot.lane.b32.xlu2 %v623_v40, %s2613_s1  ;;  %2351 = vmatmul.msk.f32.vlgmr.msrb.gmra.mxu0 %vm660_vm8, %v623_v40  ;;  %v1058_v39 = vld [vmem:[#allocation2 + $0x990] sm:$0xff] }
 0x25c   :  { %2468 = vpow2.f32 %v619_v17  ;;  %1025 = vmatpush.msra.mxu0 %v1020_v29  ;;  %v1012_v17 = vld [vmem:[#allocation2 + $0x8c0] sm:$0xff] }
 0x25d   :  { %2470 = vpow2.f32 %v621_v46  ;;  %v1009_v46 = vld [vmem:[#allocation2 + $0x8a8] sm:$0xff] }
 0x25e   :  { %1026 = vmatpush.msra.mxu0 %v1019_v31  ;;  %v1043_v31 = vld [vmem:[#allocation2 + $0x918] sm:$0xff] }
 0x260   :  { %1027 = vmatpush.msra.mxu0 %v1018_v33  ;;  %v1083_v33 = vld [vmem:[#allocation2 + $0x9b8] sm:$0xff] }
 0x261   :  { %v2467_v43 = vpop.eup %2466 }
 0x262   :  { %2348 = vmatmul.msk.f32.gmra.mxu3 %vm596_vm7, %v2467_v43  ;;  %v624_v45 = vsel %vm596_vm7, %v2467_v43, 0.0  ;;  %v2469_v47 = vpop.eup %2468  ;;  %1028 = vmatpush.msra.mxu0 %v1017_v34  ;;  %v1010_v43 = vld [vmem:[#allocation2 + $0x8b0] sm:$0xff]  ;;  %v1123_v34 = vld [vmem:[#allocation2 + $0xa58] sm:$0xff] }
 0x263   :  { %820 = vrot.lane.b32.xlu2 %v623_v40, %s2614_s21  ;;  %822 = vrot.lane.b32.xlu0 %v624_v45, %s2614_s21  ;;  %v625_v50 = vsel %vm597_vm0, %v2469_v47, 0.0  ;;  %v2471_v53 = vpop.eup %2470 }
 0x264   :  { %765 = vrot.lane.b32.xlu1 %v624_v45, %s2613_s1  ;;  %2352 = vmatmul.msk.f32.gmra.mxu0 %vm660_vm8, %v624_v45  ;;  %v626_v56 = vsel %vm598_vm6, %v2471_v53, 0.0 }
 0x265   :  { %1029 = vmatpush.msra.mxu0 %v1016_v35 }
 0x267   :  { %1030 = vmatpush.msra.mxu0 %v1015_v36  ;;  %v1122_v36 = vld [vmem:[#allocation2 + $0xa50] sm:$0xff] }
 0x269   :  { %v2427_v48 = vpop.permute.xlu0 %2426  ;;  %1031 = vmatpush.msra.mxu0 %v1014_v37  ;;  %v1082_v37 = vld [vmem:[#allocation2 + $0x9b0] sm:$0xff] }
 0x26a   :  { %v2428_v49 = vunpack.i.l.bf16 %v2427_v48  ;;  %2349 = vmatmul.msk.f32.gmra.mxu3 %vm597_vm0, %v2469_v47  ;;  %v2429_v51 = vunpack.i.h.bf16 %v2427_v48  ;;  %v1055_v47 = vld [vmem:[#allocation2 + $0x978] sm:$0xff]  ;;  %v1008_v48 = vld [vmem:[#allocation2 + $0x8a0] sm:$0xff] }
 0x26b   :  { %702 = vrot.lane.b32.xlu2 %v623_v40, %s2612_s0  ;;  %824 = vrot.lane.b32.xlu0 %v625_v50, %s2614_s21  ;;  %v1057_v40 = vld [vmem:[#allocation2 + $0x988] sm:$0xff] }
 0x26c   :  { %767 = vrot.lane.b32.xlu1 %v625_v50, %s2613_s1  ;;  %2353 = vmatmul.msk.f32.gmra.mxu0 %vm660_vm8, %v625_v50 }
 0x26d   :  { %805 = vmatpush.msrb.mxu2 %v2428_v49  ;;  %1032 = vmatpush.msra.mxu0 %v1013_v38  ;;  %v1054_v49 = vld [vmem:[#allocation2 + $0x970] sm:$0xff] }
 0x26e   :  { %v2545_v38 = vld [vmem:[#allocation2 + $0x50] sm:$0xff] }
 0x26f   :  { %806 = vmatpush.msrb.mxu2 %v2429_v51  ;;  %1033 = vmatpush.msra.mxu0 %v1012_v17  ;;  %v1007_v51 = vld [vmem:[#allocation2 + $0x898] sm:$0xff] }
 0x271   :  { %v2442_v54 = vpop.permute.xlu0 %2441  ;;  %1034 = vmatpush.msra.mxu0 %v1011_v41  ;;  %v1081_v41 = vld [vmem:[#allocation2 + $0x9a8] sm:$0xff] }
 0x272   :  { %v2443_v55 = vunpack.i.l.bf16 %v2442_v54  ;;  %2350 = vmatmul.msk.f32.gmra.mxu3 %vm598_vm6, %v2471_v53  ;;  %v2444_v57 = vunpack.i.h.bf16 %v2442_v54  ;;  %v1053_v53 = vld [vmem:[#allocation2 + $0x968] sm:$0xff] }
 0x273   :  { %704 = vrot.lane.b32.xlu2 %v624_v45, %s2612_s0  ;;  %826 = vrot.lane.b32.xlu0 %v626_v56, %s2614_s21  ;;  %v1093_v54 = vld [vmem:[#allocation2 + $0xa08] sm:$0xff] }
 0x274   :  { %769 = vrot.lane.b32.xlu1 %v626_v56, %s2613_s1  ;;  %2354 = vmatmul.msk.f32.gmra.mxu0 %vm660_vm8, %v626_v56 }
 0x275   :  { %748 = vmatpush.msrb.mxu1 %v2443_v55  ;;  %1035 = vmatpush.msra.mxu0 %v1010_v43  ;;  %v1052_v55 = vld [vmem:[#allocation2 + $0x960] sm:$0xff]  ;;  %v1121_v43 = vld [vmem:[#allocation2 + $0xa48] sm:$0xff] }
 0x277   :  { %749 = vmatpush.msrb.mxu1 %v2444_v57  ;;  %1036 = vmatpush.msra.mxu0 %v1009_v46  ;;  %v1051_v57 = vld [vmem:[#allocation2 + $0x958] sm:$0xff] }
 0x279   :  { %1059 = vmatpush.msra.mxu1 %v1058_v39  ;;  %1037 = vmatpush.msra.mxu0 %v1008_v48 }
 0x27b   :  { %706 = vrot.lane.b32.xlu2 %v625_v50, %s2612_s0  ;;  %1060 = vmatpush.msra.mxu1 %v1057_v40  ;;  %v1094_v50 = vld [vmem:[#allocation2 + $0xa10] sm:$0xff] }
 0x27c   :  { %1095 = vmatpush.msra.mxu2 %v1094_v50  ;;  %1038 = vmatpush.msra.mxu0 %v1007_v51  ;;  %v1080_v50 = vld [vmem:[#allocation2 + $0x9a0] sm:$0xff] }
 0x27d   :  { %1061 = vmatpush.msra.mxu1 %v1056_v44  ;;  %v1120_v51 = vld [vmem:[#allocation2 + $0xa40] sm:$0xff] }
 0x27e   :  { %1096 = vmatpush.msra.mxu2 %v1093_v54 }
 0x27f   :  { %1062 = vmatpush.msra.mxu1 %v1055_v47 }
 0x281   :  { %1063 = vmatpush.msra.mxu1 %v1054_v49 }
 0x283   :  { %708 = vrot.lane.b32.xlu2 %v626_v56, %s2612_s0  ;;  %1064 = vmatpush.msra.mxu1 %v1053_v53  ;;  %v1092_v56 = vld [vmem:[#allocation2 + $0xa00] sm:$0xff] }
 0x284   :  { %1097 = vmatpush.msra.mxu2 %v1092_v56  ;;  %v999_v56 = vld [vmem:[#allocation2 + $0x878] sm:$0xff] }
 0x285   :  { %1065 = vmatpush.msra.mxu1 %v1052_v55 }
 0x287   :  { %1066 = vmatpush.msra.mxu1 %v1051_v57  ;;  %v1079_v57 = vld [vmem:[#allocation2 + $0x998] sm:$0xff] }
 0x2b5   :  { %v764_v58 = vpop.permute.xlu2 %763 }
 0x2b6   :  { %2359 = vmatmul.msk.f32.vlgmr.msrb.gmra.mxu2 %vm660_vm8, %v764_v58  ;;  %v1091_v58 = vld [vmem:[#allocation2 + $0x9f8] sm:$0xff] }
 0x2b7   :  { %1098 = vmatpush.msra.mxu2 %v1091_v58  ;;  %v1119_v58 = vld [vmem:[#allocation2 + $0xa38] sm:$0xff] }
 0x2bd   :  { %v821_v59 = vpop.permute.xlu2 %820 }
 0x2be   :  { %2363 = vmatmul.msk.f32.vlgmr.msrb.gmra.mxu3 %vm660_vm8, %v821_v59  ;;  %v1130_v59 = vld [vmem:[#allocation2 + $0xa90] sm:$0xff] }
 0x2bf   :  { %1131 = vmatpush.msra.mxu3 %v1130_v59 }
 0x2c5   :  { %v703_v60 = vpop.permute.xlu2 %702 }
 0x2c6   :  { %2355 = vmatmul.msk.f32.vlgmr.msrb.gmra.mxu1 %vm660_vm8, %v703_v60  ;;  %v1050_v60 = vld [vmem:[#allocation2 + $0x950] sm:$0xff] }
 0x2c7   :  { %1067 = vmatpush.msra.mxu1 %v1050_v60 }
 0x2cd   :  { %v705_v61 = vpop.permute.xlu2 %704 }
 0x2ce   :  { %2356 = vmatmul.msk.f32.gmra.mxu1 %vm660_vm8, %v705_v61 }
 0x2d5   :  { %v707_v62 = vpop.permute.xlu2 %706  ;;  %v823_v63 = vpop.permute.xlu0 %822 }
 0x2d6   :  { %v766_v0 = vpop.permute.xlu1 %765  ;;  %2357 = vmatmul.msk.f32.gmra.mxu1 %vm660_vm8, %v707_v62  ;;  %2364 = vmatmul.msk.f32.gmra.mxu3 %vm660_vm8, %v823_v63  ;;  %v1090_v62 = vld [vmem:[#allocation2 + $0x9f0] sm:$0xff]  ;;  %v1049_v63 = vld [vmem:[#allocation2 + $0x948] sm:$0xff] }
 0x2d7   :  { %2360 = vmatmul.msk.f32.gmra.mxu2 %vm660_vm8, %v766_v0  ;;  %v1089_v0 = vld [vmem:[#allocation2 + $0x9e8] sm:$0xff]  ;;  %1068 = vmatpush.msra.mxu1 %v1049_v63 }
 0x2d8   :  { %1099 = vmatpush.msra.mxu2 %v1090_v62  ;;  %v690_v39 = vpop.f32.mrf.mxu0  ;;  %v1117_v62 = vld [vmem:[#allocation2 + $0xa28] sm:$0xff] }
 0x2da   :  { %1100 = vmatpush.msra.mxu2 %v1089_v0 }
 0x2dd   :  { %v709_v1 = vpop.permute.xlu2 %708  ;;  %v825_v3 = vpop.permute.xlu0 %824 }
 0x2de   :  { %v768_v2 = vpop.permute.xlu1 %767  ;;  %2358 = vmatmul.msk.f32.gmra.mxu1 %vm660_vm8, %v709_v1  ;;  %2365 = vmatmul.msk.f32.gmra.mxu3 %vm660_vm8, %v825_v3  ;;  %v644_v6 = vpop.f32.mrf.mxu3  ;;  %v1129_v1 = vld [vmem:[#allocation2 + $0xa88] sm:$0xff]  ;;  %v1048_v3 = vld [vmem:[#allocation2 + $0x940] sm:$0xff] }
 0x2df   :  { %2361 = vmatmul.msk.f32.gmra.mxu2 %vm660_vm8, %v768_v2  ;;  %v2746_v45 = vmax.f32 %v644_v6, 1e-30  ;;  %1132 = vmatpush.msra.mxu3 %v1129_v1  ;;  %v1127_v6 = vld [vmem:[#allocation2 + $0xa78] sm:$0xff]  ;;  %v1116_v1 = vld [vmem:[#allocation2 + $0xa20] sm:$0xff] }
 0x2e0   :  { %1069 = vmatpush.msra.mxu1 %v1048_v3  ;;  %v1115_v3 = vld [vmem:[#allocation2 + $0xa18] sm:$0xff] }
 0x2e1   :  { %2472 = vrcp.f32 %v2746_v45  ;;  %vm944_vm10 = vweird.f32 %v2746_v45  ;;  %v948_v35 = vand.u32 2147483647, %v2746_v45 }
 0x2e3   :  { %vm949_vm14 = vcmp.eq.f32.partialorder %v948_v35, 8.507059e+37 }
 0x2e5   :  { %v827_v5 = vpop.permute.xlu0 %826 }
 0x2e6   :  { %v770_v4 = vpop.permute.xlu1 %769  ;;  %2366 = vmatmul.msk.f32.gmra.mxu3 %vm660_vm8, %v827_v5  ;;  %v2728_v7 = vpop.f32.mrf.mxu3  ;;  %v1128_v5 = vld [vmem:[#allocation2 + $0xa80] sm:$0xff] }
 0x2e7   :  { %2362 = vmatmul.msk.f32.gmra.mxu2 %vm660_vm8, %v770_v4  ;;  %v2749_v61 = vpop.eup %2472  ;;  %v1088_v4 = vld [vmem:[#allocation2 + $0x9e0] sm:$0xff]  ;;  %1133 = vmatpush.msra.mxu3 %v1128_v5 }
 0x2e8   :  { %v940_v2 = vmul.f32 %v2749_v61, %v2746_v45  ;;  %1101 = vmatpush.msra.mxu2 %v1088_v4  ;;  %vm945_vm9 = vweird.f32 %v2749_v61 }
 0x2e9   :  { %1134 = vmatpush.msra.mxu3 %v1127_v6  ;;  %vm2765_vm12 = vmor %vm944_vm10, %vm945_vm9 }
 0x2ee   :  { %v2730_v8 = vpop.f32.mrf.mxu3 }
 0x2ef   :  { %v2773_v44 = vmax.f32 %v2730_v8, 1e-30 }
 0x2f1   :  { %vm974_vm4 = vweird.f32 %v2773_v44 }
 0x2f6   :  { %v2732_v9 = vpop.f32.mrf.mxu3 }
 0x2f7   :  { %v2787_v63 = vmax.f32 %v2732_v9, 1e-30  ;;  %v132_v9 = vld [vmem:[#allocation2 + $0x288] sm:$0xff] }
 0x2f9   :  { %vm989_vm9 = vweird.f32 %v2787_v63 }
 0x339   :  { %v808_v10 = vpop.f32.mrf.mxu2 }
 0x33a   :  { %897 = vrot.lane.b32.xlu0 %v808_v10, %s2613_s1  ;;  %v1047_v10 = vld [vmem:[#allocation2 + $0x938] sm:$0xff] }
 0x33b   :  { %1070 = vmatpush.msra.mxu1 %v1047_v10  ;;  %v134_v10 = vld [vmem:[#allocation2 + $0x298] sm:$0xff] }
 0x33c   :  { %1171 = vmatpush.msrb.mxu0 %v134_v10 }
 0x341   :  { %v865_v11 = vpop.f32.mrf.mxu3 }
 0x342   :  { %913 = vrot.lane.b32.xlu2 %v865_v11, %s2612_s0  ;;  %v1087_v11 = vld [vmem:[#allocation2 + $0x9d8] sm:$0xff] }
 0x343   :  { %v751_v12 = vpop.f32.mrf.mxu1  ;;  %1102 = vmatpush.msra.mxu2 %v1087_v11  ;;  %v133_v11 = vld [vmem:[#allocation2 + $0x290] sm:$0xff] }
 0x344   :  { %881 = vrot.lane.b32.xlu1 %v751_v12, %s2614_s21  ;;  %v1126_v12 = vld [vmem:[#allocation2 + $0xa70] sm:$0xff]  ;;  %1172 = vmatpush.msrb.mxu0 %v133_v11  ;;  %v993_v11 = vand.u32 2147483647, %v2787_v63 }
 0x345   :  { %1135 = vmatpush.msra.mxu3 %v1126_v12  ;;  %v693_v12 = vpop.f32.mrf.mxu0 }
 0x346   :  { %1173 = vmatpush.msrb.mxu0 %v132_v9  ;;  %v2551_v9 = vld [vmem:[#allocation2 + $0x20] sm:$0xff] }
 0x34b   :  { %v754_v13 = vpop.f32.mrf.mxu1 }
 0x34c   :  { %883 = vrot.lane.b32.xlu1 %v754_v13, %s2614_s21  ;;  %v941_v13 = vsub.f32 1.0, %v940_v2 }
 0x353   :  { %v757_v14 = vpop.f32.mrf.mxu1 }
 0x354   :  { %885 = vrot.lane.b32.xlu2 %v757_v14, %s2614_s21  ;;  %v1046_v14 = vld [vmem:[#allocation2 + $0x930] sm:$0xff] }
 0x355   :  { %1071 = vmatpush.msra.mxu1 %v1046_v14 }
 0x359   :  { %v868_v15 = vpop.f32.mrf.mxu3 }
 0x35a   :  { %v811_v16 = vpop.f32.mrf.mxu2  ;;  %915 = vrot.lane.b32.xlu1 %v868_v15, %s2612_s0  ;;  %v1086_v15 = vld [vmem:[#allocation2 + $0x9d0] sm:$0xff] }
 0x35b   :  { %899 = vrot.lane.b32.xlu0 %v811_v16, %s2613_s1  ;;  %v760_v18 = vpop.f32.mrf.mxu1  ;;  %1103 = vmatpush.msra.mxu2 %v1086_v15  ;;  %v942_v16 = vmul.f32 %v2749_v61, %v941_v13  ;;  %v131_v15 = vld [vmem:[#allocation2 + $0x280] sm:$0xff] }
 0x35c   :  { %1174 = vmatpush.msrb.mxu0 %v131_v15 }
 0x35d   :  { %v943_v29 = vadd.f32 %v2749_v61, %v942_v16 }
 0x35f   :  { %v947_v40 = vsel %vm2765_vm12, %v2749_v61, %v943_v29  ;;  %v1118_v61 = vld [vmem:[#allocation2 + $0xa30] sm:$0xff]  ;;  %vm994_vm12 = vcmp.eq.f32.partialorder %v993_v11, 8.507059e+37  ;;  %v167_v11 = vld [vmem:[#allocation2 + $0x3a0] sm:$0x1] }
 0x361   :  { %v871_v20 = vpop.f32.mrf.mxu3 }
 0x362   :  { %v814_v19 = vpop.f32.mrf.mxu2  ;;  %887 = vrot.lane.b32.xlu1 %v760_v18, %s2614_s21  ;;  %917 = vrot.lane.b32.xlu2 %v871_v20, %s2612_s0  ;;  %v1045_v18 = vld [vmem:[#allocation2 + $0x928] sm:$0xff] }
 0x363   :  { %901 = vrot.lane.b32.xlu0 %v814_v19, %s2613_s1  ;;  %v1085_v19 = vld [vmem:[#allocation2 + $0x9c8] sm:$0xff]  ;;  %1072 = vmatpush.msra.mxu1 %v1045_v18 }
 0x364   :  { %v1125_v20 = vld [vmem:[#allocation2 + $0xa68] sm:$0xff]  ;;  %1104 = vmatpush.msra.mxu2 %v1085_v19  ;;  %v130_v19 = vld [vmem:[#allocation2 + $0x278] sm:$0xff] }
 0x365   :  { %1136 = vmatpush.msra.mxu3 %v1125_v20  ;;  %1175 = vmatpush.msrb.mxu0 %v130_v19 }
 0x366   :  { %1105 = vmatpush.msra.mxu2 %v1084_v25 }
 0x367   :  { %1137 = vmatpush.msra.mxu3 %v1124_v27 }
 0x368   :  { %1106 = vmatpush.msra.mxu2 %v1083_v33 }
 0x369   :  { %v874_v23 = vpop.f32.mrf.mxu3  ;;  %1138 = vmatpush.msra.mxu3 %v1123_v34  ;;  %v2544_v34 = vld [vmem:[#allocation2 + $0x58] sm:$0xff] }
 0x36a   :  { %v817_v21 = vpop.f32.mrf.mxu2  ;;  %919 = vrot.lane.b32.xlu2 %v874_v23, %s2612_s0  ;;  %v1044_v23 = vld [vmem:[#allocation2 + $0x920] sm:$0xff]  ;;  %1107 = vmatpush.msra.mxu2 %v1082_v37 }
 0x36b   :  { %903 = vrot.lane.b32.xlu0 %v817_v21, %s2613_s1  ;;  %v2755_v21 = vmax.f32 %v2728_v7, 1e-30  ;;  %1073 = vmatpush.msra.mxu1 %v1044_v23  ;;  %v950_v7 = vand.u32 2147483648, %v2746_v45 }
 0x36c   :  { %1139 = vmatpush.msra.mxu3 %v1122_v36  ;;  %1108 = vmatpush.msra.mxu2 %v1081_v41  ;;  %v1000_v36 = vld [vmem:[#allocation2 + $0x880] sm:$0xff] }
 0x36d   :  { %2474 = vrcp.f32 %v2755_v21  ;;  %1074 = vmatpush.msra.mxu1 %v1043_v31  ;;  %v951_v46 = vor.u32 1.1754944e-38, %v950_v7  ;;  %v965_v18 = vand.u32 2147483648, %v2755_v21  ;;  %vm959_vm0 = vweird.f32 %v2755_v21  ;;  %v128_v7 = vld [vmem:[#allocation2 + $0x268] sm:$0xff]  ;;  %v127_v41 = vld [vmem:[#allocation2 + $0x260] sm:$0xff] }
 0x36e   :  { %1140 = vmatpush.msra.mxu3 %v1121_v43  ;;  %1109 = vmatpush.msra.mxu2 %v1080_v50  ;;  %2476 = vrcp.f32 %v2773_v44  ;;  %v980_v43 = vand.u32 2147483648, %v2773_v44 }
 0x36f   :  { %v952_v54 = vsel %vm949_vm14, %v951_v46, %v947_v40  ;;  %2478 = vrcp.f32 %v2787_v63  ;;  %v966_v31 = vor.u32 1.1754944e-38, %v965_v18  ;;  %v696_v46 = vpop.f32.mrf.mxu0 }
 0x370   :  { %1141 = vmatpush.msra.mxu3 %v1120_v51  ;;  %1110 = vmatpush.msra.mxu2 %v1079_v57  ;;  %v2547_v51 = vld [vmem:[#allocation2 + $0x40] sm:$0xff] }
 0x372   :  { %1142 = vmatpush.msra.mxu3 %v1119_v58  ;;  %v2548_v58 = vld [vmem:[#allocation2 + $0x38] sm:$0xff] }
 0x373   :  { %v2777_v53 = vpop.eup %2474 }
 0x374   :  { %v955_v59 = vmul.f32 %v2777_v53, %v2755_v21  ;;  %1143 = vmatpush.msra.mxu3 %v1118_v61  ;;  %v2789_v2 = vpop.eup %2476  ;;  %vm960_vm15 = vweird.f32 %v2777_v53 }
 0x375   :  { %v970_v4 = vmul.f32 %v2789_v2, %v2773_v44  ;;  %v2799_v16 = vpop.eup %2478  ;;  %vm2805_vm1 = vmor %vm959_vm0, %vm960_vm15  ;;  %vm975_vm3 = vweird.f32 %v2789_v2  ;;  %vm1241_vm15 = vcmp.gt.f32.partialorder %v167_v11, 0.0 }
 0x376   :  { %v956_v0 = vsub.f32 1.0, %v955_v59  ;;  %1144 = vmatpush.msra.mxu3 %v1117_v62  ;;  %v985_v20 = vmul.f32 %v2799_v16, %v2787_v63  ;;  %vm2826_vm5 = vmor %vm974_vm4, %vm975_vm3  ;;  %v1001_v62 = vld [vmem:[#allocation2 + $0x888] sm:$0xff]  ;;  %vm990_vm7 = vweird.f32 %v2799_v16 }
 0x377   :  { %v971_v13 = vsub.f32 1.0, %v970_v4  ;;  %v995_v4 = vand.u32 2147483648, %v2787_v63  ;;  %vm991_vm10 = vmor %vm989_vm9, %vm990_vm7  ;;  %v1002_v63 = vld [vmem:[#allocation2 + $0x890] sm:$0xff] }
 0x378   :  { %1145 = vmatpush.msra.mxu3 %v1116_v1  ;;  %v957_v6 = vmul.f32 %v2777_v53, %v956_v0  ;;  %v2549_v1 = vld [vmem:[#allocation2 + $0x30] sm:$0xff] }
 0x379   :  { %v972_v27 = vmul.f32 %v2789_v2, %v971_v13  ;;  %v996_v15 = vor.u32 1.1754944e-38, %v995_v4  ;;  %v171_v4 = vld [vmem:[#allocation2 + $0x3c0] sm:$0xff] }
 0x37a   :  { %1146 = vmatpush.msra.mxu3 %v1115_v3  ;;  %v958_v14 = vadd.f32 %v2777_v53, %v957_v6 }
 0x37c   :  { %1401 = vmatpush.msrb.mxu3 %v2642_v24  ;;  %v963_v24 = vand.u32 2147483647, %v2755_v21  ;;  %v129_v21 = vld [vmem:[#allocation2 + $0x270] sm:$0xff] }
 0x37d   :  { %1176 = vmatpush.msrb.mxu0 %v129_v21  ;;  %v2555_v21 = vld [vmem:[#allocation2] sm:$0xff] }
 0x37e   :  { %1402 = vmatpush.msrb.mxu3 %v2646_v26  ;;  %vm964_vm2 = vcmp.eq.f32.partialorder %v963_v24, 8.507059e+37  ;;  %v2552_v24 = vld [vmem:[#allocation2 + $0x18] sm:$0xff] }
 0x37f   :  { %1177 = vmatpush.msrb.mxu0 %v128_v7  ;;  %v119_v7 = vld [vmem:[#allocation2 + $0x220] sm:$0xff] }
 0x380   :  { %1403 = vmatpush.msrb.mxu3 %v2649_v28  ;;  %v962_v28 = vsel %vm2805_vm1, %v2777_v53, %v958_v14 }
 0x381   :  { %v967_v35 = vsel %vm964_vm2, %v966_v31, %v962_v28  ;;  %1178 = vmatpush.msrb.mxu0 %v127_v41  ;;  %v123_v31 = vld [vmem:[#allocation2 + $0x240] sm:$0xff] }
 0x382   :  { %1404 = vmatpush.msrb.mxu3 %v2652_v30 }
 0x384   :  { %1405 = vmatpush.msrb.mxu3 %v2544_v34  ;;  %v121_v34 = vld [vmem:[#allocation2 + $0x230] sm:$0xff] }
 0x386   :  { %1406 = vmatpush.msrb.mxu3 %v2545_v38  ;;  %v1163_v38 = vld [vmem:[#allocation2 + $0xab8] sm:$0xff] }
 0x39c   :  { %v914_v48 = vpop.permute.xlu2 %913 }
 0x3ac   :  { %v898_v45 = vpop.permute.xlu0 %897 }
 0x3ae   :  { %v886_v23 = vpop.permute.xlu2 %885 }
 0x3b6   :  { %v882_v17 = vpop.permute.xlu1 %881 }
 0x3b7   :  { %v925_v47 = vsel %vm660_vm8, %v690_v39, %v882_v17  ;;  %v986_v39 = vsub.f32 1.0, %v985_v20  ;;  %v973_v17 = vadd.f32 %v2789_v2, %v972_v27  ;;  %v2554_v27 = vld [vmem:[#allocation2 + $0x8] sm:$0xff] }
 0x3b8   :  { %v930_v49 = vsel %vm929_vm11, %v925_v47, %v898_v45  ;;  %v2546_v45 = vld [vmem:[#allocation2 + $0x48] sm:$0xff] }
 0x3b9   :  { %v935_v55 = vsel %vm934_vm13, %v930_v49, %v914_v48  ;;  %1407 = vmatpush.msrb.mxu3 %v2546_v45  ;;  %v978_v48 = vand.u32 2147483647, %v2773_v44  ;;  %v126_v49 = vld [vmem:[#allocation2 + $0x258] sm:$0xff]  ;;  %v927_v44 = vsel %vm660_vm8, %v696_v46, %v886_v23  ;;  %v1164_v45 = vld [vmem:[#allocation2 + $0xac0] sm:$0xff] }
 0x3ba   :  { %v953_v8 = vmul.f32 %v952_v54, %v935_v55  ;;  %v977_v54 = vsel %vm2826_vm5, %v2789_v2, %v973_v17  ;;  %v987_v55 = vmul.f32 %v2799_v16, %v986_v39  ;;  %1179 = vmatpush.msrb.mxu0 %v126_v49  ;;  %v1152_v17 = vld [vmem:[#allocation2 + $0xaa0] sm:$0xff]  ;;  %v1153_v49 = vld [vmem:[#allocation2 + $0xaa8] sm:$0xff] }
 0x3bb   :  { %1408 = vmatpush.msrb.mxu3 %v2547_v51  ;;  %vm979_vm6 = vcmp.eq.f32.partialorder %v978_v48, 8.507059e+37 }
 0x3bc   :  { %v2783_v60 = vadd.f32 %v999_v56, %v953_v8  ;;  %v918_v53 = vpop.permute.xlu2 %917  ;;  %v125_v56 = vld [vmem:[#allocation2 + $0x250] sm:$0xff]  ;;  %v981_v8 = vor.u32 1.1754944e-38, %v980_v43  ;;  %v988_v3 = vadd.f32 %v2799_v16, %v987_v55 }
 0x3bd   :  { %1409 = vmatpush.msrb.mxu3 %v2548_v58  ;;  %1180 = vmatpush.msrb.mxu0 %v125_v56 }
 0x3be   :  { %1039 = vmatmul.f32.vlgmr.msra.gmra.mxu0 %v2783_v60  ;;  %v884_v5 = vpop.permute.xlu1 %883  ;;  %v982_v61 = vsel %vm979_vm6, %v981_v8, %v977_v54  ;;  %v992_v13 = vsel %vm991_vm10, %v2799_v16, %v988_v3  ;;  %v1165_v54 = vld [vmem:[#allocation2 + $0xac8] sm:$0xff]  ;;  %v170_v3 = vld [vmem:[#allocation2 + $0x3b8] sm:$0xff] }
 0x3bf   :  { %v926_v29 = vsel %vm660_vm8, %v693_v12, %v884_v5  ;;  %1410 = vmatpush.msrb.mxu3 %v2549_v1  ;;  %v2550_v5 = vld [vmem:[#allocation2 + $0x28] sm:$0xff]  ;;  %v699_v12 = vpop.f32.mrf.mxu0  ;;  %v997_v20 = vsel %vm994_vm12, %v996_v15, %v992_v13 }
 0x3c1   :  { %1411 = vmatpush.msrb.mxu3 %v2550_v5  ;;  %v172_v5 = vld [vmem:[#allocation2 + $0x3c8] sm:$0xff] }
 0x3c3   :  { %1412 = vmatpush.msrb.mxu3 %v2551_v9 }
 0x3c4   :  { %v920_v19 = vpop.permute.xlu2 %919 }
 0x3c5   :  { %1413 = vmatpush.msrb.mxu3 %v2552_v24 }
 0x3cc   :  { %v916_v25 = vpop.permute.xlu1 %915 }
 0x3cd   :  { %v900_v33 = vpop.permute.xlu0 %899 }
 0x3ce   :  { %v931_v30 = vsel %vm929_vm11, %v926_v29, %v900_v33  ;;  %v124_v29 = vld [vmem:[#allocation2 + $0x248] sm:$0xff]  ;;  %v122_v33 = vld [vmem:[#allocation2 + $0x238] sm:$0xff] }
 0x3cf   :  { %v936_v37 = vsel %vm934_vm13, %v931_v30, %v916_v25  ;;  %v2553_v25 = vld [vmem:[#allocation2 + $0x10] sm:$0xff]  ;;  %1181 = vmatpush.msrb.mxu0 %v124_v29  ;;  %v120_v30 = vld [vmem:[#allocation2 + $0x228] sm:$0xff] }
 0x3d0   :  { %v968_v40 = vmul.f32 %v967_v35, %v936_v37  ;;  %1414 = vmatpush.msrb.mxu3 %v2553_v25  ;;  %v1151_v35 = vld [vmem:[#allocation2 + $0xa98] sm:$0xff]  ;;  %v115_v25 = vld [vmem:[#allocation2 + $0x200] sm:$0xff] }
 0x3d1   :  { %1182 = vmatpush.msrb.mxu0 %v123_v31  ;;  %v113_v31 = vld [vmem:[#allocation2 + $0x1f0] sm:$0xff] }
 0x3d2   :  { %v2822_v47 = vadd.f32 %v1000_v36, %v968_v40  ;;  %1415 = vmatpush.msrb.mxu3 %v2554_v27  ;;  %v114_v27 = vld [vmem:[#allocation2 + $0x1f8] sm:$0xff] }
 0x3d3   :  { %1183 = vmatpush.msrb.mxu0 %v122_v33  ;;  %v112_v33 = vld [vmem:[#allocation2 + $0x1e8] sm:$0xff] }
 0x3d4   :  { %1075 = vmatmul.f32.vlgmr.msra.gmra.mxu1 %v2822_v47  ;;  %v888_v6 = vpop.permute.xlu1 %887  ;;  %1416 = vmatpush.msrb.mxu3 %v2555_v21 }
 0x3d5   :  { %v902_v57 = vpop.permute.xlu0 %901  ;;  %v928_v14 = vsel %vm660_vm8, %v699_v12, %v888_v6  ;;  %1184 = vmatpush.msrb.mxu0 %v121_v34  ;;  %v168_v6 = vld [vmem:[#allocation2 + $0x3a8] sm:$0x1]  ;;  %v2615_v12 = vmov 0   ;;  %v111_v34 = vld [vmem:[#allocation2 + $0x1e0] sm:$0xff] }
 0x3d6   :  { %v932_v59 = vsel %vm929_vm11, %v927_v44, %v902_v57  ;;  %v1166_v57 = vld [vmem:[#allocation2 + $0xad0] sm:$0xff]  ;;  %v1287_v9 = vadd.f32 %v168_v6, %v167_v11  ;;  %vm1257_vm14 = vcmp.gt.f32.partialorder %v168_v6, 0.0  ;;  %v1242_v15 = vsel %vm1241_vm15, 1, %v2615_v12 }
 0x3d7   :  { %v937_v0 = vsel %vm934_vm13, %v932_v59, %v918_v53  ;;  %1185 = vmatpush.msrb.mxu0 %v120_v30  ;;  %v1154_v53 = vld [vmem:[#allocation2 + $0xab0] sm:$0xff]  ;;  %v1243_v24 = vperm.slane %v1242_v15, 0 }
 0x3d8   :  { %v983_v2 = vmul.f32 %v982_v61, %v937_v0 }
 0x3d9   :  { %1186 = vmatpush.msrb.mxu0 %v119_v7  ;;  %vm2863_vm1 = vcmp.eq.s32.totalorder %v1243_v24, 1 }
 0x3da   :  { %v2841_v10 = vadd.f32 %v1001_v62, %v983_v2  ;;  %v169_v2 = vld [vmem:[#allocation2 + $0x3b0] sm:$0xff] }
 0x3dc   :  { %1111 = vmatmul.f32.vlgmr.msra.gmra.mxu2 %v2841_v10 }
 0x3dd   :  { %v904_v18 = vpop.permute.xlu0 %903 }
 0x3de   :  { %v933_v26 = vsel %vm929_vm11, %v928_v14, %v904_v18  ;;  %v1258_v14 = vsel %vm1257_vm14, 1, %v2615_v12 }
 0x3df   :  { %v938_v23 = vsel %vm934_vm13, %v933_v26, %v920_v19  ;;  %vm1288_vm13 = vcmp.gt.f32.partialorder %v1287_v9, 0.0  ;;  %v1259_v18 = vperm.slane %v1258_v14, 0  ;;  %v118_v19 = vld [vmem:[#allocation2 + $0x218] sm:$0xff]  ;;  %v117_v26 = vld [vmem:[#allocation2 + $0x210] sm:$0xff] }
 0x3e0   :  { %v998_v28 = vmul.f32 %v997_v20, %v938_v23  ;;  %v2857_v13 = vsel %vm1288_vm13, 1, %v2615_v12  ;;  %1308 = vmatpush.msrb.mxu2 %v118_v19  ;;  %v116_v20 = vld [vmem:[#allocation2 + $0x208] sm:$0xff] }
 0x3e1   :  { %vm2859_vm0 = vcmp.eq.s32.totalorder %v1259_v18, 1 }
 0x3e2   :  { %v2850_v16 = vadd.f32 %v1002_v63, %v998_v28  ;;  %1309 = vmatpush.msrb.mxu2 %v117_v26 }
 0x3e4   :  { %1147 = vmatmul.f32.vlgmr.msra.gmra.mxu3 %v2850_v16  ;;  %1310 = vmatpush.msrb.mxu2 %v116_v20 }
 0x3e6   :  { %1311 = vmatpush.msrb.mxu2 %v115_v25 }
 0x3e8   :  { %1312 = vmatpush.msrb.mxu2 %v114_v27 }
 0x3ea   :  { %1313 = vmatpush.msrb.mxu2 %v113_v31 }
 0x3ec   :  { %1314 = vmatpush.msrb.mxu2 %v112_v33 }
 0x3ee   :  { %1315 = vmatpush.msrb.mxu2 %v111_v34 }
 0x43b   :  { %v1040_v36 = vpop.f32.mrf.mxu0 }
 0x43c   :  { %v1155_v37 = vadd.f32 %v1151_v35, %v1040_v36 }
 0x43e   :  { %2480 = vtanh.f32 %v1155_v37 }
 0x444   :  { %v2481_v39 = vpop.eup %2480 }
 0x445   :  { %v1167_v40 = vmul.f32 %v2481_v39, %v1163_v38 }
 0x447   :  { %1187 = vmatmul.f32.vlgmr.msrb.gmra.mxu0 %v1167_v40 }
 0x451   :  { %v1076_v41 = vpop.f32.mrf.mxu1 }
 0x452   :  { %v1156_v43 = vadd.f32 %v1152_v17, %v1076_v41  ;;  %v110_v41 = vld [vmem:[#allocation2 + $0x1d8] sm:$0xff] }
 0x453   :  { %1316 = vmatpush.msrb.mxu2 %v110_v41 }
 0x454   :  { %2482 = vtanh.f32 %v1156_v43  ;;  %v109_v43 = vld [vmem:[#allocation2 + $0x1d0] sm:$0xff] }
 0x455   :  { %1317 = vmatpush.msrb.mxu2 %v109_v43 }
 0x45a   :  { %v2483_v46 = vpop.eup %2482 }
 0x45b   :  { %v1168_v48 = vmul.f32 %v2483_v46, %v1164_v45  ;;  %v108_v45 = vld [vmem:[#allocation2 + $0x1c8] sm:$0xff]  ;;  %v107_v46 = vld [vmem:[#allocation2 + $0x1c0] sm:$0xff] }
 0x45c   :  { %1318 = vmatpush.msrb.mxu2 %v108_v45  ;;  %v150_v45 = vld [vmem:[#allocation2 + $0x318] sm:$0xff] }
 0x45d   :  { %1190 = vmatmul.f32.gmra.mxu0 %v1168_v48  ;;  %v106_v48 = vld [vmem:[#allocation2 + $0x1b8] sm:$0xff] }
 0x45e   :  { %1319 = vmatpush.msrb.mxu2 %v107_v46  ;;  %v149_v46 = vld [vmem:[#allocation2 + $0x310] sm:$0xff]  ;;  %1434 = vmatpush.msra.mxu0 %v150_v45 }
 0x45f   :  { %v1112_v50 = vpop.f32.mrf.mxu2 }
 0x460   :  { %v1157_v51 = vadd.f32 %v1153_v49, %v1112_v50  ;;  %1320 = vmatpush.msrb.mxu2 %v106_v48  ;;  %v105_v49 = vld [vmem:[#allocation2 + $0x1b0] sm:$0xff]  ;;  %v104_v50 = vld [vmem:[#allocation2 + $0x1a8] sm:$0xff]  ;;  %1435 = vmatpush.msra.mxu0 %v149_v46 }
 0x462   :  { %2484 = vtanh.f32 %v1157_v51  ;;  %1321 = vmatpush.msrb.mxu2 %v105_v49  ;;  %v103_v51 = vld [vmem:[#allocation2 + $0x1a0] sm:$0xff] }
 0x464   :  { %1322 = vmatpush.msrb.mxu2 %v104_v50  ;;  %v148_v50 = vld [vmem:[#allocation2 + $0x308] sm:$0xff] }
 0x465   :  { %1436 = vmatpush.msra.mxu0 %v148_v50  ;;  %v135_v50 = vld [vmem:[#allocation2 + $0x2a0] sm:$0xff] }
 0x466   :  { %1323 = vmatpush.msrb.mxu2 %v103_v51 }
 0x467   :  { %v1148_v55 = vpop.f32.mrf.mxu3 }
 0x468   :  { %v2485_v56 = vpop.eup %2484  ;;  %v1158_v44 = vadd.f32 %v1154_v53, %v1148_v55  ;;  %v2456_v53 = vld [vmem:[#allocation2 + $0x3a8] ss:$0 sm:$0xff] }
 0x469   :  { %v1169_v8 = vmul.f32 %v2485_v56, %v1165_v54  ;;  %v2457_v54 = vld [vmem:[#allocation2 + $0x3a0] ss:$0 sm:$0xff] }
 0x46a   :  { %2486 = vtanh.f32 %v1158_v44 }
 0x46b   :  { %1193 = vmatmul.f32.gmra.mxu0 %v1169_v8 }
 0x470   :  { %v2487_v58 = vpop.eup %2486 }
 0x471   :  { %v1170_v59 = vmul.f32 %v2487_v58, %v1166_v57 }
 0x473   :  { %1196 = vmatmul.f32.gmra.mxu0 %v1170_v59 }
 0x4c4   :  { %v1188_v61 = vpop.f32.mrf.mxu0 }
 0x4da   :  { %v1191_v62 = vpop.f32.mrf.mxu0 }
 0x4e8   :  { %v1194_v0 = vpop.f32.mrf.mxu0 }
 0x4f0   :  { %v1197_v1 = vpop.f32.mrf.mxu0 }
 0x4f1   :  { %1224 = vmatpush.msrb.mxu1 %v1197_v1 }
 0x4f3   :  { %1225 = vmatpush.msrb.mxu1 %v1194_v0  ;;  %v1302_v0 = vperm.slane %v2857_v13, 0 }
 0x4f5   :  { %1226 = vmatpush.msrb.mxu1 %v1191_v62  ;;  %vm2884_vm2 = vcmp.eq.s32.totalorder %v1302_v0, 1 }
 0x4f7   :  { %1227 = vmatpush.msrb.mxu1 %v1188_v61 }
 0x4f8   :  { %2367 = vmatmul.msk.f32.vlgmr.msrb.gmra.mxu1 %vm660_vm8, %v169_v2 }
 0x500   :  { %2368 = vmatmul.msk.f32.gmra.mxu1 %vm660_vm8, %v170_v3 }
 0x508   :  { %2369 = vmatmul.msk.f32.gmra.mxu1 %vm660_vm8, %v171_v4  ;;  %v1473_v4 = vld [vmem:[#allocation2 + $0xb28] sm:$0xff] }
 0x510   :  { %2370 = vmatmul.msk.f32.gmra.mxu1 %vm660_vm8, %v172_v5 }
 0x575   :  { %v1229_v28 = vpop.f32.mrf.mxu1 }
 0x576   :  { %v1261_v21 = vsel %vm2859_vm0, %v1229_v28, -1e+30  ;;  %v1245_v29 = vsel %vm2863_vm1, %v1229_v28, -1e+30 }
 0x577   :  { %1265 = vmax.xlane.f32.xlu0 %v1261_v21  ;;  %1249 = vmax.xlane.f32.xlu1 %v1245_v29 }
 0x57d   :  { %v1232_v30 = vpop.f32.mrf.mxu1 }
 0x57e   :  { %v1262_v7 = vsel %vm2859_vm0, %v1232_v30, -1e+30  ;;  %v1246_v35 = vsel %vm2863_vm1, %v1232_v30, -1e+30 }
 0x57f   :  { %1267 = vmax.xlane.f32.xlu1 %v1262_v7  ;;  %1251 = vmax.xlane.f32.xlu2 %v1246_v35 }
 0x585   :  { %v1235_v36 = vpop.f32.mrf.mxu1 }
 0x586   :  { %v1263_v37 = vsel %vm2859_vm0, %v1235_v36, -1e+30  ;;  %v1247_v38 = vsel %vm2863_vm1, %v1235_v36, -1e+30 }
 0x587   :  { %1269 = vmax.xlane.f32.xlu2 %v1263_v37  ;;  %1253 = vmax.xlane.f32.xlu0 %v1247_v38 }
 0x58d   :  { %v1238_v39 = vpop.f32.mrf.mxu1 }
 0x58e   :  { %v1264_v40 = vsel %vm2859_vm0, %v1238_v39, -1e+30  ;;  %v1248_v17 = vsel %vm2863_vm1, %v1238_v39, -1e+30 }
 0x58f   :  { %1271 = vmax.xlane.f32.xlu0 %v1264_v40  ;;  %1255 = vmax.xlane.f32.xlu1 %v1248_v17 }
 0x5ea   :  { %v1266_v55 = vpop.xlane.xlu0 %1265  ;;  %v1250_v56 = vpop.xlane.xlu1 %1249 }
 0x5eb   :  { %v1279_v44 = vmul.f32 %v2456_v53, %v1266_v55  ;;  %v1274_v8 = vmul.f32 %v2457_v54, %v1250_v56 }
 0x5ed   :  { %v1283_v57 = vadd.f32 %v1279_v44, %v1274_v8  ;;  %v147_v44 = vld [vmem:[#allocation2 + $0x300] sm:$0xff] }
 0x5ee   :  { %1437 = vmatpush.msra.mxu0 %v147_v44 }
 0x5ef   :  { %v1289_v58 = vsub.f32 %v1229_v28, %v1283_v57 }
 0x5f1   :  { %v1293_v59 = vmul.f32 1.442695, %v1289_v58 }
 0x5f2   :  { %v1268_v61 = vpop.xlane.xlu1 %1267  ;;  %v1252_v62 = vpop.xlane.xlu2 %1251 }
 0x5f3   :  { %2488 = vpow2.f32 %v1293_v59  ;;  %v1280_v1 = vmul.f32 %v2456_v53, %v1268_v61  ;;  %v1275_v2 = vmul.f32 %v2457_v54, %v1252_v62  ;;  %v146_v59 = vld [vmem:[#allocation2 + $0x2f8] sm:$0xff] }
 0x5f4   :  { %1438 = vmatpush.msra.mxu0 %v146_v59  ;;  %v1470_v59 = vld [vmem:[#allocation2 + $0xb10] sm:$0xff] }
 0x5f5   :  { %v1284_v3 = vadd.f32 %v1280_v1, %v1275_v2  ;;  %v145_v1 = vld [vmem:[#allocation2 + $0x2f0] sm:$0xff] }
 0x5f6   :  { %1439 = vmatpush.msra.mxu0 %v145_v1 }
 0x5f7   :  { %v1290_v5 = vsub.f32 %v1232_v30, %v1284_v3 }
 0x5f9   :  { %v2888_v6 = vpop.eup %2488  ;;  %v1295_v11 = vmul.f32 1.442695, %v1290_v5  ;;  %v144_v5 = vld [vmem:[#allocation2 + $0x2e8] sm:$0xff] }
 0x5fa   :  { %2371 = vmatmul.msk.f32.vlgmr.msrb.gmra.mxu2 %vm2884_vm2, %v2888_v6  ;;  %v1270_v9 = vpop.xlane.xlu2 %1269  ;;  %v1254_v12 = vpop.xlane.xlu0 %1253  ;;  %v1304_v13 = vsel %vm2884_vm2, %v2888_v6, 0.0  ;;  %1440 = vmatpush.msra.mxu0 %v144_v5  ;;  %v1464_v5 = vld [vmem:[#allocation2 + $0xae0] sm:$0xff] }
 0x5fb   :  { %2490 = vpow2.f32 %v1295_v11  ;;  %v1281_v14 = vmul.f32 %v2456_v53, %v1270_v9  ;;  %v1276_v15 = vmul.f32 %v2457_v54, %v1254_v12 }
 0x5fd   :  { %v1285_v18 = vadd.f32 %v1281_v14, %v1276_v15  ;;  %v143_v14 = vld [vmem:[#allocation2 + $0x2e0] sm:$0xff] }
 0x5fe   :  { %1441 = vmatpush.msra.mxu0 %v143_v14  ;;  %v1525_v14 = vld [vmem:[#allocation2 + $0xbe0] sm:$0xff] }
 0x5ff   :  { %v1291_v24 = vsub.f32 %v1235_v36, %v1285_v18 }
 0x601   :  { %v2896_v19 = vpop.eup %2490  ;;  %v1297_v26 = vmul.f32 1.442695, %v1291_v24 }
 0x602   :  { %2372 = vmatmul.msk.f32.gmra.mxu2 %vm2884_vm2, %v2896_v19  ;;  %v1272_v20 = vpop.xlane.xlu0 %1271  ;;  %v1256_v63 = vpop.xlane.xlu1 %1255  ;;  %v1305_v23 = vsel %vm2884_vm2, %v2896_v19, 0.0 }
 0x603   :  { %2492 = vpow2.f32 %v1297_v26  ;;  %v1282_v25 = vmul.f32 %v2456_v53, %v1272_v20  ;;  %v1277_v28 = vmul.f32 %v2457_v54, %v1256_v63  ;;  %v142_v26 = vld [vmem:[#allocation2 + $0x2d8] sm:$0xff] }
 0x604   :  { %1442 = vmatpush.msra.mxu0 %v142_v26  ;;  %v1523_v26 = vld [vmem:[#allocation2 + $0xbd0] sm:$0xff] }
 0x605   :  { %v1286_v27 = vadd.f32 %v1282_v25, %v1277_v28  ;;  %v141_v28 = vld [vmem:[#allocation2 + $0x2d0] sm:$0xff] }
 0x606   :  { %1443 = vmatpush.msra.mxu0 %v141_v28  ;;  %v1521_v28 = vld [vmem:[#allocation2 + $0xbc0] sm:$0xff] }
 0x607   :  { %v1292_v21 = vsub.f32 %v1238_v39, %v1286_v27 }
 0x609   :  { %v2904_v29 = vpop.eup %2492  ;;  %v1299_v31 = vmul.f32 1.442695, %v1292_v21  ;;  %v140_v21 = vld [vmem:[#allocation2 + $0x2c8] sm:$0xff] }
 0x60a   :  { %2373 = vmatmul.msk.f32.gmra.mxu2 %vm2884_vm2, %v2904_v29  ;;  %v1306_v33 = vsel %vm2884_vm2, %v2904_v29, 0.0  ;;  %1444 = vmatpush.msra.mxu0 %v140_v21  ;;  %v1520_v21 = vld [vmem:[#allocation2 + $0xbb8] sm:$0xff] }
 0x60b   :  { %2494 = vpow2.f32 %v1299_v31 }
 0x611   :  { %v2912_v34 = vpop.eup %2494 }
 0x612   :  { %2374 = vmatmul.msk.f32.gmra.mxu2 %vm2884_vm2, %v2912_v34  ;;  %v1307_v30 = vsel %vm2884_vm2, %v2912_v34, 0.0  ;;  %v1472_v34 = vld [vmem:[#allocation2 + $0xb20] sm:$0xff] }
 0x67d   :  { %v1325_v7 = vpop.f32.mrf.mxu2 }
 0x67e   :  { %v1337_v35 = vmax.f32 %v1325_v7, 1e-30 }
 0x680   :  { %2496 = vrcp.f32 %v1337_v35  ;;  %v1352_v17 = vand.u32 2147483648, %v1337_v35  ;;  %v1350_v43 = vand.u32 2147483647, %v1337_v35  ;;  %vm1346_vm4 = vweird.f32 %v1337_v35 }
 0x682   :  { %v1353_v54 = vor.u32 1.1754944e-38, %v1352_v17  ;;  %vm1351_vm6 = vcmp.eq.f32.partialorder %v1350_v43, 8.507059e+37  ;;  %v137_v43 = vld [vmem:[#allocation2 + $0x2b0] sm:$0xff] }
 0x685   :  { %v1328_v36 = vpop.f32.mrf.mxu2 }
 0x686   :  { %v2497_v37 = vpop.eup %2496  ;;  %v1338_v38 = vmax.f32 %v1328_v36, 1e-30 }
 0x687   :  { %v1342_v39 = vmul.f32 %v2497_v37, %v1337_v35  ;;  %vm1347_vm3 = vweird.f32 %v2497_v37 }
 0x688   :  { %2498 = vrcp.f32 %v1338_v38  ;;  %vm1348_vm5 = vmor %vm1346_vm4, %vm1347_vm3  ;;  %v1367_v61 = vand.u32 2147483648, %v1338_v38  ;;  %v1365_v0 = vand.u32 2147483647, %v1338_v38  ;;  %vm1361_vm9 = vweird.f32 %v1338_v38 }
 0x689   :  { %v1343_v40 = vsub.f32 1.0, %v1342_v39  ;;  %v138_v39 = vld [vmem:[#allocation2 + $0x2b8] sm:$0xff] }
 0x68a   :  { %v1368_v9 = vor.u32 1.1754944e-38, %v1367_v61  ;;  %vm1366_vm12 = vcmp.eq.f32.partialorder %v1365_v0, 8.507059e+37  ;;  %v1469_v61 = vld [vmem:[#allocation2 + $0xb08] sm:$0xff] }
 0x68b   :  { %v1344_v41 = vmul.f32 %v2497_v37, %v1343_v40 }
 0x68d   :  { %v1331_v48 = vpop.f32.mrf.mxu2  ;;  %v1345_v49 = vadd.f32 %v2497_v37, %v1344_v41 }
 0x68e   :  { %v2499_v51 = vpop.eup %2498  ;;  %v1339_v53 = vmax.f32 %v1331_v48, 1e-30 }
 0x68f   :  { %v1357_v55 = vmul.f32 %v2499_v51, %v1338_v38  ;;  %v1349_v56 = vsel %vm1348_vm5, %v2497_v37, %v1345_v49  ;;  %vm1362_vm7 = vweird.f32 %v2499_v51 }
 0x690   :  { %2500 = vrcp.f32 %v1339_v53  ;;  %v1354_v8 = vsel %vm1351_vm6, %v1353_v54, %v1349_v56  ;;  %vm1363_vm10 = vmor %vm1361_vm9, %vm1362_vm7  ;;  %v1382_v20 = vand.u32 2147483648, %v1339_v53  ;;  %v1380_v25 = vand.u32 2147483647, %v1339_v53  ;;  %v1476_v54 = vld [vmem:[#allocation2 + $0xb40] sm:$0xff] }
 0x691   :  { %v1355_v57 = vmul.f32 %v1354_v8, %v1304_v13  ;;  %v1358_v58 = vsub.f32 1.0, %v1357_v55  ;;  %vm1376_vm14 = vweird.f32 %v1339_v53  ;;  %v1475_v55 = vld [vmem:[#allocation2 + $0xb38] sm:$0xff]  ;;  %v1474_v8 = vld [vmem:[#allocation2 + $0xb30] sm:$0xff] }
 0x692   :  { %v1383_v7 = vor.u32 1.1754944e-38, %v1382_v20  ;;  %vm1381_vm0 = vcmp.eq.f32.partialorder %v1380_v25, 8.507059e+37  ;;  %v1568_v20 = vld [vmem:[#allocation2 + $0xc50] sm:$0xff]  ;;  %v1567_v25 = vld [vmem:[#allocation2 + $0xc48] sm:$0xff] }
 0x693   :  { %1417 = vmatmul.f32.vlgmr.msrb.gmra.mxu3 %v1355_v57  ;;  %v1359_v62 = vmul.f32 %v2499_v51, %v1358_v58 }
 0x695   :  { %v1334_v2 = vpop.f32.mrf.mxu2  ;;  %v1360_v3 = vadd.f32 %v2499_v51, %v1359_v62  ;;  %v1468_v62 = vld [vmem:[#allocation2 + $0xb00] sm:$0xff] }
 0x696   :  { %v2501_v6 = vpop.eup %2500  ;;  %v1340_v11 = vmax.f32 %v1334_v2, 1e-30  ;;  %v1466_v2 = vld [vmem:[#allocation2 + $0xaf0] sm:$0xff] }
 0x697   :  { %v1372_v12 = vmul.f32 %v2501_v6, %v1339_v53  ;;  %v1364_v13 = vsel %vm1363_vm10, %v2499_v51, %v1360_v3  ;;  %vm1377_vm13 = vweird.f32 %v2501_v6  ;;  %v1478_v51 = vld [vmem:[#allocation2 + $0xb50] sm:$0xff]  ;;  %v1477_v53 = vld [vmem:[#allocation2 + $0xb48] sm:$0xff] }
 0x698   :  { %2502 = vrcp.f32 %v1340_v11  ;;  %v1369_v15 = vsel %vm1366_vm12, %v1368_v9, %v1364_v13  ;;  %vm1378_vm15 = vmor %vm1376_vm14, %vm1377_vm13  ;;  %v1397_v40 = vand.u32 2147483648, %v1340_v11  ;;  %v1395_v41 = vand.u32 2147483647, %v1340_v11  ;;  %1483 = vmatpush.msra.mxu1 %v1478_v51  ;;  %v1465_v3 = vld [vmem:[#allocation2 + $0xae8] sm:$0xff]  ;;  %v1527_v9 = vld [vmem:[#allocation2 + $0xbf0] sm:$0xff] }
 0x699   :  { %v1370_v18 = vmul.f32 %v1369_v15, %v1305_v23  ;;  %v1373_v24 = vsub.f32 1.0, %v1372_v12  ;;  %v139_v23 = vld [vmem:[#allocation2 + $0x2c0] sm:$0xff]  ;;  %vm1391_vm3 = vweird.f32 %v1340_v11  ;;  %v1572_v12 = vld [vmem:[#allocation2 + $0xc70] sm:$0xff]  ;;  %v1526_v13 = vld [vmem:[#allocation2 + $0xbe8] sm:$0xff]  ;;  %1528 = vmatpush.msra.mxu2 %v1527_v9 }
 0x69a   :  { %1445 = vmatpush.msra.mxu0 %v139_v23  ;;  %v1398_v46 = vor.u32 1.1754944e-38, %v1397_v40  ;;  %vm1396_vm5 = vcmp.eq.f32.partialorder %v1395_v41, 8.507059e+37  ;;  %1484 = vmatpush.msra.mxu1 %v1477_v53  ;;  %v1570_v15 = vld [vmem:[#allocation2 + $0xc60] sm:$0xff]  ;;  %v1518_v23 = vld [vmem:[#allocation2 + $0xba8] sm:$0xff]  ;;  %v1561_v40 = vld [vmem:[#allocation2 + $0xc18] sm:$0xff] }
 0x69b   :  { %1420 = vmatmul.f32.gmra.mxu3 %v1370_v18  ;;  %v1374_v63 = vmul.f32 %v2501_v6, %v1373_v24  ;;  %1529 = vmatpush.msra.mxu2 %v1526_v13  ;;  %v1524_v18 = vld [vmem:[#allocation2 + $0xbd8] sm:$0xff]  ;;  %v1560_v41 = vld [vmem:[#allocation2 + $0xc10] sm:$0xff] }
 0x69c   :  { %1446 = vmatpush.msra.mxu0 %v138_v39  ;;  %1485 = vmatpush.msra.mxu1 %v1476_v54  ;;  %v1569_v24 = vld [vmem:[#allocation2 + $0xc58] sm:$0xff] }
 0x69d   :  { %v1375_v27 = vadd.f32 %v2501_v6, %v1374_v63  ;;  %1573 = vmatpush.msra.mxu3 %v1572_v12  ;;  %1530 = vmatpush.msra.mxu2 %v1525_v14  ;;  %v1522_v63 = vld [vmem:[#allocation2 + $0xbc8] sm:$0xff]  ;;  %v1516_v39 = vld [vmem:[#allocation2 + $0xb98] sm:$0xff] }
 0x69e   :  { %v2503_v31 = vpop.eup %2502  ;;  %1447 = vmatpush.msra.mxu0 %v137_v43  ;;  %1486 = vmatpush.msra.mxu1 %v1475_v55  ;;  %v1479_v51 = vld [vmem:[#allocation2 + $0xb58] sm:$0xff]  ;;  %v1480_v55 = vld [vmem:[#allocation2 + $0xb60] sm:$0xff] }
 0x69f   :  { %v1387_v35 = vmul.f32 %v2503_v31, %v1340_v11  ;;  %v1379_v19 = vsel %vm1378_vm15, %v2501_v6, %v1375_v27  ;;  %vm1392_vm1 = vweird.f32 %v2503_v31  ;;  %v1463_v11 = vld [vmem:[#allocation2 + $0xad8] sm:$0xff]  ;;  %1531 = vmatpush.msra.mxu2 %v1524_v18  ;;  %v1566_v27 = vld [vmem:[#allocation2 + $0xc40] sm:$0xff] }
 0x6a0   :  { %v1384_v36 = vsel %vm1381_vm0, %v1383_v7, %v1379_v19  ;;  %vm1393_vm4 = vmor %vm1391_vm3, %vm1392_vm1  ;;  %1487 = vmatpush.msra.mxu1 %v1474_v8  ;;  %v1519_v7 = vld [vmem:[#allocation2 + $0xbb0] sm:$0xff]  ;;  %v1481_v8 = vld [vmem:[#allocation2 + $0xb68] sm:$0xff] }
 0x6a1   :  { %v1385_v37 = vmul.f32 %v1384_v36, %v1306_v33  ;;  %v1388_v38 = vsub.f32 1.0, %v1387_v35  ;;  %v136_v33 = vld [vmem:[#allocation2 + $0x2a8] sm:$0xff]  ;;  %1532 = vmatpush.msra.mxu2 %v1523_v26  ;;  %v1564_v35 = vld [vmem:[#allocation2 + $0xc30] sm:$0xff] }
 0x6a2   :  { %1448 = vmatpush.msra.mxu0 %v136_v33  ;;  %1488 = vmatpush.msra.mxu1 %v1473_v4  ;;  %v1563_v36 = vld [vmem:[#allocation2 + $0xc28] sm:$0xff]  ;;  %v1512_v33 = vld [vmem:[#allocation2 + $0xb78] sm:$0xff]  ;;  %v2980_v26 = vld [vmem:[#allocation2 + $0x3d0] sm:$0xff] }
 0x6a3   :  { %1423 = vmatmul.f32.gmra.mxu3 %v1385_v37  ;;  %v1389_v17 = vmul.f32 %v2503_v31, %v1388_v38  ;;  %1533 = vmatpush.msra.mxu2 %v1522_v63  ;;  %v1517_v37 = vld [vmem:[#allocation2 + $0xba0] sm:$0xff]  ;;  %vm1659_vm2 = vcmp.gt.f32.partialorder %v2980_v26, 0.0 }
 0x6a4   :  { %1449 = vmatpush.msra.mxu0 %v135_v50  ;;  %1489 = vmatpush.msra.mxu1 %v1472_v34  ;;  %v1562_v38 = vld [vmem:[#allocation2 + $0xc20] sm:$0xff]  ;;  %v1557_v50 = vld [vmem:[#allocation2 + $0xbf8] sm:$0xff] }
 0x6a5   :  { %v1390_v45 = vadd.f32 %v2503_v31, %v1389_v17  ;;  %1534 = vmatpush.msra.mxu2 %v1521_v28  ;;  %v1515_v17 = vld [vmem:[#allocation2 + $0xb90] sm:$0xff] }
 0x6a7   :  { %v1394_v48 = vsel %vm1393_vm4, %v2503_v31, %v1390_v45  ;;  %v1565_v31 = vld [vmem:[#allocation2 + $0xc38] sm:$0xff]  ;;  %1535 = vmatpush.msra.mxu2 %v1520_v21  ;;  %v1514_v45 = vld [vmem:[#allocation2 + $0xb88] sm:$0xff] }
 0x6a8   :  { %v1399_v49 = vsel %vm1396_vm5, %v1398_v46, %v1394_v48  ;;  %v1559_v46 = vld [vmem:[#allocation2 + $0xc08] sm:$0xff] }
 0x6a9   :  { %v1400_v29 = vmul.f32 %v1399_v49, %v1307_v30  ;;  %v1471_v30 = vld [vmem:[#allocation2 + $0xb18] sm:$0xff]  ;;  %1536 = vmatpush.msra.mxu2 %v1519_v7  ;;  %v1513_v49 = vld [vmem:[#allocation2 + $0xb80] sm:$0xff] }
 0x6aa   :  { %1490 = vmatpush.msra.mxu1 %v1471_v30  ;;  %v1482_v30 = vld [vmem:[#allocation2 + $0xb70] sm:$0xff] }
 0x6ab   :  { %1426 = vmatmul.f32.gmra.mxu3 %v1400_v29  ;;  %1537 = vmatpush.msra.mxu2 %v1518_v23  ;;  %v1558_v29 = vld [vmem:[#allocation2 + $0xc00] sm:$0xff] }
 0x6ac   :  { %1491 = vmatpush.msra.mxu1 %v1470_v59 }
 0x6ad   :  { %1538 = vmatpush.msra.mxu2 %v1517_v37 }
 0x6ae   :  { %1492 = vmatpush.msra.mxu1 %v1469_v61 }
 0x6af   :  { %1539 = vmatpush.msra.mxu2 %v1516_v39  ;;  %v3001_v39 = vld [vmem:[#allocation2 + $0x3e8] sm:$0xff] }
 0x6b0   :  { %1493 = vmatpush.msra.mxu1 %v1468_v62  ;;  %vm1662_vm9 = vcmp.gt.f32.partialorder %v3001_v39, 0.0 }
 0x6b1   :  { %1540 = vmatpush.msra.mxu2 %v1515_v17 }
 0x6b3   :  { %1541 = vmatpush.msra.mxu2 %v1514_v45 }
 0x6b5   :  { %1542 = vmatpush.msra.mxu2 %v1513_v49 }
 0x6b7   :  { %1543 = vmatpush.msra.mxu2 %v1512_v33 }
 0x716   :  { %v1418_v56 = vpop.f32.mrf.mxu3 }
 0x717   :  { %v1430_v44 = vmul.f32 %v1418_v56, %v2783_v60  ;;  %v1467_v60 = vld [vmem:[#allocation2 + $0xaf8] sm:$0xff] }
 0x718   :  { %1494 = vmatpush.msra.mxu1 %v1467_v60 }
 0x719   :  { %1450 = vmatmul.f32.vlgmr.msra.gmra.mxu0 %v1430_v44 }
 0x71a   :  { %1495 = vmatpush.msra.mxu1 %v1466_v2 }
 0x71c   :  { %1496 = vmatpush.msra.mxu1 %v1465_v3 }
 0x71e   :  { %v1421_v57 = vpop.f32.mrf.mxu3  ;;  %1497 = vmatpush.msra.mxu1 %v1464_v5 }
 0x71f   :  { %v1431_v58 = vmul.f32 %v1421_v57, %v2822_v47 }
 0x720   :  { %1498 = vmatpush.msra.mxu1 %v1463_v11 }
 0x721   :  { %1453 = vmatmul.f32.gmra.mxu0 %v1431_v58 }
 0x726   :  { %v1424_v0 = vpop.f32.mrf.mxu3 }
 0x727   :  { %v1432_v1 = vmul.f32 %v1424_v0, %v2841_v10  ;;  %v1571_v10 = vld [vmem:[#allocation2 + $0xc68] sm:$0xff] }
 0x728   :  { %1574 = vmatpush.msra.mxu3 %v1571_v10 }
 0x729   :  { %1456 = vmatmul.f32.gmra.mxu0 %v1432_v1 }
 0x72a   :  { %1575 = vmatpush.msra.mxu3 %v1570_v15 }
 0x72c   :  { %1576 = vmatpush.msra.mxu3 %v1569_v24 }
 0x72e   :  { %v1427_v47 = vpop.f32.mrf.mxu3  ;;  %1577 = vmatpush.msra.mxu3 %v1568_v20 }
 0x72f   :  { %v1433_v6 = vmul.f32 %v1427_v47, %v2850_v16 }
 0x730   :  { %1578 = vmatpush.msra.mxu3 %v1567_v25  ;;  %v2986_v25 = vld [vmem:[#allocation2 + $0x3d8] sm:$0xff] }
 0x731   :  { %1459 = vmatmul.f32.gmra.mxu0 %v1433_v6  ;;  %vm1660_vm6 = vcmp.gt.f32.partialorder %v2986_v25, 0.0 }
 0x732   :  { %1579 = vmatpush.msra.mxu3 %v1566_v27 }
 0x734   :  { %1580 = vmatpush.msra.mxu3 %v1565_v31  ;;  %v2992_v31 = vld [vmem:[#allocation2 + $0x3e0] sm:$0xff] }
 0x735   :  { %vm1661_vm7 = vcmp.gt.f32.partialorder %v2992_v31, 0.0 }
 0x736   :  { %1581 = vmatpush.msra.mxu3 %v1564_v35 }
 0x738   :  { %1582 = vmatpush.msra.mxu3 %v1563_v36 }
 0x73a   :  { %1583 = vmatpush.msra.mxu3 %v1562_v38 }
 0x73c   :  { %1584 = vmatpush.msra.mxu3 %v1561_v40 }
 0x73e   :  { %1585 = vmatpush.msra.mxu3 %v1560_v41 }
 0x740   :  { %1586 = vmatpush.msra.mxu3 %v1559_v46 }
 0x742   :  { %1587 = vmatpush.msra.mxu3 %v1558_v29 }
 0x744   :  { %1588 = vmatpush.msra.mxu3 %v1557_v50 }
 0x796   :  { %v1451_v16 = vpop.f32.mrf.mxu0 }
 0x797   :  { %1499 = vmatmul.f32.vlgmr.msra.gmra.mxu1 %v1451_v16 }
 0x79e   :  { %v1454_v19 = vpop.f32.mrf.mxu0 }
 0x79f   :  { %1502 = vmatmul.f32.gmra.mxu1 %v1454_v19 }
 0x7a6   :  { %v1457_v43 = vpop.f32.mrf.mxu0 }
 0x7a7   :  { %1505 = vmatmul.f32.gmra.mxu1 %v1457_v43 }
 0x7ae   :  { %v1460_v48 = vpop.f32.mrf.mxu0 }
 0x7af   :  { %1508 = vmatmul.f32.gmra.mxu1 %v1460_v48 }
 0x814   :  { %v1500_v53 = vpop.f32.mrf.mxu1 }
 0x815   :  { %v1501_v54 = vadd.f32 %v1500_v53, %v1479_v51 }
 0x817   :  { %1544 = vmatmul.f32.vlgmr.msra.gmra.mxu2 %v1501_v54  ;;  %1589 = vmatmul.f32.vlgmr.msra.gmra.mxu3 %v1501_v54 }
 0x81c   :  { %v1503_v56 = vpop.f32.mrf.mxu1 }
 0x81d   :  { %v1504_v44 = vadd.f32 %v1503_v56, %v1480_v55 }
 0x81f   :  { %1547 = vmatmul.f32.gmra.mxu2 %v1504_v44  ;;  %1592 = vmatmul.f32.gmra.mxu3 %v1504_v44 }
 0x824   :  { %v1506_v4 = vpop.f32.mrf.mxu1 }
 0x825   :  { %v1507_v34 = vadd.f32 %v1506_v4, %v1481_v8 }
 0x827   :  { %1550 = vmatmul.f32.gmra.mxu2 %v1507_v34  ;;  %1595 = vmatmul.f32.gmra.mxu3 %v1507_v34 }
 0x82c   :  { %v1509_v57 = vpop.f32.mrf.mxu1 }
 0x82d   :  { %v1510_v58 = vadd.f32 %v1509_v57, %v1482_v30 }
 0x82f   :  { %1553 = vmatmul.f32.gmra.mxu2 %v1510_v58  ;;  %1598 = vmatmul.f32.gmra.mxu3 %v1510_v58 }
 0x89a   :  { %v1545_v59 = vpop.f32.mrf.mxu2  ;;  %v2949_v2 = vpop.f32.mrf.mxu3 }
 0x8a2   :  { %v1548_v61 = vpop.f32.mrf.mxu2  ;;  %v2953_v11 = vpop.f32.mrf.mxu3 }
 0x8a3   :  { %1818 = vrot.lane.b32.xlu0 %v1548_v61, %s2614_s21  ;;  %v2450_v51 = vpack.i.bf16 %v2949_v2, %v2953_v11 }
 0x8aa   :  { %v1551_v62 = vpop.f32.mrf.mxu2  ;;  %v2959_v10 = vpop.f32.mrf.mxu3 }
 0x8ab   :  { %1808 = vrot.lane.b32.xlu0 %v1545_v59, %s2612_s0  ;;  %1820 = vrot.lane.b32.xlu1 %v1551_v62, %s2614_s21 }
 0x8b2   :  { %v1554_v60 = vpop.f32.mrf.mxu2  ;;  %v2967_v24 = vpop.f32.mrf.mxu3 }
 0x8b3   :  { %1810 = vrot.lane.b32.xlu1 %v1548_v61, %s2612_s0  ;;  %1814 = vrot.lane.b32.xlu0 %v1554_v60, %s2612_s0 }
 0x8b4   :  { %1822 = vrot.lane.b32.xlu2 %v1554_v60, %s2614_s21 }
 0x8bb   :  { %1612 = vrot.lane.b32.xlu1 %v1554_v60, %s2613_s1  ;;  %1608 = vrot.lane.b32.xlu0 %v1548_v61, %s2613_s1 }
 0x8bc   :  { %1816 = vrot.lane.b32.xlu2 %v1545_v59, %s2614_s21 }
 0x8c3   :  { %1606 = vrot.lane.b32.xlu1 %v1545_v59, %s2613_s1 }
 0x8c4   :  { %1812 = vrot.lane.b32.xlu2 %v1551_v62, %s2612_s0 }
 0x8cc   :  { %1610 = vrot.lane.b32.xlu2 %v1551_v62, %s2613_s1 }
 0x90e   :  { %v1823_v0 = vpop.permute.xlu2 %1822 }
 0x90f   :  { %2387 = vmatpush.xpose.msk.msrb.mxu2 %vm660_vm8, %v1823_v0 }
 0x915   :  { %v1819_v1 = vpop.permute.xlu0 %1818 }
 0x916   :  { %v1817_v3 = vpop.permute.xlu2 %1816 }
 0x91d   :  { %v1821_v5 = vpop.permute.xlu1 %1820  ;;  %v1809_v47 = vpop.permute.xlu0 %1808 }
 0x91e   :  { %2388 = vmatpush.xpose.msk.msrb.mxu2 %vm660_vm8, %v1821_v5  ;;  %v1813_v9 = vpop.permute.xlu2 %1812 }
 0x922   :  { %2389 = vmatpush.xpose.msk.msrb.mxu2 %vm660_vm8, %v1819_v1 }
 0x925   :  { %v1811_v6 = vpop.permute.xlu1 %1810  ;;  %v1815_v12 = vpop.permute.xlu0 %1814 }
 0x926   :  { %2390 = vmatpush.xpose.msk.msrb.mxu2 %vm660_vm8, %v1817_v3  ;;  %v1611_v14 = vpop.permute.xlu2 %1610 }
 0x929   :  { %2391 = vmatmul.msk.f32.vlgmr.msrb.gmra.mxu2 %vm660_vm8, %v1809_v47 }
 0x92d   :  { %v1613_v13 = vpop.permute.xlu1 %1612  ;;  %v1609_v15 = vpop.permute.xlu0 %1608 }
 0x92e   :  { %2375 = vmatpush.xpose.msk.msrb.mxu0 %vm660_vm8, %v1613_v13  ;;  %2403 = vmatpush.xpose.msk.msrb.mxu1 %vm660_vm8, %v1613_v13 }
 0x931   :  { %2392 = vmatmul.msk.f32.gmra.mxu2 %vm660_vm8, %v1811_v6 }
 0x932   :  { %2376 = vmatpush.xpose.msk.msrb.mxu0 %vm660_vm8, %v1611_v14  ;;  %2404 = vmatpush.xpose.msk.msrb.mxu1 %vm660_vm8, %v1611_v14 }
 0x935   :  { %v1607_v18 = vpop.permute.xlu1 %1606 }
 0x936   :  { %2377 = vmatpush.xpose.msk.msrb.mxu0 %vm660_vm8, %v1609_v15  ;;  %2405 = vmatpush.xpose.msk.msrb.mxu1 %vm660_vm8, %v1609_v15 }
 0x939   :  { %2393 = vmatmul.msk.f32.gmra.mxu2 %vm660_vm8, %v1813_v9 }
 0x93a   :  { %2378 = vmatpush.xpose.msk.msrb.mxu0 %vm660_vm8, %v1607_v18  ;;  %2406 = vmatpush.xpose.msk.msrb.mxu1 %vm660_vm8, %v1607_v18 }
 0x93d   :  { %2379 = vmatmul.msk.f32.vlgmr.msrb.gmra.mxu0 %vm660_vm8, %v1545_v59  ;;  %2381 = vmatmul.msk.f32.vlgmr.msrb.gmra.mxu1 %vm660_vm8, %v1551_v62 }
 0x93e   :  { %1791 = vmatpush.msra.mxu1 %v2967_v24 }
 0x940   :  { %1792 = vmatpush.msra.mxu1 %v2959_v10 }
 0x941   :  { %2394 = vmatmul.msk.f32.gmra.mxu2 %vm660_vm8, %v1815_v12 }
 0x942   :  { %1793 = vmatpush.msra.mxu1 %v2953_v11 }
 0x944   :  { %1794 = vmatpush.msra.mxu1 %v2949_v2 }
 0x945   :  { %2380 = vmatmul.msk.f32.gmra.mxu0 %vm660_vm8, %v1548_v61  ;;  %2382 = vmatmul.msk.f32.gmra.mxu1 %vm660_vm8, %v1554_v60 }
 0x9ac   :  { %v1857_v20 = vpop.f32.mrf.mxu2 }
 0x9ad   :  { %v1869_v16 = vsel %vm1659_vm2, %v1857_v20, -1e+30  ;;  %v2445_v20 = vpack.i.bf16 %v2959_v10, %v2967_v24 }
 0x9ae   :  { %v1873_v63 = vsel %vm660_vm8, %v1869_v16, -inf }
 0x9af   :  { %1874 = vmax.xlane.f32.xlu2 %v1873_v63 }
 0x9b4   :  { %v1860_v28 = vpop.f32.mrf.mxu2 }
 0x9b5   :  { %v1870_v27 = vsel %vm1660_vm6, %v1860_v28, -1e+30 }
 0x9b6   :  { %v1876_v21 = vsel %vm660_vm8, %v1870_v27, -inf }
 0x9b7   :  { %1877 = vmax.xlane.f32.xlu0 %v1876_v21 }
 0x9ba   :  { %v1647_v7 = vpop.f32.mrf.mxu0  ;;  %v1653_v36 = vpop.f32.mrf.mxu1 }
 0x9bb   :  { %v1663_v35 = vsel %vm1659_vm2, %v1647_v7, -1e+30  ;;  %v1665_v17 = vsel %vm1661_vm7, %v1653_v36, -1e+30 }
 0x9bc   :  { %v1863_v19 = vpop.f32.mrf.mxu2  ;;  %v1667_v38 = vsel %vm660_vm8, %v1663_v35, -inf  ;;  %v1673_v48 = vsel %vm660_vm8, %v1665_v17, -inf }
 0x9bd   :  { %v1871_v23 = vsel %vm1661_vm7, %v1863_v19, -1e+30 }
 0x9be   :  { %v1879_v37 = vsel %vm660_vm8, %v1871_v23, -inf }
 0x9bf   :  { %1880 = vmax.xlane.f32.xlu1 %v1879_v37  ;;  %1668 = vmax.xlane.f32.xlu0 %v1667_v38 }
 0x9c2   :  { %v1650_v40 = vpop.f32.mrf.mxu0  ;;  %v1656_v29 = vpop.f32.mrf.mxu1 }
 0x9c3   :  { %v3007_v41 = vsel %vm1660_vm6, %v1650_v40, -1e+30  ;;  %v1666_v33 = vsel %vm1662_vm9, %v1656_v29, -1e+30 }
 0x9c4   :  { %v1866_v43 = vpop.f32.mrf.mxu2  ;;  %v1670_v49 = vsel %vm660_vm8, %v3007_v41, -inf  ;;  %v1676_v50 = vsel %vm660_vm8, %v1666_v33, -inf }
 0x9c5   :  { %v1872_v45 = vsel %vm1662_vm9, %v1866_v43, -1e+30 }
 0x9c6   :  { %v1882_v46 = vsel %vm660_vm8, %v1872_v45, -inf }
 0x9c7   :  { %1883 = vmax.xlane.f32.xlu2 %v1882_v46  ;;  %1674 = vmax.xlane.f32.xlu0 %v1673_v48 }
 0x9c8   :  { %1671 = vmax.xlane.f32.xlu1 %v1670_v49 }
 0x9cf   :  { %1677 = vmax.xlane.f32.xlu0 %v1676_v50 }
 0x9e3   :  { %2451 = vrot.lane.b32.xlu0 %v2450_v51, %s2612_s0 }
 0xa22   :  { %v1875_v53 = vpop.xlane.xlu2 %1874 }
 0xa23   :  { %v1885_v54 = vsub.f32 %v1869_v16, %v1875_v53 }
 0xa25   :  { %v1889_v55 = vmul.f32 1.442695, %v1885_v54 }
 0xa27   :  { %2504 = vpow2.f32 %v1889_v55 }
 0xa2a   :  { %v1878_v56 = vpop.xlane.xlu0 %1877 }
 0xa2b   :  { %v1886_v44 = vsub.f32 %v1870_v27, %v1878_v56 }
 0xa2d   :  { %v2505_v8 = vpop.eup %2504  ;;  %v1891_v4 = vmul.f32 1.442695, %v1886_v44 }
 0xa2e   :  { %v3024_v34 = vsel %vm1659_vm2, %v2505_v8, 0.0 }
 0xa2f   :  { %2506 = vpow2.f32 %v1891_v4  ;;  %v1901_v30 = vsel %vm660_vm8, %v3024_v34, 0.0 }
 0xa30   :  { %1902 = vadd.xlane.f32.xlu2 %v1901_v30 }
 0xa32   :  { %v1881_v57 = vpop.xlane.xlu1 %1880  ;;  %v1669_v58 = vpop.xlane.xlu0 %1668 }
 0xa33   :  { %v1887_v59 = vsub.f32 %v1871_v23, %v1881_v57  ;;  %v1679_v47 = vsub.f32 %v1663_v35, %v1669_v58 }
 0xa35   :  { %v2507_v61 = vpop.eup %2506  ;;  %v1893_v62 = vmul.f32 1.442695, %v1887_v59  ;;  %v1683_v12 = vmul.f32 1.442695, %v1679_v47 }
 0xa36   :  { %v3030_v60 = vsel %vm1660_vm6, %v2507_v61, 0.0 }
 0xa37   :  { %2508 = vpow2.f32 %v1893_v62  ;;  %v1904_v0 = vsel %vm660_vm8, %v3030_v60, 0.0 }
 0xa38   :  { %1905 = vadd.xlane.f32.xlu1 %v1904_v0 }
 0xa3a   :  { %v1675_v1 = vpop.xlane.xlu0 %1674  ;;  %v1884_v2 = vpop.xlane.xlu2 %1883 }
 0xa3b   :  { %v1888_v3 = vsub.f32 %v1872_v45, %v1884_v2  ;;  %v1681_v15 = vsub.f32 %v1665_v17, %v1675_v1  ;;  %v1672_v37 = vpop.xlane.xlu1 %1671 }
 0xa3c   :  { %v1680_v26 = vsub.f32 %v3007_v41, %v1672_v37 }
 0xa3d   :  { %v2509_v5 = vpop.eup %2508  ;;  %v1895_v6 = vmul.f32 1.442695, %v1888_v3  ;;  %v1687_v28 = vmul.f32 1.442695, %v1681_v15 }
 0xa3e   :  { %v3036_v11 = vsel %vm1661_vm7, %v2509_v5, 0.0  ;;  %v1685_v39 = vmul.f32 1.442695, %v1680_v26 }
 0xa3f   :  { %v1907_v9 = vsel %vm660_vm8, %v3036_v11, 0.0  ;;  %2510 = vpow2.f32 %v1895_v6 }
 0xa40   :  { %1908 = vadd.xlane.f32.xlu1 %v1907_v9  ;;  %2512 = vpow2.f32 %v1683_v12 }
 0xa42   :  { %v1678_v13 = vpop.xlane.xlu0 %1677 }
 0xa43   :  { %v1682_v14 = vsub.f32 %v1666_v33, %v1678_v13 }
 0xa45   :  { %v1689_v18 = vmul.f32 1.442695, %v1682_v14  ;;  %v2511_v16 = vpop.eup %2510 }
 0xa46   :  { %v3045_v63 = vsel %vm1662_vm9, %v2511_v16, 0.0  ;;  %v2513_v21 = vpop.eup %2512 }
 0xa47   :  { %2514 = vpow2.f32 %v1689_v18  ;;  %v1910_v27 = vsel %vm660_vm8, %v3045_v63, 0.0  ;;  %v3055_v10 = vsel %vm1659_vm2, %v2513_v21, 0.0 }
 0xa48   :  { %2446 = vrot.lane.b32.xlu2 %v2445_v20, %s2612_s0  ;;  %1911 = vadd.xlane.f32.xlu1 %v1910_v27  ;;  %2516 = vpow2.f32 %v1687_v28  ;;  %v1695_v19 = vsel %vm660_vm8, %v3055_v10, 0.0 }
 0xa49   :  { %2518 = vpow2.f32 %v1685_v39 }
 0xa4d   :  { %v2515_v7 = vpop.eup %2514 }
 0xa4e   :  { %v3051_v35 = vsel %vm1662_vm9, %v2515_v7, 0.0  ;;  %v2517_v23 = vpop.eup %2516 }
 0xa4f   :  { %v1704_v24 = vsel %vm660_vm8, %v3051_v35, 0.0  ;;  %v3063_v36 = vsel %vm1661_vm7, %v2517_v23, 0.0  ;;  %v2519_v40 = vpop.eup %2518 }
 0xa50   :  { %1705 = vadd.xlane.f32.xlu0 %v1704_v24  ;;  %1696 = vadd.xlane.f32.xlu1 %v1695_v19  ;;  %v1701_v38 = vsel %vm660_vm8, %v3063_v36, 0.0  ;;  %v3070_v17 = vsel %vm1660_vm6, %v2519_v40, 0.0 }
 0xa51   :  { %v1698_v43 = vsel %vm660_vm8, %v3070_v17, 0.0 }
 0xa55   :  { %v2452_v33 = vpop.permute.xlu0 %2451 }
 0xa56   :  { %v2453_v54 = vunpack.i.l.bf16 %v2452_v33  ;;  %v2454_v8 = vunpack.i.h.bf16 %v2452_v33 }
 0xa58   :  { %1702 = vadd.xlane.f32.xlu1 %v1701_v38 }
 0xa71   :  { %1699 = vadd.xlane.f32.xlu2 %v1698_v43 }
 0xaa3   :  { %v1903_v31 = vpop.xlane.xlu2 %1902 }
 0xaa4   :  { %2520 = vrcp.f32 %v1903_v31  ;;  %v1924_v50 = vand.u32 2147483648, %v1903_v31  ;;  %v1922_v25 = vand.u32 2147483647, %v1903_v31  ;;  %vm1918_vm12 = vweird.f32 %v1903_v31 }
 0xaa6   :  { %v1925_v44 = vor.u32 1.1754944e-38, %v1924_v50  ;;  %vm1923_vm14 = vcmp.eq.f32.partialorder %v1922_v25, 8.507059e+37  ;;  %v2118_v50 = vld [vmem:[#allocation2 + $0xd28] sm:$0xff] }
 0xaaa   :  { %v2521_v45 = vpop.eup %2520 }
 0xaab   :  { %v1914_v46 = vmul.f32 %v2521_v45, %v1903_v31  ;;  %v1906_v48 = vpop.xlane.xlu1 %1905  ;;  %v2447_v49 = vpop.permute.xlu2 %2446  ;;  %vm1919_vm10 = vweird.f32 %v2521_v45 }
 0xaac   :  { %2522 = vrcp.f32 %v1906_v48  ;;  %v2448_v41 = vunpack.i.l.bf16 %v2447_v49  ;;  %v2449_v53 = vunpack.i.h.bf16 %v2447_v49  ;;  %vm1920_vm13 = vmor %vm1918_vm12, %vm1919_vm10  ;;  %v1939_v62 = vand.u32 2147483648, %v1906_v48 }
 0xaad   :  { %v1915_v29 = vsub.f32 1.0, %v1914_v46  ;;  %v1937_v1 = vand.u32 2147483647, %v1906_v48  ;;  %vm1933_vm0 = vweird.f32 %v1906_v48 }
 0xaae   :  { %2013 = vmatpush.msrb.mxu3 %v2448_v41  ;;  %v1940_v5 = vor.u32 1.1754944e-38, %v1939_v62 }
 0xaaf   :  { %v1916_v51 = vmul.f32 %v2521_v45, %v1915_v29  ;;  %vm1938_vm3 = vcmp.eq.f32.partialorder %v1937_v1, 8.507059e+37  ;;  %v2119_v29 = vld [vmem:[#allocation2 + $0xd30] sm:$0xff] }
 0xab0   :  { %2014 = vmatpush.msrb.mxu3 %v2449_v53  ;;  %v2117_v53 = vld [vmem:[#allocation2 + $0xd20] sm:$0xff] }
 0xab1   :  { %v1917_v55 = vadd.f32 %v2521_v45, %v1916_v51 }
 0xab2   :  { %v2523_v56 = vpop.eup %2522  ;;  %2015 = vmatpush.msrb.mxu3 %v2453_v54 }
 0xab3   :  { %v1921_v4 = vsel %vm1920_vm13, %v2521_v45, %v1917_v55  ;;  %v1929_v30 = vmul.f32 %v2523_v56, %v1906_v48  ;;  %v1909_v57 = vpop.xlane.xlu1 %1908  ;;  %vm1934_vm15 = vweird.f32 %v2523_v56 }
 0xab4   :  { %v1926_v58 = vsel %vm1923_vm14, %v1925_v44, %v1921_v4  ;;  %2524 = vrcp.f32 %v1909_v57  ;;  %2016 = vmatpush.msrb.mxu3 %v2454_v8  ;;  %vm1935_vm1 = vmor %vm1933_vm0, %vm1934_vm15  ;;  %v1954_v15 = vand.u32 2147483648, %v1909_v57  ;;  %v1952_v18 = vand.u32 2147483647, %v1909_v57  ;;  %v2115_v44 = vld [vmem:[#allocation2 + $0xd10] sm:$0xff]  ;;  %v2114_v8 = vld [vmem:[#allocation2 + $0xd08] sm:$0xff] }
 0xab5   :  { %v1930_v59 = vsub.f32 1.0, %v1929_v30  ;;  %v1927_v61 = vmul.f32 %v1926_v58, %v3024_v34  ;;  %vm1948_vm5 = vweird.f32 %v1909_v57  ;;  %v2113_v30 = vld [vmem:[#allocation2 + $0xd00] sm:$0xff]  ;;  %v2111_v58 = vld [vmem:[#allocation2 + $0xcf0] sm:$0xff] }
 0xab6   :  { %v1955_v16 = vor.u32 1.1754944e-38, %v1954_v15  ;;  %vm1953_vm6 = vcmp.eq.f32.partialorder %v1952_v18, 8.507059e+37 }
 0xab7   :  { %v1931_v0 = vmul.f32 %v2523_v56, %v1930_v59  ;;  %2395 = vmatmul.msk.f32.vlgmr.msrb.gmra.mxu3 %vm660_vm8, %v1927_v61  ;;  %v2110_v61 = vld [vmem:[#allocation2 + $0xce8] sm:$0xff] }
 0xab9   :  { %v1932_v2 = vadd.f32 %v2523_v56, %v1931_v0  ;;  %v2109_v0 = vld [vmem:[#allocation2 + $0xce0] sm:$0xff] }
 0xaba   :  { %v2525_v3 = vpop.eup %2524 }
 0xabb   :  { %v1944_v47 = vmul.f32 %v2525_v3, %v1909_v57  ;;  %v1936_v6 = vsel %vm1935_vm1, %v2523_v56, %v1932_v2  ;;  %v1912_v13 = vpop.xlane.xlu1 %1911  ;;  %vm1949_vm4 = vweird.f32 %v2525_v3  ;;  %v2116_v56 = vld [vmem:[#allocation2 + $0xd18] sm:$0xff] }
 0xabc   :  { %v1941_v9 = vsel %vm1938_vm3, %v1940_v5, %v1936_v6  ;;  %2526 = vrcp.f32 %v1912_v13  ;;  %vm1950_vm2 = vmor %vm1948_vm5, %vm1949_vm4  ;;  %v1969_v23 = vand.u32 2147483648, %v1912_v13  ;;  %v1967_v38 = vand.u32 2147483647, %v1912_v13  ;;  %v2112_v57 = vld [vmem:[#allocation2 + $0xcf8] sm:$0xff] }
 0xabd   :  { %v1945_v12 = vsub.f32 1.0, %v1944_v47  ;;  %v1942_v14 = vmul.f32 %v1941_v9, %v3030_v60  ;;  %vm1963_vm9 = vweird.f32 %v1912_v13  ;;  %v2108_v2 = vld [vmem:[#allocation2 + $0xcd8] sm:$0xff]  ;;  %v2106_v47 = vld [vmem:[#allocation2 + $0xcc8] sm:$0xff] }
 0xabe   :  { %v1970_v40 = vor.u32 1.1754944e-38, %v1969_v23  ;;  %vm1968_vm12 = vcmp.eq.f32.partialorder %v1967_v38, 8.507059e+37 }
 0xabf   :  { %v1946_v34 = vmul.f32 %v2525_v3, %v1945_v12  ;;  %2396 = vmatmul.msk.f32.gmra.mxu3 %vm660_vm8, %v1942_v14 }
 0xac1   :  { %v1947_v20 = vadd.f32 %v2525_v3, %v1946_v34 }
 0xac2   :  { %v2527_v27 = vpop.eup %2526 }
 0xac3   :  { %v1951_v28 = vsel %vm1950_vm2, %v2525_v3, %v1947_v20  ;;  %v1959_v21 = vmul.f32 %v2527_v27, %v1912_v13  ;;  %v1697_v7 = vpop.xlane.xlu1 %1696  ;;  %vm1964_vm7 = vweird.f32 %v2527_v27  ;;  %v1706_v59 = vpop.xlane.xlu0 %1705  ;;  %v2107_v3 = vld [vmem:[#allocation2 + $0xcd0] sm:$0xff]  ;;  %v2105_v13 = vld [vmem:[#allocation2 + $0xcc0] sm:$0xff] }
 0xac4   :  { %v1956_v24 = vsel %vm1953_vm6, %v1955_v16, %v1951_v28  ;;  %2528 = vrcp.f32 %v1697_v7  ;;  %vm1965_vm10 = vmor %vm1963_vm9, %vm1964_vm7  ;;  %v1718_v49 = vand.u32 2147483648, %v1697_v7  ;;  %v1716_v33 = vand.u32 2147483647, %v1697_v7 }
 0xac5   :  { %v1960_v19 = vsub.f32 1.0, %v1959_v21  ;;  %v1957_v60 = vmul.f32 %v1956_v24, %v3036_v11  ;;  %v2120_v11 = vld [vmem:[#allocation2 + $0xd38] sm:$0xff]  ;;  %vm1712_vm14 = vweird.f32 %v1697_v7 }
 0xac6   :  { %2123 = vmatpush.msrb.mxu1 %v2120_v11  ;;  %v1719_v25 = vor.u32 1.1754944e-38, %v1718_v49  ;;  %vm1717_vm0 = vcmp.eq.f32.partialorder %v1716_v33, 8.507059e+37  ;;  %v2057_v33 = vld [vmem:[#allocation2 + $0xcb0] sm:$0xff] }
 0xac7   :  { %v1961_v37 = vmul.f32 %v2527_v27, %v1960_v19  ;;  %2397 = vmatmul.msk.f32.gmra.mxu3 %vm660_vm8, %v1957_v60  ;;  %2080 = vmatpush.msra.mxu0 %v2057_v33 }
 0xac8   :  { %2124 = vmatpush.msrb.mxu1 %v2119_v29 }
 0xac9   :  { %v1962_v26 = vadd.f32 %v2527_v27, %v1961_v37 }
 0xaca   :  { %v2529_v39 = vpop.eup %2528  ;;  %2125 = vmatpush.msrb.mxu1 %v2118_v50  ;;  %v2052_v50 = vld [vmem:[#allocation2 + $0xc88] sm:$0xff] }
 0xacb   :  { %v1708_v43 = vmul.f32 %v2529_v39, %v1697_v7  ;;  %v1966_v31 = vsel %vm1965_vm10, %v2527_v27, %v1962_v26  ;;  %vm1713_vm13 = vweird.f32 %v2529_v39  ;;  %v1703_v4 = vpop.xlane.xlu1 %1702 }
 0xacc   :  { %v1971_v45 = vsel %vm1968_vm12, %v1970_v40, %v1966_v31  ;;  %vm1714_vm15 = vmor %vm1712_vm14, %vm1713_vm13  ;;  %2126 = vmatpush.msrb.mxu1 %v2117_v53  ;;  %2530 = vrcp.f32 %v1703_v4  ;;  %v1748_v19 = vand.u32 2147483648, %v1703_v4  ;;  %vm1742_vm6 = vweird.f32 %v1703_v4  ;;  %v166_v53 = vld [vmem:[#allocation2 + $0x398] sm:$0xff] }
 0xacd   :  { %v1709_v46 = vsub.f32 1.0, %v1708_v43  ;;  %v1972_v48 = vmul.f32 %v1971_v45, %v3045_v63  ;;  %v1746_v37 = vand.u32 2147483647, %v1703_v4  ;;  %v1763_v31 = vand.u32 2147483648, %v1706_v59  ;;  %2168 = vmatpush.msra.mxu2 %v166_v53  ;;  %2205 = vmatpush.msra.mxu3 %v166_v53 }
 0xace   :  { %2127 = vmatpush.msrb.mxu1 %v2116_v56  ;;  %vm1757_vm12 = vweird.f32 %v1706_v59  ;;  %v1761_v45 = vand.u32 2147483647, %v1706_v59 }
 0xacf   :  { %v1710_v41 = vmul.f32 %v2529_v39, %v1709_v46  ;;  %2398 = vmatmul.msk.f32.gmra.mxu3 %vm660_vm8, %v1972_v48  ;;  %vm1747_vm9 = vcmp.eq.f32.partialorder %v1746_v37, 8.507059e+37 }
 0xad0   :  { %2128 = vmatpush.msrb.mxu1 %v2115_v44  ;;  %vm1762_vm14 = vcmp.eq.f32.partialorder %v1761_v45, 8.507059e+37  ;;  %v163_v44 = vld [vmem:[#allocation2 + $0x380] sm:$0xff] }
 0xad1   :  { %v1711_v51 = vadd.f32 %v2529_v39, %v1710_v41 }
 0xad2   :  { %2129 = vmatpush.msrb.mxu1 %v2114_v8 }
 0xad3   :  { %v1715_v54 = vsel %vm1714_vm15, %v2529_v39, %v1711_v51  ;;  %v1749_v39 = vor.u32 1.1754944e-38, %v1748_v19  ;;  %v2051_v51 = vld [vmem:[#allocation2 + $0xc80] sm:$0xff] }
 0xad4   :  { %v1720_v63 = vsel %vm1717_vm0, %v1719_v25, %v1715_v54  ;;  %2130 = vmatpush.msrb.mxu1 %v2113_v30  ;;  %v2050_v25 = vld [vmem:[#allocation2 + $0xc78] sm:$0xff]  ;;  %v165_v54 = vld [vmem:[#allocation2 + $0x390] sm:$0xff] }
 0xad5   :  { %v1721_v55 = vmul.f32 %v1720_v63, %v3055_v10  ;;  %v2531_v10 = vpop.eup %2530  ;;  %2169 = vmatpush.msra.mxu2 %v165_v54  ;;  %2206 = vmatpush.msra.mxu3 %v165_v54  ;;  %v161_v30 = vld [vmem:[#allocation2 + $0x370] sm:$0xff] }
 0xad6   :  { %2131 = vmatpush.msrb.mxu1 %v2112_v57  ;;  %v1738_v1 = vmul.f32 %v2531_v10, %v1703_v4  ;;  %vm1743_vm2 = vweird.f32 %v2531_v10  ;;  %v162_v4 = vld [vmem:[#allocation2 + $0x378] sm:$0xff] }
 0xad7   :  { %2383 = vmatmul.msk.f32.vlgmr.msra.gmra.mxu1 %vm660_vm8, %v1721_v55  ;;  %vm1744_vm7 = vmor %vm1742_vm6, %vm1743_vm2  ;;  %v164_v55 = vld [vmem:[#allocation2 + $0x388] sm:$0xff] }
 0xad8   :  { %2132 = vmatpush.msrb.mxu1 %v2111_v58  ;;  %v1739_v9 = vsub.f32 1.0, %v1738_v1  ;;  %2170 = vmatpush.msra.mxu2 %v164_v55  ;;  %v160_v58 = vld [vmem:[#allocation2 + $0x368] sm:$0xff] }
 0xad9   :  { %2207 = vmatpush.msra.mxu3 %v164_v55  ;;  %v2304_v55 = vld [vmem:[#allocation2 + $0xdd0] sm:$0xff] }
 0xada   :  { %2133 = vmatpush.msrb.mxu1 %v2110_v61  ;;  %v1740_v18 = vmul.f32 %v2531_v10, %v1739_v9  ;;  %2171 = vmatpush.msra.mxu2 %v163_v44  ;;  %v159_v61 = vld [vmem:[#allocation2 + $0x360] sm:$0xff] }
 0xadb   :  { %2208 = vmatpush.msra.mxu3 %v163_v44 }
 0xadc   :  { %2134 = vmatpush.msrb.mxu1 %v2109_v0  ;;  %v1741_v24 = vadd.f32 %v2531_v10, %v1740_v18  ;;  %2172 = vmatpush.msra.mxu2 %v162_v4  ;;  %v157_v0 = vld [vmem:[#allocation2 + $0x350] sm:$0xff] }
 0xadd   :  { %2209 = vmatpush.msra.mxu3 %v162_v4 }
 0xade   :  { %2135 = vmatpush.msrb.mxu1 %v2108_v2  ;;  %v1745_v26 = vsel %vm1744_vm7, %v2531_v10, %v1741_v24  ;;  %2173 = vmatpush.msra.mxu2 %v161_v30  ;;  %v158_v10 = vld [vmem:[#allocation2 + $0x358] sm:$0xff]  ;;  %v156_v2 = vld [vmem:[#allocation2 + $0x348] sm:$0xff] }
 0xadf   :  { %v1750_v40 = vsel %vm1747_vm9, %v1749_v39, %v1745_v26  ;;  %2210 = vmatpush.msra.mxu3 %v161_v30 }
 0xae0   :  { %2136 = vmatpush.msrb.mxu1 %v2107_v3  ;;  %v1751_v46 = vmul.f32 %v1750_v40, %v3063_v36  ;;  %2174 = vmatpush.msra.mxu2 %v160_v58 }
 0xae1   :  { %2211 = vmatpush.msra.mxu3 %v160_v58 }
 0xae2   :  { %2137 = vmatpush.msrb.mxu1 %v2106_v47  ;;  %2175 = vmatpush.msra.mxu2 %v159_v61 }
 0xae3   :  { %2212 = vmatpush.msra.mxu3 %v159_v61 }
 0xae4   :  { %v1700_v62 = vpop.xlane.xlu2 %1699  ;;  %2138 = vmatpush.msrb.mxu1 %v2105_v13  ;;  %2176 = vmatpush.msra.mxu2 %v158_v10  ;;  %v154_v13 = vld [vmem:[#allocation2 + $0x338] sm:$0xff] }
 0xae5   :  { %2532 = vrcp.f32 %v1700_v62  ;;  %v1733_v15 = vand.u32 2147483648, %v1700_v62  ;;  %v1731_v16 = vand.u32 2147483647, %v1700_v62  ;;  %vm1727_vm3 = vweird.f32 %v1700_v62  ;;  %2213 = vmatpush.msra.mxu3 %v158_v10 }
 0xae6   :  { %2534 = vrcp.f32 %v1706_v59  ;;  %2177 = vmatpush.msra.mxu2 %v157_v0 }
 0xae7   :  { %v1734_v21 = vor.u32 1.1754944e-38, %v1733_v15  ;;  %vm1732_vm5 = vcmp.eq.f32.partialorder %v1731_v16, 8.507059e+37  ;;  %2214 = vmatpush.msra.mxu3 %v157_v0  ;;  %v151_v15 = vld [vmem:[#allocation2 + $0x320] sm:$0xff] }
 0xae8   :  { %2178 = vmatpush.msra.mxu2 %v156_v2  ;;  %v2458_v16 = vld [vmem:[#allocation2 + $0xd40] ss:$0 sm:$0xff] }
 0xae9   :  { %2215 = vmatpush.msra.mxu3 %v156_v2  ;;  %v2302_v2 = vld [vmem:[#allocation2 + $0xdc0] sm:$0xff] }
 0xaeb   :  { %v2533_v5 = vpop.eup %2532 }
 0xaec   :  { %v2535_v6 = vpop.eup %2534  ;;  %v1723_v12 = vmul.f32 %v2533_v5, %v1700_v62  ;;  %vm1728_vm1 = vweird.f32 %v2533_v5 }
 0xaed   :  { %v1753_v34 = vmul.f32 %v2535_v6, %v1706_v59  ;;  %vm1729_vm4 = vmor %vm1727_vm3, %vm1728_vm1  ;;  %vm1758_vm10 = vweird.f32 %v2535_v6 }
 0xaee   :  { %v1724_v14 = vsub.f32 1.0, %v1723_v12  ;;  %vm1759_vm13 = vmor %vm1757_vm12, %vm1758_vm10  ;;  %v155_v12 = vld [vmem:[#allocation2 + $0x340] sm:$0xff] }
 0xaef   :  { %v1754_v27 = vsub.f32 1.0, %v1753_v34  ;;  %2179 = vmatpush.msra.mxu2 %v155_v12  ;;  %2216 = vmatpush.msra.mxu3 %v155_v12  ;;  %v152_v34 = vld [vmem:[#allocation2 + $0x328] sm:$0xff]  ;;  %v2296_v12 = vld [vmem:[#allocation2 + $0xd90] sm:$0xff] }
 0xaf0   :  { %v1725_v20 = vmul.f32 %v2533_v5, %v1724_v14  ;;  %v153_v14 = vld [vmem:[#allocation2 + $0x330] sm:$0xff] }
 0xaf1   :  { %v1755_v38 = vmul.f32 %v2535_v6, %v1754_v27  ;;  %2180 = vmatpush.msra.mxu2 %v154_v13  ;;  %2217 = vmatpush.msra.mxu3 %v154_v13  ;;  %v2459_v27 = vld [vmem:[#allocation2 + $0xcb8] ss:$0 sm:$0xff]  ;;  %v2295_v13 = vld [vmem:[#allocation2 + $0xd88] sm:$0xff] }
 0xaf2   :  { %v1726_v28 = vadd.f32 %v2533_v5, %v1725_v20  ;;  %v2152_v20 = vld [vmem:[#allocation2 + $0xd48] sm:$0x1] }
 0xaf3   :  { %v1756_v43 = vadd.f32 %v2535_v6, %v1755_v38  ;;  %2181 = vmatpush.msra.mxu2 %v153_v14  ;;  %2218 = vmatpush.msra.mxu3 %v153_v14  ;;  %v2294_v14 = vld [vmem:[#allocation2 + $0xd80] sm:$0xff] }
 0xaf4   :  { %v1730_v7 = vsel %vm1729_vm4, %v2533_v5, %v1726_v28  ;;  %v2158_v28 = vsub.f32 1.0, %v2152_v20  ;;  %v2290_v20 = vld [vmem:[#allocation2 + $0xd60] sm:$0xff] }
 0xaf5   :  { %v1735_v60 = vsel %vm1732_vm5, %v1734_v21, %v1730_v7  ;;  %v1760_v48 = vsel %vm1759_vm13, %v2535_v6, %v1756_v43  ;;  %2182 = vmatpush.msra.mxu2 %v152_v34  ;;  %2219 = vmatpush.msra.mxu3 %v152_v34  ;;  %v2293_v34 = vld [vmem:[#allocation2 + $0xd78] sm:$0xff] }
 0xaf6   :  { %v1736_v23 = vmul.f32 %v1735_v60, %v3070_v17  ;;  %v1764_v17 = vor.u32 1.1754944e-38, %v1763_v31  ;;  %v2159_v24 = vperm.slane %v2158_v28, 0  ;;  %v2460_v60 = vld [vmem:[#allocation2 + $0xd48] ss:$0 sm:$0xff] }
 0xaf7   :  { %2183 = vmatpush.msra.mxu2 %v151_v15  ;;  %2220 = vmatpush.msra.mxu3 %v151_v15  ;;  %v2292_v15 = vld [vmem:[#allocation2 + $0xd70] sm:$0xff] }
 0xaf8   :  { %2384 = vmatmul.msk.f32.gmra.mxu1 %vm660_vm8, %v1736_v23  ;;  %v1765_v49 = vsel %vm1762_vm14, %v1764_v17, %v1760_v48 }
 0xaf9   :  { %v1766_v11 = vmul.f32 %v1765_v49, %v3051_v35 }
 0xb00   :  { %2385 = vmatmul.msk.f32.gmra.mxu1 %vm660_vm8, %v1751_v46 }
 0xb08   :  { %2386 = vmatmul.msk.f32.gmra.mxu1 %vm660_vm8, %v1766_v11 }
 0xb10   :  { %2139 = vmatmul.f32.vlgmr.msrb.gmra.mxu1 %v2640_v22  ;;  %v2056_v22 = vld [vmem:[#allocation2 + $0xca8] sm:$0xff] }
 0xb11   :  { %2081 = vmatpush.msra.mxu0 %v2056_v22 }
 0xb18   :  { %2142 = vmatmul.f32.gmra.mxu1 %v2656_v32  ;;  %v2055_v32 = vld [vmem:[#allocation2 + $0xca0] sm:$0xff] }
 0xb19   :  { %2082 = vmatpush.msra.mxu0 %v2055_v32 }
 0xb20   :  { %2145 = vmatmul.f32.gmra.mxu1 %v2662_v42  ;;  %v2054_v42 = vld [vmem:[#allocation2 + $0xc98] sm:$0xff] }
 0xb21   :  { %2083 = vmatpush.msra.mxu0 %v2054_v42 }
 0xb28   :  { %2148 = vmatmul.f32.gmra.mxu1 %v2667_v52  ;;  %v2053_v52 = vld [vmem:[#allocation2 + $0xc90] sm:$0xff] }
 0xb29   :  { %2084 = vmatpush.msra.mxu0 %v2053_v52 }
 0xb2b   :  { %2085 = vmatpush.msra.mxu0 %v2052_v50 }
 0xb2d   :  { %2086 = vmatpush.msra.mxu0 %v2051_v51 }
 0xb2f   :  { %2087 = vmatpush.msra.mxu0 %v2050_v25 }
 0xb3a   :  { %v2018_v36 = vpop.f32.mrf.mxu3 }
 0xb3b   :  { %2034 = vrot.lane.b32.xlu1 %v2018_v36, %s2614_s21 }
 0xb42   :  { %v2021_v29 = vpop.f32.mrf.mxu3 }
 0xb43   :  { %2036 = vrot.lane.b32.xlu1 %v2021_v29, %s2614_s21 }
 0xb4a   :  { %v2024_v41 = vpop.f32.mrf.mxu3 }
 0xb4b   :  { %2038 = vrot.lane.b32.xlu2 %v2024_v41, %s2614_s21 }
 0xb52   :  { %v2027_v35 = vpop.f32.mrf.mxu3 }
 0xb53   :  { %2040 = vrot.lane.b32.xlu1 %v2027_v35, %s2614_s21 }
 0xb54   :  { %v1796_v63 = vpop.f32.mrf.mxu1 }
 0xb75   :  { %v1799_v57 = vpop.f32.mrf.mxu1 }
 0xb7d   :  { %v1802_v3 = vpop.f32.mrf.mxu1 }
 0xb85   :  { %v1805_v47 = vpop.f32.mrf.mxu1 }
 0xb8d   :  { %v2140_v18 = vpop.f32.mrf.mxu1 }
 0xb8e   :  { %v2141_v7 = vadd.f32 %v2458_v16, %v2140_v18  ;;  %v2291_v18 = vld [vmem:[#allocation2 + $0xd68] sm:$0xff] }
 0xb90   :  { %v2160_v38 = vmul.f32 %v2159_v24, %v2141_v7 }
 0xb95   :  { %v2143_v37 = vpop.f32.mrf.mxu1 }
 0xb96   :  { %v2144_v43 = vadd.f32 %v2458_v16, %v2143_v37 }
 0xb98   :  { %v2161_v46 = vmul.f32 %v2159_v24, %v2144_v43  ;;  %v2461_v43 = vld [vmem:[#allocation2 + $0xd50] ss:$0 sm:$0xff] }
 0xb9d   :  { %v2146_v17 = vpop.f32.mrf.mxu1 }
 0xb9e   :  { %v2147_v36 = vadd.f32 %v2458_v16, %v2146_v17 }
 0xba0   :  { %v2162_v35 = vmul.f32 %v2159_v24, %v2147_v36 }
 0xba5   :  { %v2039_v1 = vpop.permute.xlu2 %2038  ;;  %v2149_v32 = vpop.f32.mrf.mxu1 }
 0xba6   :  { %v2048_v5 = vsel %vm660_vm8, %v1802_v3, %v2039_v1  ;;  %v2150_v52 = vadd.f32 %v2458_v16, %v2149_v32  ;;  %v2303_v1 = vld [vmem:[#allocation2 + $0xdc8] sm:$0xff]  ;;  %v2301_v3 = vld [vmem:[#allocation2 + $0xdb8] sm:$0xff] }
 0xba8   :  { %v2163_v25 = vmul.f32 %v2159_v24, %v2150_v52 }
 0xbad   :  { %v2035_v56 = vpop.permute.xlu1 %2034 }
 0xbae   :  { %v2046_v8 = vsel %vm660_vm8, %v1796_v63, %v2035_v56  ;;  %v2305_v63 = vld [vmem:[#allocation2 + $0xdd8] sm:$0xff] }
 0xbaf   :  { %2399 = vmatmul.msk.f32.vlgmr.msra.gmra.mxu0 %vm929_vm11, %v2046_v8 }
 0xbb0   :  { %2308 = vmatpush.msrb.mxu0 %v2305_v63 }
 0xbb2   :  { %2309 = vmatpush.msrb.mxu0 %v2304_v55 }
 0xbb4   :  { %2310 = vmatpush.msrb.mxu0 %v2303_v1 }
 0xbb5   :  { %v2037_v59 = vpop.permute.xlu1 %2036 }
 0xbb6   :  { %v2047_v62 = vsel %vm660_vm8, %v1799_v57, %v2037_v59  ;;  %2311 = vmatpush.msrb.mxu0 %v2302_v2 }
 0xbb7   :  { %2400 = vmatmul.msk.f32.gmra.mxu0 %vm929_vm11, %v2047_v62 }
 0xbb8   :  { %2312 = vmatpush.msrb.mxu0 %v2301_v3  ;;  %v2463_v3 = vld [vmem:[#allocation2 + $0xde0] ss:$0 sm:$0xff] }
 0xbbf   :  { %2401 = vmatmul.msk.f32.gmra.mxu0 %vm929_vm11, %v2048_v5  ;;  %v2300_v5 = vld [vmem:[#allocation2 + $0xdb0] sm:$0xff] }
 0xbc0   :  { %2313 = vmatpush.msrb.mxu0 %v2300_v5 }
 0xbc5   :  { %v2041_v6 = vpop.permute.xlu1 %2040 }
 0xbc6   :  { %v2049_v9 = vsel %vm660_vm8, %v1805_v47, %v2041_v6  ;;  %v2299_v47 = vld [vmem:[#allocation2 + $0xda8] sm:$0xff]  ;;  %v2298_v6 = vld [vmem:[#allocation2 + $0xda0] sm:$0xff] }
 0xbc7   :  { %2402 = vmatmul.msk.f32.gmra.mxu0 %vm929_vm11, %v2049_v9  ;;  %v2297_v9 = vld [vmem:[#allocation2 + $0xd98] sm:$0xff] }
 0xbc8   :  { %2314 = vmatpush.msrb.mxu0 %v2299_v47 }
 0xbca   :  { %2315 = vmatpush.msrb.mxu0 %v2298_v6 }
 0xbcc   :  { %2316 = vmatpush.msrb.mxu0 %v2297_v9 }
 0xbce   :  { %2317 = vmatpush.msrb.mxu0 %v2296_v12 }
 0xbd0   :  { %2318 = vmatpush.msrb.mxu0 %v2295_v13 }
 0xbd2   :  { %2319 = vmatpush.msrb.mxu0 %v2294_v14 }
 0xbd4   :  { %2320 = vmatpush.msrb.mxu0 %v2293_v34 }
 0xbd6   :  { %2321 = vmatpush.msrb.mxu0 %v2292_v15 }
 0xbd8   :  { %2322 = vmatpush.msrb.mxu0 %v2291_v18 }
 0xbda   :  { %2323 = vmatpush.msrb.mxu0 %v2290_v20 }
 0xc2c   :  { %v2089_v21 = vpop.f32.mrf.mxu0 }
 0xc2d   :  { %v2090_v19 = vadd.f32 %v2459_v27, %v2089_v21 }
 0xc2f   :  { %v2101_v23 = vmax.f32 %v2090_v19, 0.0 }
 0xc31   :  { %v2154_v26 = vmul.f32 %v2460_v60, %v2101_v23 }
 0xc33   :  { %v2164_v39 = vadd.f32 %v2160_v38, %v2154_v26 }
 0xc34   :  { %v2092_v40 = vpop.f32.mrf.mxu0 }
 0xc35   :  { %v2093_v31 = vadd.f32 %v2459_v27, %v2092_v40  ;;  %2184 = vmatmul.f32.vlgmr.msra.gmra.mxu2 %v2164_v39 }
 0xc37   :  { %v2102_v45 = vmax.f32 %v2093_v31, 0.0 }
 0xc39   :  { %v2155_v48 = vmul.f32 %v2460_v60, %v2102_v45 }
 0xc3b   :  { %v2165_v49 = vadd.f32 %v2161_v46, %v2155_v48  ;;  %v2462_v48 = vld [vmem:[#allocation2 + $0xd58] ss:$0 sm:$0xff] }
 0xc3c   :  { %v2095_v11 = vpop.f32.mrf.mxu0 }
 0xc3d   :  { %v2096_v29 = vadd.f32 %v2459_v27, %v2095_v11  ;;  %2187 = vmatmul.f32.gmra.mxu2 %v2165_v49 }
 0xc3f   :  { %v2103_v41 = vmax.f32 %v2096_v29, 0.0 }
 0xc41   :  { %v2156_v33 = vmul.f32 %v2460_v60, %v2103_v41 }
 0xc43   :  { %v2166_v22 = vadd.f32 %v2162_v35, %v2156_v33 }
 0xc44   :  { %v2098_v42 = vpop.f32.mrf.mxu0 }
 0xc45   :  { %2190 = vmatmul.f32.gmra.mxu2 %v2166_v22  ;;  %v2099_v50 = vadd.f32 %v2459_v27, %v2098_v42 }
 0xc47   :  { %v2104_v51 = vmax.f32 %v2099_v50, 0.0 }
 0xc49   :  { %v2157_v53 = vmul.f32 %v2460_v60, %v2104_v51 }
 0xc4b   :  { %v2167_v54 = vadd.f32 %v2163_v25, %v2157_v53 }
 0xc4d   :  { %2193 = vmatmul.f32.gmra.mxu2 %v2167_v54 }
 0xcb8   :  { %v2185_v56 = vpop.f32.mrf.mxu2 }
 0xcb9   :  { %v3106_v44 = vsub.f32 %v2164_v39, %v2185_v56 }
 0xcbb   :  { %v2201_v8 = vmul.f32 %v3106_v44, %v3106_v44 }
 0xcbd   :  { %2221 = vmatmul.f32.vlgmr.msra.gmra.mxu3 %v2201_v8 }
 0xcc0   :  { %v2188_v4 = vpop.f32.mrf.mxu2 }
 0xcc1   :  { %v3110_v30 = vsub.f32 %v2165_v49, %v2188_v4 }
 0xcc3   :  { %v2202_v57 = vmul.f32 %v3110_v30, %v3110_v30 }
 0xcc5   :  { %2224 = vmatmul.f32.gmra.mxu3 %v2202_v57 }
 0xcc8   :  { %v2191_v58 = vpop.f32.mrf.mxu2 }
 0xcc9   :  { %v3114_v59 = vsub.f32 %v2166_v22, %v2191_v58 }
 0xccb   :  { %v2203_v61 = vmul.f32 %v3114_v59, %v3114_v59 }
 0xccd   :  { %2227 = vmatmul.f32.gmra.mxu3 %v2203_v61 }
 0xcd0   :  { %v2194_v62 = vpop.f32.mrf.mxu2 }
 0xcd1   :  { %v3118_v10 = vsub.f32 %v2167_v54, %v2194_v62 }
 0xcd3   :  { %v2204_v0 = vmul.f32 %v3118_v10, %v3118_v10 }
 0xcd5   :  { %2230 = vmatmul.f32.gmra.mxu3 %v2204_v0 }
 0xd40   :  { %v2222_v16 = vpop.f32.mrf.mxu3 }
 0xd41   :  { %v2223_v28 = vadd.f32 1e-05, %v2222_v16 }
 0xd43   :  { %2536 = vrsqrt.f32 %v2223_v28  ;;  %vm2240_vm11 = vweird.f32 %v2223_v28 }
 0xd48   :  { %v2225_v27 = vpop.f32.mrf.mxu3 }
 0xd49   :  { %v2537_v21 = vpop.eup %2536  ;;  %v2226_v7 = vadd.f32 1e-05, %v2225_v27 }
 0xd4a   :  { %v2235_v24 = vmul.f32 %v2537_v21, %v2223_v28  ;;  %vm2241_vm8 = vweird.f32 %v2537_v21 }
 0xd4b   :  { %2538 = vrsqrt.f32 %v2226_v7  ;;  %vm2242_vm15 = vmor %vm2240_vm11, %vm2241_vm8  ;;  %vm2250_vm1 = vweird.f32 %v2226_v7 }
 0xd4c   :  { %v2236_v19 = vmul.f32 %v2537_v21, %v2235_v24 }
 0xd4e   :  { %v2237_v60 = vmul.f32 0.5, %v2236_v19 }
 0xd50   :  { %v2238_v23 = vsub.f32 1.5, %v2237_v60  ;;  %v2228_v37 = vpop.f32.mrf.mxu3 }
 0xd51   :  { %v2539_v38 = vpop.eup %2538  ;;  %v2229_v26 = vadd.f32 1e-05, %v2228_v37 }
 0xd52   :  { %v2239_v39 = vmul.f32 %v2537_v21, %v2238_v23  ;;  %v2245_v40 = vmul.f32 %v2539_v38, %v2226_v7  ;;  %vm2251_vm0 = vweird.f32 %v2539_v38 }
 0xd53   :  { %2540 = vrsqrt.f32 %v2229_v26  ;;  %vm2252_vm3 = vmor %vm2250_vm1, %vm2251_vm0  ;;  %vm2260_vm5 = vweird.f32 %v2229_v26 }
 0xd54   :  { %v2243_v31 = vsel %vm2242_vm15, %v2537_v21, %v2239_v39  ;;  %v2246_v45 = vmul.f32 %v2539_v38, %v2245_v40 }
 0xd55   :  { %v2274_v46 = vmul.f32 %v2243_v31, %v3106_v44 }
 0xd56   :  { %v2247_v17 = vmul.f32 0.5, %v2246_v45 }
 0xd57   :  { %v2280_v49 = vmul.f32 %v2461_v43, %v2274_v46 }
 0xd58   :  { %v2248_v11 = vsub.f32 1.5, %v2247_v17  ;;  %v2231_v33 = vpop.f32.mrf.mxu3 }
 0xd59   :  { %v2541_v36 = vpop.eup %2540  ;;  %v2286_v29 = vadd.f32 %v2462_v48, %v2280_v49  ;;  %v2232_v22 = vadd.f32 1e-05, %v2231_v33 }
 0xd5a   :  { %v2249_v41 = vmul.f32 %v2539_v38, %v2248_v11  ;;  %v2255_v35 = vmul.f32 %v2541_v36, %v2229_v26  ;;  %vm2261_vm4 = vweird.f32 %v2541_v36 }
 0xd5b   :  { %2324 = vmatmul.f32.vlgmr.msrb.gmra.mxu0 %v2286_v29  ;;  %2542 = vrsqrt.f32 %v2232_v22  ;;  %vm2262_vm2 = vmor %vm2260_vm5, %vm2261_vm4  ;;  %vm2270_vm7 = vweird.f32 %v2232_v22 }
 0xd5c   :  { %v2253_v32 = vsel %vm2252_vm3, %v2539_v38, %v2249_v41  ;;  %v2256_v42 = vmul.f32 %v2541_v36, %v2255_v35 }
 0xd5d   :  { %v2275_v52 = vmul.f32 %v2253_v32, %v3110_v30 }
 0xd5e   :  { %v2257_v50 = vmul.f32 0.5, %v2256_v42 }
 0xd5f   :  { %v2281_v51 = vmul.f32 %v2461_v43, %v2275_v52 }
 0xd60   :  { %v2258_v25 = vsub.f32 1.5, %v2257_v50 }
 0xd61   :  { %v2287_v53 = vadd.f32 %v2462_v48, %v2281_v51  ;;  %v2543_v63 = vpop.eup %2542 }
 0xd62   :  { %v2259_v54 = vmul.f32 %v2541_v36, %v2258_v25  ;;  %v2265_v56 = vmul.f32 %v2543_v63, %v2232_v22  ;;  %vm2271_vm6 = vweird.f32 %v2543_v63 }
 0xd63   :  { %2327 = vmatmul.f32.gmra.mxu0 %v2287_v53  ;;  %vm2272_vm9 = vmor %vm2270_vm7, %vm2271_vm6 }
 0xd64   :  { %v2263_v55 = vsel %vm2262_vm2, %v2541_v36, %v2259_v54  ;;  %v2266_v8 = vmul.f32 %v2543_v63, %v2265_v56 }
 0xd65   :  { %v2276_v44 = vmul.f32 %v2263_v55, %v3114_v59 }
 0xd66   :  { %v2267_v57 = vmul.f32 0.5, %v2266_v8 }
 0xd67   :  { %v2282_v4 = vmul.f32 %v2461_v43, %v2276_v44 }
 0xd68   :  { %v2268_v61 = vsub.f32 1.5, %v2267_v57 }
 0xd69   :  { %v2288_v58 = vadd.f32 %v2462_v48, %v2282_v4 }
 0xd6a   :  { %v2269_v30 = vmul.f32 %v2543_v63, %v2268_v61 }
 0xd6b   :  { %2330 = vmatmul.f32.gmra.mxu0 %v2288_v58 }
 0xd6c   :  { %v2273_v62 = vsel %vm2272_vm9, %v2543_v63, %v2269_v30 }
 0xd6d   :  { %v2277_v0 = vmul.f32 %v2273_v62, %v3118_v10 }
 0xd6f   :  { %v2283_v1 = vmul.f32 %v2461_v43, %v2277_v0 }
 0xd71   :  { %v2289_v2 = vadd.f32 %v2462_v48, %v2283_v1 }
 0xd73   :  { %2333 = vmatmul.f32.gmra.mxu0 %v2289_v2 }
 0xdd8   :  { %v2325_v5 = vpop.f32.mrf.mxu0 }
 0xdd9   :  { %v2326_v47 = vadd.f32 %v2463_v3, %v2325_v5 }
 0xddb   :  { %2337 = vst [vmem:[%s3140_s2] sm:$0xff] %v2326_v47 }
 0xde0   :  { %v2328_v59 = vpop.f32.mrf.mxu0 }
 0xde1   :  { %v2329_v6 = vadd.f32 %v2463_v3, %v2328_v59 }
 0xde3   :  { %2338 = vst [vmem:[%s3140_s2 + $0x8] sm:$0xff] %v2329_v6 }
 0xde8   :  { %v2331_v9 = vpop.f32.mrf.mxu0 }
 0xde9   :  { %v2332_v12 = vadd.f32 %v2463_v3, %v2331_v9 }
 0xdeb   :  { %2339 = vst [vmem:[%s3140_s2 + $0x10] sm:$0xff] %v2332_v12 }
 0xdf0   :  { %v2334_v10 = vpop.f32.mrf.mxu0 }
 0xdf1   :  { %v2335_v13 = vadd.f32 %v2463_v3, %v2334_v10 }
 0xdf3   :  { %2340 = vst [vmem:[%s3140_s2 + $0x18] sm:$0xff] %v2335_v13 }
 0xdf4   :  { %2345 = vsyncpa [#allocation3], 1 }
 0xdf5   :  { %2346 = vsyncpa [#allocation5], 1 }

</bundles_post_ra>
